<compile_context>
chip_gen: v7x
topology: tpu7x:2x2x1
jax: 0.10.0
libtpu: 0.0.40
codegen_flags: <defaults>
</compile_context>

<pallas_src>
import jax
import jax.numpy as jnp
from jax.experimental import pallas as pl
from jax.experimental.pallas import tpu as pltpu

L = 2048            # instance feature dim (self.L)
D = 224             # attention hidden dim (self.D)
DP = 256            # D padded to a clean lane-tile width
C = 6               # len(label_mapping_rvs) (self.C), K = 1
CPAD = 128          # classifier column block padded to one lane tile
WTOT = 2 * DP + CPAD  # fused weight width: Wv | Wu | Wcls^T(+pad) = 640


def ghd_kernel(x_ref, wall_ref, ball_ref, wa_ref, ba_ref, bcls_ref, out_ref):
    bb, n, l = x_ref.shape            # (BB, N, L) f32 block (BB whole bags)
    c = out_ref.shape[-1]

    # Cast to bf16 in VMEM (no separate HBM pass in the wrapper).
    x2 = x_ref[...].reshape(bb * n, l).astype(jnp.bfloat16)          # (BB*N, L)

    # Single MXU pass over x: [x Wv | x Wu | x Wcls^T] with f32 accumulation.
    g = jnp.dot(x2, wall_ref[...],
                preferred_element_type=jnp.float32) + ball_ref[...]  # (BB*N, 640)

    # Gated attention hidden: tanh(x Wv + bv) * sigmoid(x Wu + bu).
    gated = jnp.tanh(g[:, :DP]) * jax.nn.sigmoid(g[:, DP:2 * DP])    # (BB*N, DP)

    # Per-instance classifier scores (already computed by the fused matmul).
    s = g[:, 2 * DP:2 * DP + c].reshape(bb, n, c)                    # (BB, N, C)

    # Attention logits per class (tiny matmul, bf16 inputs -> one MXU pass).
    a = jnp.dot(gated.astype(jnp.bfloat16), wa_ref[...],
                preferred_element_type=jnp.float32) + ba_ref[...]    # (BB*N, C)
    a = a.reshape(bb, n, c)

    # Per-bag softmax over the instance axis (exact denominator).
    a = a - jnp.max(a, axis=1, keepdims=True)
    e = jnp.exp(a)
    attn = e / jnp.sum(e, axis=1, keepdims=True)                     # (BB, N, C)

    # Attention-weighted sum over instances + per-class bias.
    out_ref[0] = jnp.sum(attn * s, axis=1) + bcls_ref[...]           # (BB, C)


def prepare_params(params):
    """Pad / fuse / cast the PyTorch-layout params. Call ONCE, reuse the result
    for every ghd_forward call (hoisted out of the per-call path)."""
    wv, bv, wu, bu, wa, ba, wcls, bcls = params
    pad_d = DP - D
    wv_p = jnp.pad(wv, ((0, 0), (0, pad_d)))                  # (L, DP)
    wu_p = jnp.pad(wu, ((0, 0), (0, pad_d)))                  # (L, DP)
    wc_p = jnp.pad(wcls.T, ((0, 0), (0, CPAD - C)))           # (L, CPAD)
    w_all = jnp.concatenate([wv_p, wu_p, wc_p], axis=1).astype(jnp.bfloat16)
    bv_p = jnp.pad(bv, ((0, 0), (0, pad_d)))                  # tanh(0)=0 -> pad cols = 0
    bu_p = jnp.pad(bu, ((0, 0), (0, pad_d)))
    b_all = jnp.concatenate(
        [bv_p, bu_p, jnp.zeros((1, CPAD), jnp.float32)], axis=1)      # (1, WTOT)
    wa_p = jnp.pad(wa, ((0, pad_d), (0, 0))).astype(jnp.bfloat16)     # (DP, C), zero rows
    return w_all, b_all, wa_p, ba, bcls


def _pick_bags_per_step(bs, n, target_rows=512):
    """Whole bags per grid step: enough rows to fill the MXU M dim, bounded VMEM."""
    bb = max(1, min(bs, target_rows // max(n, 1)))
    while bs % bb:
        bb -= 1
    return bb


def ghd_forward(x, prepared, target_rows=512):
    bs, n, l = x.shape
    assert l == L
    w_all, b_all, wa_p, ba, bcls = prepared

    bb = _pick_bags_per_step(bs, n, target_rows)
    grid = (bs // bb,)

    out = pl.pallas_call(
        ghd_kernel,
        out_shape=jax.ShapeDtypeStruct((bs // bb, bb, C), jnp.float32),
        grid=grid,
        in_specs=[
            pl.BlockSpec((bb, n, L), lambda i: (i, 0, 0)),     # x (f32; cast in VMEM)
            pl.BlockSpec((L, WTOT), lambda i: (0, 0)),         # fused Wv|Wu|Wcls (bf16)
            pl.BlockSpec((1, WTOT), lambda i: (0, 0)),         # fused bv|bu|0   (f32)
            pl.BlockSpec((DP, C), lambda i: (0, 0)),           # Wa padded      (bf16)
            pl.BlockSpec((1, C), lambda i: (0, 0)),            # ba
            pl.BlockSpec((1, C), lambda i: (0, 0)),            # bcls
        ],
        out_specs=pl.BlockSpec((1, bb, C), lambda i: (i, 0, 0)),
        compiler_params=pltpu.CompilerParams(
            dimension_semantics=("parallel",),                 # shard bags across TCs (v7x)
            vmem_limit_bytes=48 * 1024 * 1024),
    )(x, w_all, b_all, wa_p, ba, bcls)
    return out.reshape(bs, C)


def ghd_reference(x, params):
    """Pure-JAX reference mirroring the PyTorch forward (bf16-quantized big
    operands so it matches the kernel's mixed-precision path)."""
    wv, bv, wu, bu, wa, ba, wcls, bcls = params
    bs, n, l = x.shape
    xq = x.astype(jnp.bfloat16).astype(jnp.float32)
    wvq = wv.astype(jnp.bfloat16).astype(jnp.float32)
    wuq = wu.astype(jnp.bfloat16).astype(jnp.float32)
    wclsq = wcls.astype(jnp.bfloat16).astype(jnp.float32)
    x2 = xq.reshape(bs * n, l)
    a_v = jnp.tanh(x2 @ wvq + bv)
    a_u = jax.nn.sigmoid(x2 @ wuq + bu)
    a = (a_v * a_u) @ wa + ba                         # (bs*N, C)
    a = jax.nn.softmax(a.reshape(bs, n, C), axis=1)   # softmax over instances
    m = jnp.einsum('bnc,bnl->bcl', a, xq)             # (bs, C, L)
    y = jnp.einsum('bcl,cl->bc', m, wclsq) + bcls[0]  # (bs, C)
    return y


def init_params(key):
    ks = jax.random.split(key, 8)
    s = 0.02
    wv = jax.random.normal(ks[0], (L, D), jnp.float32) * s
    bv = jax.random.normal(ks[1], (1, D), jnp.float32) * s
    wu = jax.random.normal(ks[2], (L, D), jnp.float32) * s
    bu = jax.random.normal(ks[3], (1, D), jnp.float32) * s
    wa = jax.random.normal(ks[4], (D, C), jnp.float32) * s
    ba = jax.random.normal(ks[5], (1, C), jnp.float32) * s
    wcls = jax.random.normal(ks[6], (C, L), jnp.float32) * s
    bcls = jax.random.normal(ks[7], (1, C), jnp.float32) * s
    return (wv, bv, wu, bu, wa, ba, wcls, bcls)


if __name__ == "__main__":
    key = jax.random.PRNGKey(0)
    k_param, k_x = jax.random.split(key)

    bs, num_instances = 2, 8
    params = init_params(k_param)
    x = jax.random.normal(k_x, (bs, num_instances, L), jnp.float32)

    # Weight prep runs ONCE (not per forward call).
    prepared = jax.tree_util.tree_map(jax.block_until_ready, prepare_params(params))

    y = jax.block_until_ready(ghd_forward(x, prepared))
    y_ref = jax.block_until_ready(ghd_reference(x, params))

    assert y.shape == (bs, C), y.shape
    assert jnp.allclose(y, y_ref, atol=1e-2, rtol=1e-2), (y, y_ref)
    print("KERNEL_OK")
</pallas_src>

<mosaic_0001>
module attributes {stable_mosaic.version = 11 : i64} {
  func.func @ghd_kernel(%arg0: i32, %arg1: memref<2x8x2048xf32, #tpu.memory_space<vmem>>, %arg2: memref<2048x640xbf16, #tpu.memory_space<vmem>>, %arg3: memref<1x640xf32, #tpu.memory_space<vmem>>, %arg4: memref<256x6xbf16, #tpu.memory_space<vmem>>, %arg5: memref<1x6xf32, #tpu.memory_space<vmem>>, %arg6: memref<1x6xf32, #tpu.memory_space<vmem>>, %arg7: memref<1x2x6xf32, #tpu.memory_space<vmem>>) attributes {dimension_semantics = [#tpu.dimension_semantics<parallel>], iteration_bounds = array<i64: 1>, scalar_prefetch = 0 : i64, scratch_operands = 0 : i64, tpu.core_type = #tpu.core_type<tc>, window_params = [{transform_indices = @transform_0, window_bounds = array<i64: 2, 8, 2048>}, {pipeline_mode = #tpu.pipeline_mode<synchronous>, transform_indices = @transform_1, window_bounds = array<i64: 2048, 640>}, {pipeline_mode = #tpu.pipeline_mode<synchronous>, transform_indices = @transform_2, window_bounds = array<i64: 1, 640>}, {pipeline_mode = #tpu.pipeline_mode<synchronous>, transform_indices = @transform_3, window_bounds = array<i64: 256, 6>}, {pipeline_mode = #tpu.pipeline_mode<synchronous>, transform_indices = @transform_4, window_bounds = array<i64: 1, 6>}, {pipeline_mode = #tpu.pipeline_mode<synchronous>, transform_indices = @transform_5, window_bounds = array<i64: 1, 6>}, {transform_indices = @transform_6, window_bounds = array<i64: 1, 2, 6>}]} {
    %c0 = arith.constant 0 : index
    %c0_0 = arith.constant 0 : index
    %c0_1 = arith.constant 0 : index
    %0 = vector.load %arg1[%c0, %c0_0, %c0_1] : memref<2x8x2048xf32, #tpu.memory_space<vmem>>, vector<2x8x2048xf32>
    %1 = vector.shape_cast %0 : vector<2x8x2048xf32> to vector<16x2048xf32>
    %2 = arith.truncf %1 : vector<16x2048xf32> to vector<16x2048xbf16>
    %c0_2 = arith.constant 0 : index
    %c0_3 = arith.constant 0 : index
    %3 = vector.load %arg2[%c0_2, %c0_3] : memref<2048x640xbf16, #tpu.memory_space<vmem>>, vector<2048x640xbf16>
    %cst = arith.constant dense<0.000000e+00> : vector<16x640xf32>
    %4 = tpu.matmul %2, %3, %cst {dimension_numbers = #tpu.dot_dimension_numbers<[1], [0], [0], [1], [0, 0, 1, 1], [], []>} : vector<16x2048xbf16>, vector<2048x640xbf16>, vector<16x640xf32> -> vector<16x640xf32>
    %c0_4 = arith.constant 0 : index
    %c0_5 = arith.constant 0 : index
    %5 = vector.load %arg3[%c0_4, %c0_5] : memref<1x640xf32, #tpu.memory_space<vmem>>, vector<1x640xf32>
    %6 = vector.broadcast %5 : vector<1x640xf32> to vector<16x640xf32>
    %7 = arith.addf %4, %6 : vector<16x640xf32>
    %8 = vector.extract_strided_slice %7 {offsets = [0, 0], sizes = [16, 256], strides = [1, 1]} : vector<16x640xf32> to vector<16x256xf32>
    %9 = math.tanh %8 : vector<16x256xf32>
    %10 = vector.extract_strided_slice %7 {offsets = [0, 256], sizes = [16, 256], strides = [1, 1]} : vector<16x640xf32> to vector<16x256xf32>
    %11 = arith.negf %10 : vector<16x256xf32>
    %12 = math.exp %11 : vector<16x256xf32>
    %cst_6 = arith.constant 1.000000e+00 : f32
    %13 = vector.broadcast %cst_6 : f32 to vector<16x256xf32>
    %14 = arith.addf %13, %12 : vector<16x256xf32>
    %15 = arith.divf %13, %14 : vector<16x256xf32>
    %16 = arith.mulf %9, %15 : vector<16x256xf32>
    %17 = vector.extract_strided_slice %7 {offsets = [0, 512], sizes = [16, 6], strides = [1, 1]} : vector<16x640xf32> to vector<16x6xf32>
    %18 = vector.shape_cast %17 : vector<16x6xf32> to vector<2x8x6xf32>
    %19 = arith.truncf %16 : vector<16x256xf32> to vector<16x256xbf16>
    %c0_7 = arith.constant 0 : index
    %c0_8 = arith.constant 0 : index
    %20 = vector.load %arg4[%c0_7, %c0_8] : memref<256x6xbf16, #tpu.memory_space<vmem>>, vector<256x6xbf16>
    %cst_9 = arith.constant dense<0.000000e+00> : vector<16x6xf32>
    %21 = tpu.matmul %19, %20, %cst_9 {dimension_numbers = #tpu.dot_dimension_numbers<[1], [0], [0], [1], [0, 0, 1, 1], [], []>} : vector<16x256xbf16>, vector<256x6xbf16>, vector<16x6xf32> -> vector<16x6xf32>
    %c0_10 = arith.constant 0 : index
    %c0_11 = arith.constant 0 : index
    %22 = vector.load %arg5[%c0_10, %c0_11] : memref<1x6xf32, #tpu.memory_space<vmem>>, vector<1x6xf32>
    %23 = vector.broadcast %22 : vector<1x6xf32> to vector<16x6xf32>
    %24 = arith.addf %21, %23 : vector<16x6xf32>
    %25 = vector.shape_cast %24 : vector<16x6xf32> to vector<2x8x6xf32>
    %cst_12 = arith.constant dense<0xFF800000> : vector<2x6xf32>
    %26 = vector.multi_reduction <maximumf>, %25, %cst_12 [1] : vector<2x8x6xf32> to vector<2x6xf32>
    %27 = vector.shape_cast %26 : vector<2x6xf32> to vector<2x1x6xf32>
    %28 = vector.broadcast %27 : vector<2x1x6xf32> to vector<2x8x6xf32>
    %29 = arith.subf %25, %28 : vector<2x8x6xf32>
    %30 = math.exp %29 : vector<2x8x6xf32>
    %cst_13 = arith.constant dense<0.000000e+00> : vector<2x6xf32>
    %31 = vector.multi_reduction <add>, %30, %cst_13 [1] : vector<2x8x6xf32> to vector<2x6xf32>
    %32 = vector.shape_cast %31 : vector<2x6xf32> to vector<2x1x6xf32>
    %33 = vector.broadcast %32 : vector<2x1x6xf32> to vector<2x8x6xf32>
    %34 = arith.divf %30, %33 : vector<2x8x6xf32>
    %35 = arith.mulf %34, %18 : vector<2x8x6xf32>
    %cst_14 = arith.constant dense<0.000000e+00> : vector<2x6xf32>
    %36 = vector.multi_reduction <add>, %35, %cst_14 [1] : vector<2x8x6xf32> to vector<2x6xf32>
    %c0_15 = arith.constant 0 : index
    %c0_16 = arith.constant 0 : index
    %37 = vector.load %arg6[%c0_15, %c0_16] : memref<1x6xf32, #tpu.memory_space<vmem>>, vector<1x6xf32>
    %38 = vector.broadcast %37 : vector<1x6xf32> to vector<2x6xf32>
    %39 = arith.addf %36, %38 : vector<2x6xf32>
    %c0_17 = arith.constant 0 : index
    %c0_18 = arith.constant 0 : index
    %c0_19 = arith.constant 0 : index
    %40 = vector.load %arg7[%c0_17, %c0_18, %c0_19] : memref<1x2x6xf32, #tpu.memory_space<vmem>>, vector<1x2x6xf32>
    %41 = vector.shape_cast %40 : vector<1x2x6xf32> to vector<2x6xf32>
    %42 = vector.shape_cast %39 : vector<2x6xf32> to vector<1x2x6xf32>
    tpu.vector_store %arg7[%c0_17, %c0_18, %c0_19], %42 {strides = array<i32>} : memref<1x2x6xf32, #tpu.memory_space<vmem>>, vector<1x2x6xf32>,
    return
  }
  func.func @transform_0(%arg0: i32) -> (i32, i32, i32) {
    %c0_i32 = arith.constant 0 : i32
    %c0_i32_0 = arith.constant 0 : i32
    %c0_i32_1 = arith.constant 0 : i32
    return %arg0, %c0_i32, %c0_i32_0 : i32, i32, i32
  }
  func.func @transform_1(%arg0: i32) -> (i32, i32) {
    %c0_i32 = arith.constant 0 : i32
    %c0_i32_0 = arith.constant 0 : i32
    %c0_i32_1 = arith.constant 0 : i32
    return %c0_i32, %c0_i32_0 : i32, i32
  }
  func.func @transform_2(%arg0: i32) -> (i32, i32) {
    %c0_i32 = arith.constant 0 : i32
    %c0_i32_0 = arith.constant 0 : i32
    %c0_i32_1 = arith.constant 0 : i32
    return %c0_i32, %c0_i32_0 : i32, i32
  }
  func.func @transform_3(%arg0: i32) -> (i32, i32) {
    %c0_i32 = arith.constant 0 : i32
    %c0_i32_0 = arith.constant 0 : i32
    %c0_i32_1 = arith.constant 0 : i32
    return %c0_i32, %c0_i32_0 : i32, i32
  }
  func.func @transform_4(%arg0: i32) -> (i32, i32) {
    %c0_i32 = arith.constant 0 : i32
    %c0_i32_0 = arith.constant 0 : i32
    %c0_i32_1 = arith.constant 0 : i32
    return %c0_i32, %c0_i32_0 : i32, i32
  }
  func.func @transform_5(%arg0: i32) -> (i32, i32) {
    %c0_i32 = arith.constant 0 : i32
    %c0_i32_0 = arith.constant 0 : i32
    %c0_i32_1 = arith.constant 0 : i32
    return %c0_i32, %c0_i32_0 : i32, i32
  }
  func.func @transform_6(%arg0: i32) -> (i32, i32, i32) {
    %c0_i32 = arith.constant 0 : i32
    %c0_i32_0 = arith.constant 0 : i32
    %c0_i32_1 = arith.constant 0 : i32
    return %arg0, %c0_i32, %c0_i32_0 : i32, i32, i32
  }
}

</mosaic_0001>

<bundles_post_ra>
// kernel: tpu_custom_call.1
= control target key start
LH: loop header
LB: loop body
LE: loop exit
PB: predicated region body
PF: predicated region fallthrough
CT: control target
= control target key end

     0   :  { %11 = vsyncpa [#allocation3], 0  ;;  %s7849_s0 = inlined_call_operand.hbm [shape: f32[2,8,2048], index: 0, kind: input, shape index: {}]   ;;  %s7850_s1 = inlined_call_operand.hbm [shape: bf16[2048,640], index: 1, kind: input, shape index: {}]   ;;  %s7851_s2 = inlined_call_operand.hbm [shape: f32[1,640], index: 2, kind: input, shape index: {}]   ;;  %s7852_s3 = inlined_call_operand.vmem [shape: bf16[256,6], index: 3, kind: input, shape index: {}]   ;;  %s7853_s4 = inlined_call_operand.hbm [shape: f32[1,6], index: 4, kind: input, shape index: {}]   ;;  %s7854_s5 = inlined_call_operand.hbm [shape: f32[1,6], index: 5, kind: input, shape index: {}]   ;;  %s7855_s6 = inlined_call_operand.hbm [shape: f32[1,2,6], index: 6, kind: output, shape index: {}]  }
   0x1   :  { %12 = vsyncpa [#allocation6], 0 }
   0x2   :  { %13 = vsyncpa [#allocation9], 0 }
   0x3   :  { %14 = vsyncpa [#allocation4], 0  ;;  %s7591_s21 = smov [#allocation5]   ;;  %s7451_s25 = scalar_lea.hbm %s7850_s1, 81920 }
   0x4   :  { %s32_s22 = sshll.u32 %s7591_s21, 4  ;;  %p7452_p0 = scmp.ne.s32.totalorder %s7850_s1, %s7451_s25  ;;  %s33_s22 = int_to_ptr.vmem [resolvable:$true] %s32_s22 }
   0x5   :  { %p7455_p1 = scmp.lt.u32.totalorder %s7451_s25, %s7850_s1 }
   0x7   :  { %p7457_p2 = pnand %p7455_p1, %p7452_p0 }
   0x9   :  { %7460 = shalt.err (!%p7457_p2)
}
   0xa   :  { %s7461_s30 = scalar_lea.vmem %s33_s22, 81920  ;;  %p7466_p4 = scmp.lt.s32.totalorder %s33_s22, %s33_s22 }
   0xb   :  { %p7462_p3 = scmp.ne.s32.totalorder %s33_s22, %s7461_s30  ;;  %p7467_p5 = scmp.lt.s32.totalorder %s7461_s30, %s7461_s30 }
   0xd   :  { %p7468_p6 = por %p7467_p5, %p7466_p4 }
   0xf   :  { %p7469_p7 = pnand %p7468_p6, %p7462_p3 }
  0x11   :  { %7472 = shalt.err (!%p7469_p7)
}
  0x12   :  { %s7592_s7 = smov 320   ;;  %s7593_s8 = smov 20  }
  0x13   :  { %38 = dma.hbm_to_vmem [thread:$0]  %s7850_s1, 81920, %s33_s22, [#allocation6], %s7592_s7, %s7592_s7, %s7593_s8  }
  0x14   :  { %s7594_s11 = smov [#allocation8]   ;;  %s7595_s13 = smov [#allocation2]  }
  0x15   :  { %s57_s12 = sshll.u32 %s7594_s11, 4  ;;  %s20_s14 = sshll.u32 %s7595_s13, 4  ;;  %s58_s12 = int_to_ptr.vmem [resolvable:$true] %s57_s12  ;;  %s21_s14 = int_to_ptr.vmem [resolvable:$true] %s20_s14 }
  0x16   :  { %s7473_s17 = scalar_lea.hbm %s7853_s4, 16 }
  0x17   :  { %p7474_p8 = scmp.ne.s32.totalorder %s7853_s4, %s7473_s17  ;;  %p7477_p9 = scmp.lt.u32.totalorder %s7473_s17, %s7853_s4 }
  0x19   :  { %p7479_p10 = pnand %p7477_p9, %p7474_p8 }
  0x1b   :  { %7482 = shalt.err (!%p7479_p10)
}
  0x1c   :  { %s7483_s1 = scalar_lea.vmem %s58_s12, 16  ;;  %s7487_s22 = scalar_lea.vmem %s58_s12, 32 }
  0x1d   :  { %p7484_p11 = scmp.ne.s32.totalorder %s58_s12, %s7483_s1  ;;  %p7488_p12 = scmp.lt.s32.totalorder %s58_s12, %s58_s12 }
  0x1e   :  { %p7489_p13 = scmp.lt.s32.totalorder %s7487_s22, %s7483_s1 }
  0x20   :  { %p7490_p0 = por %p7489_p13, %p7488_p12 }
  0x22   :  { %p7491_p1 = pnand %p7490_p0, %p7484_p11 }
  0x24   :  { %7494 = shalt.err (!%p7491_p1)
}
  0x25   :  { %60 = dma.hbm_to_vmem [thread:$0]  %s7853_s4, 16, %s58_s12, [#allocation9]  }
  0x26   :  { %s7495_s27 = scalar_lea.hbm %s7849_s0, 4096 }
  0x27   :  { %p7496_p2 = scmp.ne.s32.totalorder %s7849_s0, %s7495_s27  ;;  %p7499_p3 = scmp.lt.u32.totalorder %s7495_s27, %s7849_s0 }
  0x29   :  { %p7501_p4 = pnand %p7499_p3, %p7496_p2 }
  0x2b   :  { %7504 = shalt.err (!%p7501_p4)
}
  0x2c   :  { %s7505_s8 = scalar_lea.vmem %s21_s14, 4096  ;;  %p7510_p6 = scmp.lt.s32.totalorder %s21_s14, %s21_s14 }
  0x2d   :  { %p7506_p5 = scmp.ne.s32.totalorder %s21_s14, %s7505_s8  ;;  %p7511_p7 = scmp.lt.s32.totalorder %s7505_s8, %s7505_s8 }
  0x2f   :  { %p7512_p8 = por %p7511_p7, %p7510_p6 }
  0x31   :  { %p7513_p9 = pnand %p7512_p8, %p7506_p5 }
  0x33   :  { %7516 = shalt.err (!%p7513_p9)
}
  0x34   :  { %s7596_s4 = smov 2048   ;;  %s7597_s9 = smov 128  }
  0x35   :  { %26 = dma.hbm_to_vmem [thread:$0]  %s7849_s0, 4096, %s21_s14, [#allocation3], %s7596_s4, %s7596_s4, %s7597_s9  }
  0x36   :  { %s7598_s12 = smov [#allocation7]   ;;  %s7599_s15 = smov [#allocation10]  }
  0x37   :  { %s45_s13 = sshll.u32 %s7598_s12, 4  ;;  %s67_s16 = sshll.u32 %s7599_s15, 4  ;;  %s46_s13 = int_to_ptr.vmem [resolvable:$true] %s45_s13  ;;  %s68_s16 = int_to_ptr.vmem [resolvable:$true] %s67_s16 }
  0x38   :  { %s7517_s19 = scalar_lea.hbm %s7851_s2, 80 }
  0x39   :  { %p7518_p10 = scmp.ne.s32.totalorder %s7851_s2, %s7517_s19  ;;  %p7521_p11 = scmp.lt.u32.totalorder %s7517_s19, %s7851_s2 }
  0x3b   :  { %p7523_p12 = pnand %p7521_p11, %p7518_p10 }
  0x3d   :  { %7526 = shalt.err (!%p7523_p12)
}
  0x3e   :  { %s7527_s0 = scalar_lea.vmem %s46_s13, 80  ;;  %s7531_s14 = scalar_lea.vmem %s46_s13, 96 }
  0x3f   :  { %p7528_p13 = scmp.ne.s32.totalorder %s46_s13, %s7527_s0  ;;  %p7532_p0 = scmp.lt.s32.totalorder %s46_s13, %s46_s13 }
  0x40   :  { %p7533_p1 = scmp.lt.s32.totalorder %s7531_s14, %s7527_s0 }
  0x42   :  { %p7534_p2 = por %p7533_p1, %p7532_p0 }
  0x44   :  { %p7535_p3 = pnand %p7534_p2, %p7528_p13 }
  0x46   :  { %7538 = shalt.err (!%p7535_p3)
}
  0x47   :  { %48 = dma.hbm_to_vmem [thread:$0]  %s7851_s2, 80, %s46_s13, [#allocation6]  }
  0x48   :  { %s7539_s27 = scalar_lea.hbm %s7854_s5, 16 }
  0x49   :  { %p7540_p4 = scmp.ne.s32.totalorder %s7854_s5, %s7539_s27  ;;  %p7543_p5 = scmp.lt.u32.totalorder %s7539_s27, %s7854_s5 }
  0x4b   :  { %p7545_p6 = pnand %p7543_p5, %p7540_p4 }
  0x4d   :  { %7548 = shalt.err (!%p7545_p6)
}
  0x4e   :  { %s7549_s8 = scalar_lea.vmem %s68_s16, 16  ;;  %s7553_s4 = scalar_lea.vmem %s68_s16, 32 }
  0x4f   :  { %p7550_p7 = scmp.ne.s32.totalorder %s68_s16, %s7549_s8  ;;  %p7554_p8 = scmp.lt.s32.totalorder %s68_s16, %s68_s16 }
  0x50   :  { %p7555_p9 = scmp.lt.s32.totalorder %s7553_s4, %s7549_s8 }
  0x52   :  { %p7556_p10 = por %p7555_p9, %p7554_p8 }
  0x54   :  { %p7557_p11 = pnand %p7556_p10, %p7550_p7 }
  0x56   :  { %7560 = shalt.err (!%p7557_p11)
}
  0x57   :  { %70 = dma.hbm_to_vmem [thread:$0]  %s7854_s5, 16, %s68_s16, [#allocation9]  }
  0x58   :  { %7583 = dma.done.wait [#allocation3], 4096  }
  0x59   :  { %7584 = vsyncadd [#allocation3], 4294963200 }
  0x5a   :  { %7585 = dma.done.wait [#allocation6], 82000  }
  0x5b   :  { %7586 = vsyncadd [#allocation6], 4294885296 }
  0x5c   :  { %7587 = dma.done.wait [#allocation9], 32  }
  0x5d   :  { %7588 = vsyncadd [#allocation9], 4294967264  ;;  %v6507_v0 = vld [vmem:[#allocation5 + $0x4] ss:$20 sps:$4 sm:$0xff]   ;;  %v6509_v1 = vld [vmem:[#allocation5 + $0xc] ss:$20 sps:$4 sm:$0xff]  }
  0x5e   :  { %4258 = vmatprep.subr.bf16.mxu0 %v6507_v0  ;;  %v6511_v2 = vld [vmem:[#allocation5] ss:$20 sps:$4 sm:$0xff]   ;;  %v6512_v3 = vld [vmem:[#allocation5 + $0x8] ss:$20 sps:$4 sm:$0xff]   ;;  %4602 = vmatprep.subr.bf16.mxu1 %v6509_v1  ;;  %v6518_v7 = vld [vmem:[#allocation5 + $0x30] ss:$20 sps:$4 sm:$0xff]  }
  0x5f   :  { %v6513_v4 = vld [vmem:[#allocation5 + $0x2c] ss:$20 sps:$4 sm:$0xff]   ;;  %4259 = vmatpush1.bf16.msra.mxu0 %v6511_v2  ;;  %4603 = vmatpush1.bf16.msra.mxu1 %v6512_v3  ;;  %v6515_v5 = vld [vmem:[#allocation5 + $0x34] ss:$20 sps:$4 sm:$0xff]   ;;  %v6521_v9 = vld [vmem:[#allocation5 + $0x5c] ss:$20 sps:$4 sm:$0xff]  }
  0x60   :  { %v6517_v6 = vld [vmem:[#allocation5 + $0x28] ss:$20 sps:$4 sm:$0xff]   ;;  %4260 = vmatprep.subr.bf16.mxu0 %v6513_v4  ;;  %4604 = vmatprep.subr.bf16.mxu1 %v6515_v5  ;;  %v6523_v10 = vld [vmem:[#allocation5 + $0x50] ss:$20 sps:$4 sm:$0xff]   ;;  %v6524_v11 = vld [vmem:[#allocation5 + $0x58] ss:$20 sps:$4 sm:$0xff]  }
  0x61   :  { %v6519_v8 = vld [vmem:[#allocation5 + $0x54] ss:$20 sps:$4 sm:$0xff]   ;;  %v6525_v12 = vld [vmem:[#allocation5 + $0x7c] ss:$20 sps:$4 sm:$0xff]   ;;  %v6527_v13 = vld [vmem:[#allocation5 + $0x84] ss:$20 sps:$4 sm:$0xff]  }
  0x62   :  { %v6529_v14 = vld [vmem:[#allocation5 + $0x78] ss:$20 sps:$4 sm:$0xff]   ;;  %v6530_v15 = vld [vmem:[#allocation5 + $0x80] ss:$20 sps:$4 sm:$0xff]   ;;  %v6536_v19 = vld [vmem:[#allocation5 + $0xa8] ss:$20 sps:$4 sm:$0xff]  }
  0x63   :  { %4261 = vmatpush1.bf16.msra.mxu0 %v6517_v6  ;;  %4605 = vmatpush1.bf16.msra.mxu1 %v6518_v7  ;;  %v6531_v16 = vld [vmem:[#allocation5 + $0xa4] ss:$20 sps:$4 sm:$0xff]   ;;  %v6533_v17 = vld [vmem:[#allocation5 + $0xac] ss:$20 sps:$4 sm:$0xff]   ;;  %v6539_v21 = vld [vmem:[#allocation5 + $0xd4] ss:$20 sps:$4 sm:$0xff]  }
  0x64   :  { %4262 = vmatprep.subr.bf16.mxu0 %v6519_v8  ;;  %4606 = vmatprep.subr.bf16.mxu1 %v6521_v9  ;;  %v6535_v18 = vld [vmem:[#allocation5 + $0xa0] ss:$20 sps:$4 sm:$0xff]   ;;  %v6541_v22 = vld [vmem:[#allocation5 + $0xc8] ss:$20 sps:$4 sm:$0xff]   ;;  %v6542_v23 = vld [vmem:[#allocation5 + $0xd0] ss:$20 sps:$4 sm:$0xff]  }
  0x65   :  { %v6537_v20 = vld [vmem:[#allocation5 + $0xcc] ss:$20 sps:$4 sm:$0xff]   ;;  %v6543_v24 = vld [vmem:[#allocation5 + $0xf4] ss:$20 sps:$4 sm:$0xff]   ;;  %v6545_v25 = vld [vmem:[#allocation5 + $0xfc] ss:$20 sps:$4 sm:$0xff]  }
  0x66   :  { %v6547_v26 = vld [vmem:[#allocation5 + $0xf0] ss:$20 sps:$4 sm:$0xff]   ;;  %v6548_v27 = vld [vmem:[#allocation5 + $0xf8] ss:$20 sps:$4 sm:$0xff]   ;;  %v6554_v31 = vld [vmem:[#allocation5 + $0x120] ss:$20 sps:$4 sm:$0xff]  }
  0x67   :  { %4263 = vmatpush1.bf16.msra.mxu0 %v6523_v10  ;;  %4607 = vmatpush1.bf16.msra.mxu1 %v6524_v11  ;;  %v6549_v28 = vld [vmem:[#allocation5 + $0x11c] ss:$20 sps:$4 sm:$0xff]   ;;  %v6551_v29 = vld [vmem:[#allocation5 + $0x124] ss:$20 sps:$4 sm:$0xff]   ;;  %v6557_v33 = vld [vmem:[#allocation5 + $0x14c] ss:$20 sps:$4 sm:$0xff]  }
  0x68   :  { %4264 = vmatprep.subr.bf16.mxu0 %v6525_v12  ;;  %4608 = vmatprep.subr.bf16.mxu1 %v6527_v13  ;;  %v6553_v30 = vld [vmem:[#allocation5 + $0x118] ss:$20 sps:$4 sm:$0xff]   ;;  %v6559_v34 = vld [vmem:[#allocation5 + $0x140] ss:$20 sps:$4 sm:$0xff]   ;;  %v6560_v35 = vld [vmem:[#allocation5 + $0x148] ss:$20 sps:$4 sm:$0xff]  }
  0x69   :  { %v6555_v32 = vld [vmem:[#allocation5 + $0x144] ss:$20 sps:$4 sm:$0xff]   ;;  %v6561_v36 = vld [vmem:[#allocation5 + $0x16c] ss:$20 sps:$4 sm:$0xff]   ;;  %v6563_v37 = vld [vmem:[#allocation5 + $0x174] ss:$20 sps:$4 sm:$0xff]  }
  0x6a   :  { %v6565_v38 = vld [vmem:[#allocation5 + $0x168] ss:$20 sps:$4 sm:$0xff]   ;;  %v6566_v39 = vld [vmem:[#allocation5 + $0x170] ss:$20 sps:$4 sm:$0xff]   ;;  %v6572_v43 = vld [vmem:[#allocation5 + $0x198] ss:$20 sps:$4 sm:$0xff]  }
  0x6b   :  { %4265 = vmatpush1.bf16.msra.mxu0 %v6529_v14  ;;  %4609 = vmatpush1.bf16.msra.mxu1 %v6530_v15  ;;  %v6567_v40 = vld [vmem:[#allocation5 + $0x194] ss:$20 sps:$4 sm:$0xff]   ;;  %v6569_v41 = vld [vmem:[#allocation5 + $0x19c] ss:$20 sps:$4 sm:$0xff]   ;;  %v6575_v45 = vld [vmem:[#allocation5 + $0x1c4] ss:$20 sps:$4 sm:$0xff]  }
  0x6c   :  { %4266 = vmatprep.subr.bf16.mxu0 %v6531_v16  ;;  %4610 = vmatprep.subr.bf16.mxu1 %v6533_v17  ;;  %v6571_v42 = vld [vmem:[#allocation5 + $0x190] ss:$20 sps:$4 sm:$0xff]   ;;  %v88_v46 = vld [vmem:[#allocation2 + $0x8] sm:$0xff]  ;;  %v6578_v49 = vld [vmem:[#allocation5 + $0x1c0] ss:$20 sps:$4 sm:$0xff]   ;;  %vm5484_vm0 = vcmask 48128  }
  0x6d   :  { %v6573_v44 = vld [vmem:[#allocation5 + $0x1bc] ss:$20 sps:$4 sm:$0xff]   ;;  %v104_v47 = vld [vmem:[#allocation2 + $0x88] sm:$0xff]  ;;  %v6579_v51 = vld [vmem:[#allocation5 + $0x1e4] ss:$20 sps:$4 sm:$0xff]   ;;  %vm5551_vm1 = vcmask 1041409  }
  0x6e   :  { %v6577_v48 = vld [vmem:[#allocation5 + $0x1b8] ss:$20 sps:$4 sm:$0xff]   ;;  %v7696_v50 = vpack.c.bf16 %v104_v47, %v88_v46  ;;  %v6583_v53 = vld [vmem:[#allocation5 + $0x1e0] ss:$20 sps:$4 sm:$0xff]   ;;  %v6584_v54 = vld [vmem:[#allocation5 + $0x1e8] ss:$20 sps:$4 sm:$0xff]  }
  0x6f   :  { %4267 = vmatpush1.bf16.msra.mxu0 %v6535_v18  ;;  %4611 = vmatpush1.bf16.msra.mxu1 %v6536_v19  ;;  %v6581_v52 = vld [vmem:[#allocation5 + $0x1ec] ss:$20 sps:$4 sm:$0xff]   ;;  %v6587_v56 = vld [vmem:[#allocation5 + $0x214] ss:$20 sps:$4 sm:$0xff]   ;;  %v6590_v58 = vld [vmem:[#allocation5 + $0x210] ss:$20 sps:$4 sm:$0xff]  }
  0x70   :  { %4268 = vmatprep.subr.bf16.mxu0 %v6537_v20  ;;  %4612 = vmatprep.subr.bf16.mxu1 %v6539_v21  ;;  %v6585_v55 = vld [vmem:[#allocation5 + $0x20c] ss:$20 sps:$4 sm:$0xff]   ;;  %v6589_v57 = vld [vmem:[#allocation5 + $0x208] ss:$20 sps:$4 sm:$0xff]   ;;  %v6595_v61 = vld [vmem:[#allocation5 + $0x230] ss:$20 sps:$4 sm:$0xff]  }
  0x71   :  { %4290 = vmatprep.mubr.bf16.mxu0 %v7696_v50  ;;  %4634 = vmatprep.mubr.bf16.mxu1 %v7696_v50  ;;  %v6591_v59 = vld [vmem:[#allocation5 + $0x234] ss:$20 sps:$4 sm:$0xff]   ;;  %v6593_v60 = vld [vmem:[#allocation5 + $0x23c] ss:$20 sps:$4 sm:$0xff]   ;;  %v6596_v62 = vld [vmem:[#allocation5 + $0x238] ss:$20 sps:$4 sm:$0xff]  }
  0x72   :  { %v6597_v63 = vld [vmem:[#allocation5 + $0x25c] ss:$20 sps:$4 sm:$0xff]   ;;  %v6599_v0 = vld [vmem:[#allocation5 + $0x264] ss:$20 sps:$4 sm:$0xff]   ;;  %v6602_v2 = vld [vmem:[#allocation5 + $0x260] ss:$20 sps:$4 sm:$0xff]  }
  0x73   :  { %4269 = vmatpush1.bf16.msra.mxu0 %v6541_v22  ;;  %4613 = vmatpush1.bf16.msra.mxu1 %v6542_v23  ;;  %v6601_v1 = vld [vmem:[#allocation5 + $0x258] ss:$20 sps:$4 sm:$0xff]   ;;  %v87_v4 = vld [vmem:[#allocation2] sm:$0xff]  ;;  %v6606_v8 = vld [vmem:[#allocation5 + $0x288] ss:$20 sps:$4 sm:$0xff]   ;;  %vm5554_vm2 = vcmask 41984  }
  0x74   :  { %4270 = vmatprep.subr.bf16.mxu0 %v6543_v24  ;;  %4614 = vmatprep.subr.bf16.mxu1 %v6545_v25  ;;  %v6605_v3 = vld [vmem:[#allocation5 + $0x284] ss:$20 sps:$4 sm:$0xff]   ;;  %v6608_v6 = vld [vmem:[#allocation5 + $0x28c] ss:$20 sps:$4 sm:$0xff]   ;;  %v6614_v11 = vld [vmem:[#allocation5 + $0x2b4] ss:$20 sps:$4 sm:$0xff]  }
  0x75   :  { %v103_v5 = vld [vmem:[#allocation2 + $0x80] sm:$0xff]  ;;  %v6609_v12 = vld [vmem:[#allocation5 + $0x2a8] ss:$20 sps:$4 sm:$0xff]   ;;  %v6618_v17 = vld [vmem:[#allocation5 + $0x2d8] ss:$20 sps:$4 sm:$0xff]  }
  0x76   :  { %v6603_v7 = vld [vmem:[#allocation5 + $0x280] ss:$20 sps:$4 sm:$0xff]   ;;  %v7700_v9 = vpack.c.bf16 %v103_v5, %v87_v4  ;;  %v6612_v13 = vld [vmem:[#allocation5 + $0x2b0] ss:$20 sps:$4 sm:$0xff]   ;;  %v6621_v20 = vld [vmem:[#allocation5 + $0x2f8] ss:$20 sps:$4 sm:$0xff]  }
  0x77   :  { %4271 = vmatpush1.bf16.msra.mxu0 %v6547_v26  ;;  %4615 = vmatpush1.bf16.msra.mxu1 %v6548_v27  ;;  %v6611_v10 = vld [vmem:[#allocation5 + $0x2ac] ss:$20 sps:$4 sm:$0xff]   ;;  %v6617_v14 = vld [vmem:[#allocation5 + $0x2d4] ss:$20 sps:$4 sm:$0xff]   ;;  %v6620_v15 = vld [vmem:[#allocation5 + $0x2dc] ss:$20 sps:$4 sm:$0xff]  }
  0x78   :  { %4272 = vmatprep.subr.bf16.mxu0 %v6549_v28  ;;  %4616 = vmatprep.subr.bf16.mxu1 %v6551_v29  ;;  %v6615_v16 = vld [vmem:[#allocation5 + $0x2d0] ss:$20 sps:$4 sm:$0xff]   ;;  %v6624_v21 = vld [vmem:[#allocation5 + $0x300] ss:$20 sps:$4 sm:$0xff]   ;;  %v6630_v25 = vld [vmem:[#allocation5 + $0x328] ss:$20 sps:$4 sm:$0xff]  }
  0x79   :  { %v6623_v18 = vld [vmem:[#allocation5 + $0x2fc] ss:$20 sps:$4 sm:$0xff]   ;;  %v6626_v19 = vld [vmem:[#allocation5 + $0x304] ss:$20 sps:$4 sm:$0xff]   ;;  %v6632_v23 = vld [vmem:[#allocation5 + $0x32c] ss:$20 sps:$4 sm:$0xff]  }
  0x7a   :  { %v6629_v22 = vld [vmem:[#allocation5 + $0x324] ss:$20 sps:$4 sm:$0xff]   ;;  %v6627_v24 = vld [vmem:[#allocation5 + $0x320] ss:$20 sps:$4 sm:$0xff]   ;;  %v6633_v28 = vld [vmem:[#allocation5 + $0x348] ss:$20 sps:$4 sm:$0xff]  }
  0x7b   :  { %4273 = vmatpush1.bf16.msra.mxu0 %v6553_v30  ;;  %4617 = vmatpush1.bf16.msra.mxu1 %v6554_v31  ;;  %v6635_v26 = vld [vmem:[#allocation5 + $0x34c] ss:$20 sps:$4 sm:$0xff]   ;;  %v6638_v27 = vld [vmem:[#allocation5 + $0x354] ss:$20 sps:$4 sm:$0xff]   ;;  %v6636_v29 = vld [vmem:[#allocation5 + $0x350] ss:$20 sps:$4 sm:$0xff]  }
  0x7c   :  { %4274 = vmatprep.subr.bf16.mxu0 %v6555_v32  ;;  %4618 = vmatprep.subr.bf16.mxu1 %v6557_v33  ;;  %v6641_v30 = vld [vmem:[#allocation5 + $0x374] ss:$20 sps:$4 sm:$0xff]   ;;  %v6644_v31 = vld [vmem:[#allocation5 + $0x37c] ss:$20 sps:$4 sm:$0xff]   ;;  %v6690_v5 = vld [vmem:[#allocation5 + $0x4b8] ss:$20 sps:$4 sm:$0xff]  }
  0x7d   :  { %v90_v32 = vld [vmem:[#allocation2 + $0x18] sm:$0xff]  ;;  %v6662_v46 = vld [vmem:[#allocation5 + $0x3f4] ss:$20 sps:$4 sm:$0xff]   ;;  %v6687_v4 = vld [vmem:[#allocation5 + $0x4b0] ss:$20 sps:$4 sm:$0xff]  }
  0x7e   :  { %v106_v33 = vld [vmem:[#allocation2 + $0x98] sm:$0xff] }
  0x7f   :  { %4275 = vmatpush1.bf16.msra.mxu0 %v6559_v34  ;;  %4619 = vmatpush1.bf16.msra.mxu1 %v6560_v35  ;;  %v6639_v34 = vld [vmem:[#allocation5 + $0x370] ss:$20 sps:$4 sm:$0xff]   ;;  %v6642_v35 = vld [vmem:[#allocation5 + $0x378] ss:$20 sps:$4 sm:$0xff]   ;;  %v6657_v47 = vld [vmem:[#allocation5 + $0x3e8] ss:$20 sps:$4 sm:$0xff]  }
  0x80   :  { %4276 = vmatprep.subr.bf16.mxu0 %v6561_v36  ;;  %4620 = vmatprep.subr.bf16.mxu1 %v6563_v37  ;;  %v7704_v36 = vpack.c.bf16 %v106_v33, %v90_v32  ;;  %v6647_v37 = vld [vmem:[#allocation5 + $0x39c] ss:$20 sps:$4 sm:$0xff]   ;;  %v6720_v32 = vld [vmem:[#allocation5 + $0x580] ss:$20 sps:$4 sm:$0xff]   ;;  %v6725_v33 = vld [vmem:[#allocation5 + $0x5a4] ss:$20 sps:$4 sm:$0xff]  }
  0x83   :  { %4277 = vmatpush1.bf16.msra.mxu0 %v6565_v38  ;;  %4621 = vmatpush1.bf16.msra.mxu1 %v6566_v39  ;;  %v6650_v38 = vld [vmem:[#allocation5 + $0x3a4] ss:$20 sps:$4 sm:$0xff]  }
  0x84   :  { %4278 = vmatprep.subr.bf16.mxu0 %v6567_v40  ;;  %4622 = vmatprep.subr.bf16.mxu1 %v6569_v41  ;;  %v6645_v39 = vld [vmem:[#allocation5 + $0x398] ss:$20 sps:$4 sm:$0xff]   ;;  %v6648_v40 = vld [vmem:[#allocation5 + $0x3a0] ss:$20 sps:$4 sm:$0xff]  }
  0x85   :  { %v6653_v41 = vld [vmem:[#allocation5 + $0x3c4] ss:$20 sps:$4 sm:$0xff]  }
  0x87   :  { %4279 = vmatpush1.bf16.msra.mxu0 %v6571_v42  ;;  %4623 = vmatpush1.bf16.msra.mxu1 %v6572_v43  ;;  %v6656_v42 = vld [vmem:[#allocation5 + $0x3cc] ss:$20 sps:$4 sm:$0xff]  }
  0x88   :  { %4280 = vmatprep.subr.bf16.mxu0 %v6573_v44  ;;  %4624 = vmatprep.subr.bf16.mxu1 %v6575_v45  ;;  %v6651_v43 = vld [vmem:[#allocation5 + $0x3c0] ss:$20 sps:$4 sm:$0xff]   ;;  %v6654_v44 = vld [vmem:[#allocation5 + $0x3c8] ss:$20 sps:$4 sm:$0xff]  }
  0x89   :  { %v6659_v45 = vld [vmem:[#allocation5 + $0x3ec] ss:$20 sps:$4 sm:$0xff]  }
  0x8b   :  { %4281 = vmatpush1.bf16.msra.mxu0 %v6577_v48  ;;  %4625 = vmatpush1.bf16.msra.mxu1 %v6578_v49  ;;  %v6660_v48 = vld [vmem:[#allocation5 + $0x3f0] ss:$20 sps:$4 sm:$0xff]   ;;  %v6665_v49 = vld [vmem:[#allocation5 + $0x414] ss:$20 sps:$4 sm:$0xff]  }
  0x8c   :  { %4282 = vmatprep.subr.bf16.mxu0 %v6579_v51  ;;  %4626 = vmatprep.subr.bf16.mxu1 %v6581_v52  ;;  %v6668_v51 = vld [vmem:[#allocation5 + $0x41c] ss:$20 sps:$4 sm:$0xff]  }
  0x8d   :  { %v6663_v52 = vld [vmem:[#allocation5 + $0x410] ss:$20 sps:$4 sm:$0xff]  }
  0x8f   :  { %4283 = vmatpush1.bf16.msra.mxu0 %v6583_v53  ;;  %4627 = vmatpush1.bf16.msra.mxu1 %v6584_v54  ;;  %v6666_v53 = vld [vmem:[#allocation5 + $0x418] ss:$20 sps:$4 sm:$0xff]   ;;  %v6671_v54 = vld [vmem:[#allocation5 + $0x43c] ss:$20 sps:$4 sm:$0xff]  }
  0x90   :  { %4284 = vmatprep.subr.bf16.mxu0 %v6585_v55  ;;  %4628 = vmatprep.subr.bf16.mxu1 %v6587_v56  ;;  %v6674_v55 = vld [vmem:[#allocation5 + $0x444] ss:$20 sps:$4 sm:$0xff]  }
  0x91   :  { %v6669_v56 = vld [vmem:[#allocation5 + $0x438] ss:$20 sps:$4 sm:$0xff]  }
  0x93   :  { %4285 = vmatpush1.bf16.msra.mxu0 %v6589_v57  ;;  %4629 = vmatpush1.bf16.msra.mxu1 %v6590_v58  ;;  %v6672_v57 = vld [vmem:[#allocation5 + $0x440] ss:$20 sps:$4 sm:$0xff]   ;;  %v6677_v58 = vld [vmem:[#allocation5 + $0x464] ss:$20 sps:$4 sm:$0xff]  }
  0x94   :  { %4286 = vmatprep.subr.bf16.mxu0 %v6591_v59  ;;  %4630 = vmatprep.subr.bf16.mxu1 %v6593_v60  ;;  %v6680_v59 = vld [vmem:[#allocation5 + $0x46c] ss:$20 sps:$4 sm:$0xff]  }
  0x95   :  { %v6675_v60 = vld [vmem:[#allocation5 + $0x460] ss:$20 sps:$4 sm:$0xff]  }
  0x97   :  { %4287 = vmatpush1.bf16.msra.mxu0 %v6595_v61  ;;  %4631 = vmatpush1.bf16.msra.mxu1 %v6596_v62  ;;  %v6678_v61 = vld [vmem:[#allocation5 + $0x468] ss:$20 sps:$4 sm:$0xff]   ;;  %v6683_v62 = vld [vmem:[#allocation5 + $0x48c] ss:$20 sps:$4 sm:$0xff]  }
  0x98   :  { %4288 = vmatprep.subr.bf16.mxu0 %v6597_v63  ;;  %4632 = vmatprep.subr.bf16.mxu1 %v6599_v0  ;;  %v6686_v63 = vld [vmem:[#allocation5 + $0x494] ss:$20 sps:$4 sm:$0xff]  }
  0x99   :  { %v6681_v0 = vld [vmem:[#allocation5 + $0x488] ss:$20 sps:$4 sm:$0xff]  }
  0x9b   :  { %4289 = vmatpush1.bf16.msra.mxu0 %v6601_v1  ;;  %4633 = vmatpush1.bf16.msra.mxu1 %v6602_v2  ;;  %v6684_v1 = vld [vmem:[#allocation5 + $0x490] ss:$20 sps:$4 sm:$0xff]   ;;  %v6689_v2 = vld [vmem:[#allocation5 + $0x4b4] ss:$20 sps:$4 sm:$0xff]  }
  0x9c   :  { %4301 = vmatprep.subr.bf16.mxu0 %v6605_v3  ;;  %4645 = vmatprep.subr.bf16.mxu1 %v6608_v6  ;;  %v6692_v3 = vld [vmem:[#allocation5 + $0x4bc] ss:$20 sps:$4 sm:$0xff]  }
  0x9d   :  { %v6695_v6 = vld [vmem:[#allocation5 + $0x4dc] ss:$20 sps:$4 sm:$0xff]  }
  0x9e   :  { %4291 = vmatmul.mubr.bf16.vlgmr.msra.gmra.mrb[0].mxu0 %v7700_v9  ;;  %4635 = vmatmul.mubr.bf16.vlgmr.msra.gmra.mrb[0].mxu1 %v7700_v9 }
  0x9f   :  { %4302 = vmatpush1.bf16.msra.mxu0 %v6603_v7  ;;  %4646 = vmatpush1.bf16.msra.mxu1 %v6606_v8  ;;  %v6698_v7 = vld [vmem:[#allocation5 + $0x4e4] ss:$20 sps:$4 sm:$0xff]  }
  0xa0   :  { %4303 = vmatprep.subr.bf16.mxu0 %v6611_v10  ;;  %4647 = vmatprep.subr.bf16.mxu1 %v6614_v11  ;;  %v6693_v8 = vld [vmem:[#allocation5 + $0x4d8] ss:$20 sps:$4 sm:$0xff]   ;;  %v6696_v10 = vld [vmem:[#allocation5 + $0x4e0] ss:$20 sps:$4 sm:$0xff]  }
  0xa1   :  { %4333 = vmatprep.mubr.bf16.mxu0 %v7704_v36  ;;  %4677 = vmatprep.mubr.bf16.mxu1 %v7704_v36  ;;  %v6701_v11 = vld [vmem:[#allocation5 + $0x504] ss:$20 sps:$4 sm:$0xff]  }
  0xa3   :  { %4304 = vmatpush1.bf16.msra.mxu0 %v6609_v12  ;;  %4648 = vmatpush1.bf16.msra.mxu1 %v6612_v13  ;;  %v89_v12 = vld [vmem:[#allocation2 + $0x10] sm:$0xff] }
  0xa4   :  { %4305 = vmatprep.subr.bf16.mxu0 %v6617_v14  ;;  %4649 = vmatprep.subr.bf16.mxu1 %v6620_v15  ;;  %v105_v13 = vld [vmem:[#allocation2 + $0x90] sm:$0xff]  ;;  %v6704_v14 = vld [vmem:[#allocation5 + $0x50c] ss:$20 sps:$4 sm:$0xff]  }
  0xa5   :  { %v6699_v15 = vld [vmem:[#allocation5 + $0x500] ss:$20 sps:$4 sm:$0xff]  }
  0xa7   :  { %4306 = vmatpush1.bf16.msra.mxu0 %v6615_v16  ;;  %4650 = vmatpush1.bf16.msra.mxu1 %v6618_v17  ;;  %v6702_v16 = vld [vmem:[#allocation5 + $0x508] ss:$20 sps:$4 sm:$0xff]   ;;  %v7708_v17 = vpack.c.bf16 %v105_v13, %v89_v12 }
  0xa8   :  { %4307 = vmatprep.subr.bf16.mxu0 %v6623_v18  ;;  %4651 = vmatprep.subr.bf16.mxu1 %v6626_v19  ;;  %v6707_v18 = vld [vmem:[#allocation5 + $0x52c] ss:$20 sps:$4 sm:$0xff]   ;;  %v6710_v19 = vld [vmem:[#allocation5 + $0x534] ss:$20 sps:$4 sm:$0xff]   ;;  %v6788_v13 = vld [vmem:[#allocation5 + $0x73c] ss:$20 sps:$4 sm:$0xff]  }
  0xa9   :  { %v6785_v12 = vld [vmem:[#allocation5 + $0x734] ss:$20 sps:$4 sm:$0xff]  }
  0xab   :  { %4308 = vmatpush1.bf16.msra.mxu0 %v6621_v20  ;;  %4652 = vmatpush1.bf16.msra.mxu1 %v6624_v21  ;;  %v92_v20 = vld [vmem:[#allocation2 + $0x28] sm:$0xff] }
  0xac   :  { %4309 = vmatprep.subr.bf16.mxu0 %v6629_v22  ;;  %4653 = vmatprep.subr.bf16.mxu1 %v6632_v23  ;;  %v108_v21 = vld [vmem:[#allocation2 + $0xa8] sm:$0xff]  ;;  %v6708_v23 = vld [vmem:[#allocation5 + $0x530] ss:$20 sps:$4 sm:$0xff]  }
  0xad   :  { %v6705_v22 = vld [vmem:[#allocation5 + $0x528] ss:$20 sps:$4 sm:$0xff]  }
  0xaf   :  { %4310 = vmatpush1.bf16.msra.mxu0 %v6627_v24  ;;  %4654 = vmatpush1.bf16.msra.mxu1 %v6630_v25  ;;  %v7712_v24 = vpack.c.bf16 %v108_v21, %v92_v20  ;;  %v6713_v25 = vld [vmem:[#allocation5 + $0x554] ss:$20 sps:$4 sm:$0xff]   ;;  %v6797_v21 = vld [vmem:[#allocation5 + $0x784] ss:$20 sps:$4 sm:$0xff]  }
  0xb0   :  { %4311 = vmatprep.subr.bf16.mxu0 %v6635_v26  ;;  %4655 = vmatprep.subr.bf16.mxu1 %v6638_v27  ;;  %v6716_v26 = vld [vmem:[#allocation5 + $0x55c] ss:$20 sps:$4 sm:$0xff]   ;;  %v6792_v20 = vld [vmem:[#allocation5 + $0x760] ss:$20 sps:$4 sm:$0xff]  }
  0xb1   :  { %v6711_v27 = vld [vmem:[#allocation5 + $0x550] ss:$20 sps:$4 sm:$0xff]  }
  0xb3   :  { %4312 = vmatpush1.bf16.msra.mxu0 %v6633_v28  ;;  %4656 = vmatpush1.bf16.msra.mxu1 %v6636_v29  ;;  %v6714_v28 = vld [vmem:[#allocation5 + $0x558] ss:$20 sps:$4 sm:$0xff]   ;;  %v6719_v29 = vld [vmem:[#allocation5 + $0x57c] ss:$20 sps:$4 sm:$0xff]  }
  0xb4   :  { %4313 = vmatprep.subr.bf16.mxu0 %v6641_v30  ;;  %4657 = vmatprep.subr.bf16.mxu1 %v6644_v31  ;;  %v6722_v30 = vld [vmem:[#allocation5 + $0x584] ss:$20 sps:$4 sm:$0xff]  }
  0xb5   :  { %v6717_v31 = vld [vmem:[#allocation5 + $0x578] ss:$20 sps:$4 sm:$0xff]  }
  0xb7   :  { %4314 = vmatpush1.bf16.msra.mxu0 %v6639_v34  ;;  %4658 = vmatpush1.bf16.msra.mxu1 %v6642_v35  ;;  %v6728_v34 = vld [vmem:[#allocation5 + $0x5ac] ss:$20 sps:$4 sm:$0xff]  }
  0xb8   :  { %4315 = vmatprep.subr.bf16.mxu0 %v6647_v37  ;;  %4659 = vmatprep.subr.bf16.mxu1 %v6650_v38  ;;  %v6723_v35 = vld [vmem:[#allocation5 + $0x5a0] ss:$20 sps:$4 sm:$0xff]   ;;  %v6726_v37 = vld [vmem:[#allocation5 + $0x5a8] ss:$20 sps:$4 sm:$0xff]  }
  0xb9   :  { %v6731_v38 = vld [vmem:[#allocation5 + $0x5cc] ss:$20 sps:$4 sm:$0xff]  }
  0xbb   :  { %4316 = vmatpush1.bf16.msra.mxu0 %v6645_v39  ;;  %4660 = vmatpush1.bf16.msra.mxu1 %v6648_v40  ;;  %v6734_v39 = vld [vmem:[#allocation5 + $0x5d4] ss:$20 sps:$4 sm:$0xff]  }
  0xbc   :  { %4317 = vmatprep.subr.bf16.mxu0 %v6653_v41  ;;  %4661 = vmatprep.subr.bf16.mxu1 %v6656_v42  ;;  %v6729_v40 = vld [vmem:[#allocation5 + $0x5c8] ss:$20 sps:$4 sm:$0xff]   ;;  %v6732_v41 = vld [vmem:[#allocation5 + $0x5d0] ss:$20 sps:$4 sm:$0xff]  }
  0xbd   :  { %v6737_v42 = vld [vmem:[#allocation5 + $0x5f4] ss:$20 sps:$4 sm:$0xff]  }
  0xbf   :  { %4318 = vmatpush1.bf16.msra.mxu0 %v6651_v43  ;;  %4662 = vmatpush1.bf16.msra.mxu1 %v6654_v44  ;;  %v6740_v43 = vld [vmem:[#allocation5 + $0x5fc] ss:$20 sps:$4 sm:$0xff]  }
  0xc0   :  { %4319 = vmatprep.subr.bf16.mxu0 %v6659_v45  ;;  %4663 = vmatprep.subr.bf16.mxu1 %v6662_v46  ;;  %v6735_v44 = vld [vmem:[#allocation5 + $0x5f0] ss:$20 sps:$4 sm:$0xff]   ;;  %v6738_v45 = vld [vmem:[#allocation5 + $0x5f8] ss:$20 sps:$4 sm:$0xff]  }
  0xc1   :  { %v6743_v46 = vld [vmem:[#allocation5 + $0x61c] ss:$20 sps:$4 sm:$0xff]  }
  0xc3   :  { %4320 = vmatpush1.bf16.msra.mxu0 %v6657_v47  ;;  %4664 = vmatpush1.bf16.msra.mxu1 %v6660_v48  ;;  %v6746_v47 = vld [vmem:[#allocation5 + $0x624] ss:$20 sps:$4 sm:$0xff]  }
  0xc4   :  { %4321 = vmatprep.subr.bf16.mxu0 %v6665_v49  ;;  %4665 = vmatprep.subr.bf16.mxu1 %v6668_v51  ;;  %v6741_v48 = vld [vmem:[#allocation5 + $0x618] ss:$20 sps:$4 sm:$0xff]   ;;  %v6744_v49 = vld [vmem:[#allocation5 + $0x620] ss:$20 sps:$4 sm:$0xff]  }
  0xc5   :  { %v6749_v51 = vld [vmem:[#allocation5 + $0x644] ss:$20 sps:$4 sm:$0xff]  }
  0xc7   :  { %4322 = vmatpush1.bf16.msra.mxu0 %v6663_v52  ;;  %4666 = vmatpush1.bf16.msra.mxu1 %v6666_v53  ;;  %v6752_v52 = vld [vmem:[#allocation5 + $0x64c] ss:$20 sps:$4 sm:$0xff]  }
  0xc8   :  { %4323 = vmatprep.subr.bf16.mxu0 %v6671_v54  ;;  %4667 = vmatprep.subr.bf16.mxu1 %v6674_v55  ;;  %v6747_v53 = vld [vmem:[#allocation5 + $0x640] ss:$20 sps:$4 sm:$0xff]   ;;  %v6750_v54 = vld [vmem:[#allocation5 + $0x648] ss:$20 sps:$4 sm:$0xff]  }
  0xc9   :  { %v6755_v55 = vld [vmem:[#allocation5 + $0x66c] ss:$20 sps:$4 sm:$0xff]  }
  0xcb   :  { %4324 = vmatpush1.bf16.msra.mxu0 %v6669_v56  ;;  %4668 = vmatpush1.bf16.msra.mxu1 %v6672_v57  ;;  %v6758_v56 = vld [vmem:[#allocation5 + $0x674] ss:$20 sps:$4 sm:$0xff]  }
  0xcc   :  { %4325 = vmatprep.subr.bf16.mxu0 %v6677_v58  ;;  %4669 = vmatprep.subr.bf16.mxu1 %v6680_v59  ;;  %v6753_v57 = vld [vmem:[#allocation5 + $0x668] ss:$20 sps:$4 sm:$0xff]   ;;  %v6756_v58 = vld [vmem:[#allocation5 + $0x670] ss:$20 sps:$4 sm:$0xff]  }
  0xcd   :  { %v6761_v59 = vld [vmem:[#allocation5 + $0x694] ss:$20 sps:$4 sm:$0xff]  }
  0xcf   :  { %4326 = vmatpush1.bf16.msra.mxu0 %v6675_v60  ;;  %4670 = vmatpush1.bf16.msra.mxu1 %v6678_v61  ;;  %v6764_v60 = vld [vmem:[#allocation5 + $0x69c] ss:$20 sps:$4 sm:$0xff]  }
  0xd0   :  { %4327 = vmatprep.subr.bf16.mxu0 %v6683_v62  ;;  %4671 = vmatprep.subr.bf16.mxu1 %v6686_v63  ;;  %v6759_v61 = vld [vmem:[#allocation5 + $0x690] ss:$20 sps:$4 sm:$0xff]   ;;  %v6762_v62 = vld [vmem:[#allocation5 + $0x698] ss:$20 sps:$4 sm:$0xff]  }
  0xd1   :  { %v6767_v63 = vld [vmem:[#allocation5 + $0x6bc] ss:$20 sps:$4 sm:$0xff]  }
  0xd3   :  { %4328 = vmatpush1.bf16.msra.mxu0 %v6681_v0  ;;  %4672 = vmatpush1.bf16.msra.mxu1 %v6684_v1  ;;  %v6770_v0 = vld [vmem:[#allocation5 + $0x6c4] ss:$20 sps:$4 sm:$0xff]  }
  0xd4   :  { %4329 = vmatprep.subr.bf16.mxu0 %v6689_v2  ;;  %4673 = vmatprep.subr.bf16.mxu1 %v6692_v3  ;;  %v6765_v1 = vld [vmem:[#allocation5 + $0x6b8] ss:$20 sps:$4 sm:$0xff]   ;;  %v6768_v2 = vld [vmem:[#allocation5 + $0x6c0] ss:$20 sps:$4 sm:$0xff]  }
  0xd5   :  { %v6773_v3 = vld [vmem:[#allocation5 + $0x6e4] ss:$20 sps:$4 sm:$0xff]  }
  0xd7   :  { %4330 = vmatpush1.bf16.msra.mxu0 %v6687_v4  ;;  %4674 = vmatpush1.bf16.msra.mxu1 %v6690_v5  ;;  %v6776_v4 = vld [vmem:[#allocation5 + $0x6ec] ss:$20 sps:$4 sm:$0xff]  }
  0xd8   :  { %4331 = vmatprep.subr.bf16.mxu0 %v6695_v6  ;;  %4675 = vmatprep.subr.bf16.mxu1 %v6698_v7  ;;  %v6771_v5 = vld [vmem:[#allocation5 + $0x6e0] ss:$20 sps:$4 sm:$0xff]   ;;  %v6774_v6 = vld [vmem:[#allocation5 + $0x6e8] ss:$20 sps:$4 sm:$0xff]  }
  0xd9   :  { %v6779_v7 = vld [vmem:[#allocation5 + $0x70c] ss:$20 sps:$4 sm:$0xff]  }
  0xdb   :  { %4332 = vmatpush1.bf16.msra.mxu0 %v6693_v8  ;;  %4676 = vmatpush1.bf16.msra.mxu1 %v6696_v10  ;;  %v6782_v8 = vld [vmem:[#allocation5 + $0x714] ss:$20 sps:$4 sm:$0xff]  }
  0xdc   :  { %4344 = vmatprep.subr.bf16.mxu0 %v6701_v11  ;;  %4688 = vmatprep.subr.bf16.mxu1 %v6704_v14  ;;  %v6777_v10 = vld [vmem:[#allocation5 + $0x708] ss:$20 sps:$4 sm:$0xff]   ;;  %v6780_v11 = vld [vmem:[#allocation5 + $0x710] ss:$20 sps:$4 sm:$0xff]  }
  0xdd   :  { %v6783_v14 = vld [vmem:[#allocation5 + $0x730] ss:$20 sps:$4 sm:$0xff]  }
  0xde   :  { %4334 = vmatmul.mubr.bf16.vlgmr.msra.gmra.mrb[0].mxu0 %v7708_v17  ;;  %4678 = vmatmul.mubr.bf16.vlgmr.msra.gmra.mrb[0].mxu1 %v7708_v17 }
  0xdf   :  { %4345 = vmatpush1.bf16.msra.mxu0 %v6699_v15  ;;  %4689 = vmatpush1.bf16.msra.mxu1 %v6702_v16  ;;  %v6786_v15 = vld [vmem:[#allocation5 + $0x738] ss:$20 sps:$4 sm:$0xff]   ;;  %v6791_v16 = vld [vmem:[#allocation5 + $0x75c] ss:$20 sps:$4 sm:$0xff]  }
  0xe0   :  { %4346 = vmatprep.subr.bf16.mxu0 %v6707_v18  ;;  %4690 = vmatprep.subr.bf16.mxu1 %v6710_v19  ;;  %v6794_v18 = vld [vmem:[#allocation5 + $0x764] ss:$20 sps:$4 sm:$0xff]  }
  0xe1   :  { %4376 = vmatprep.mubr.bf16.mxu0 %v7712_v24  ;;  %4720 = vmatprep.mubr.bf16.mxu1 %v7712_v24  ;;  %v6789_v19 = vld [vmem:[#allocation5 + $0x758] ss:$20 sps:$4 sm:$0xff]  }
  0xe3   :  { %4347 = vmatpush1.bf16.msra.mxu0 %v6705_v22  ;;  %4691 = vmatpush1.bf16.msra.mxu1 %v6708_v23  ;;  %v91_v22 = vld [vmem:[#allocation2 + $0x20] sm:$0xff] }
  0xe4   :  { %4348 = vmatprep.subr.bf16.mxu0 %v6713_v25  ;;  %4692 = vmatprep.subr.bf16.mxu1 %v6716_v26  ;;  %v107_v23 = vld [vmem:[#allocation2 + $0xa0] sm:$0xff] }
  0xe5   :  { %v6800_v25 = vld [vmem:[#allocation5 + $0x78c] ss:$20 sps:$4 sm:$0xff]  }
  0xe6   :  { %v6795_v26 = vld [vmem:[#allocation5 + $0x780] ss:$20 sps:$4 sm:$0xff]  }
  0xe7   :  { %4349 = vmatpush1.bf16.msra.mxu0 %v6711_v27  ;;  %4693 = vmatpush1.bf16.msra.mxu1 %v6714_v28  ;;  %v6798_v27 = vld [vmem:[#allocation5 + $0x788] ss:$20 sps:$4 sm:$0xff]   ;;  %v7716_v28 = vpack.c.bf16 %v107_v23, %v91_v22  ;;  %v6876_v23 = vld [vmem:[#allocation5 + $0x990] ss:$20 sps:$4 sm:$0xff]  }
  0xe8   :  { %4350 = vmatprep.subr.bf16.mxu0 %v6719_v29  ;;  %4694 = vmatprep.subr.bf16.mxu1 %v6722_v30  ;;  %v94_v29 = vld [vmem:[#allocation2 + $0x38] sm:$0xff] }
  0xe9   :  { %v110_v30 = vld [vmem:[#allocation2 + $0xb8] sm:$0xff] }
  0xea   :  { %v6873_v22 = vld [vmem:[#allocation5 + $0x988] ss:$20 sps:$4 sm:$0xff]  }
  0xeb   :  { %4351 = vmatpush1.bf16.msra.mxu0 %v6717_v31  ;;  %4695 = vmatpush1.bf16.msra.mxu1 %v6720_v32  ;;  %v6803_v31 = vld [vmem:[#allocation5 + $0x7ac] ss:$20 sps:$4 sm:$0xff]   ;;  %v6806_v32 = vld [vmem:[#allocation5 + $0x7b4] ss:$20 sps:$4 sm:$0xff]  }
  0xec   :  { %4352 = vmatprep.subr.bf16.mxu0 %v6725_v33  ;;  %4696 = vmatprep.subr.bf16.mxu1 %v6728_v34  ;;  %v7718_v33 = vpack.c.bf16 %v110_v30, %v94_v29  ;;  %v6801_v34 = vld [vmem:[#allocation5 + $0x7a8] ss:$20 sps:$4 sm:$0xff]   ;;  %v6882_v29 = vld [vmem:[#allocation5 + $0x9b8] ss:$20 sps:$4 sm:$0xff]  }
  0xed   :  { %v6887_v30 = vld [vmem:[#allocation5 + $0x9dc] ss:$20 sps:$4 sm:$0xff]  }
  0xef   :  { %4353 = vmatpush1.bf16.msra.mxu0 %v6723_v35  ;;  %4697 = vmatpush1.bf16.msra.mxu1 %v6726_v37  ;;  %v6804_v35 = vld [vmem:[#allocation5 + $0x7b0] ss:$20 sps:$4 sm:$0xff]   ;;  %v6809_v37 = vld [vmem:[#allocation5 + $0x7d4] ss:$20 sps:$4 sm:$0xff]  }
  0xf0   :  { %4354 = vmatprep.subr.bf16.mxu0 %v6731_v38  ;;  %4698 = vmatprep.subr.bf16.mxu1 %v6734_v39  ;;  %v6812_v38 = vld [vmem:[#allocation5 + $0x7dc] ss:$20 sps:$4 sm:$0xff]  }
  0xf1   :  { %v6807_v39 = vld [vmem:[#allocation5 + $0x7d0] ss:$20 sps:$4 sm:$0xff]  }
  0xf3   :  { %4355 = vmatpush1.bf16.msra.mxu0 %v6729_v40  ;;  %4699 = vmatpush1.bf16.msra.mxu1 %v6732_v41  ;;  %v6810_v40 = vld [vmem:[#allocation5 + $0x7d8] ss:$20 sps:$4 sm:$0xff]   ;;  %v6815_v41 = vld [vmem:[#allocation5 + $0x7fc] ss:$20 sps:$4 sm:$0xff]  }
  0xf4   :  { %4356 = vmatprep.subr.bf16.mxu0 %v6737_v42  ;;  %4700 = vmatprep.subr.bf16.mxu1 %v6740_v43  ;;  %v6818_v42 = vld [vmem:[#allocation5 + $0x804] ss:$20 sps:$4 sm:$0xff]  }
  0xf5   :  { %v6813_v43 = vld [vmem:[#allocation5 + $0x7f8] ss:$20 sps:$4 sm:$0xff]  }
  0xf7   :  { %4357 = vmatpush1.bf16.msra.mxu0 %v6735_v44  ;;  %4701 = vmatpush1.bf16.msra.mxu1 %v6738_v45  ;;  %v6816_v44 = vld [vmem:[#allocation5 + $0x800] ss:$20 sps:$4 sm:$0xff]   ;;  %v6821_v45 = vld [vmem:[#allocation5 + $0x824] ss:$20 sps:$4 sm:$0xff]  }
  0xf8   :  { %4358 = vmatprep.subr.bf16.mxu0 %v6743_v46  ;;  %4702 = vmatprep.subr.bf16.mxu1 %v6746_v47  ;;  %v6824_v46 = vld [vmem:[#allocation5 + $0x82c] ss:$20 sps:$4 sm:$0xff]  }
  0xf9   :  { %v6819_v47 = vld [vmem:[#allocation5 + $0x820] ss:$20 sps:$4 sm:$0xff]  }
  0xfb   :  { %4359 = vmatpush1.bf16.msra.mxu0 %v6741_v48  ;;  %4703 = vmatpush1.bf16.msra.mxu1 %v6744_v49  ;;  %v6822_v48 = vld [vmem:[#allocation5 + $0x828] ss:$20 sps:$4 sm:$0xff]   ;;  %v6827_v49 = vld [vmem:[#allocation5 + $0x84c] ss:$20 sps:$4 sm:$0xff]  }
  0xfc   :  { %4360 = vmatprep.subr.bf16.mxu0 %v6749_v51  ;;  %4704 = vmatprep.subr.bf16.mxu1 %v6752_v52  ;;  %v6830_v51 = vld [vmem:[#allocation5 + $0x854] ss:$20 sps:$4 sm:$0xff]  }
  0xfd   :  { %v6825_v52 = vld [vmem:[#allocation5 + $0x848] ss:$20 sps:$4 sm:$0xff]  }
  0xff   :  { %4361 = vmatpush1.bf16.msra.mxu0 %v6747_v53  ;;  %4705 = vmatpush1.bf16.msra.mxu1 %v6750_v54  ;;  %v6828_v53 = vld [vmem:[#allocation5 + $0x850] ss:$20 sps:$4 sm:$0xff]   ;;  %v6833_v54 = vld [vmem:[#allocation5 + $0x874] ss:$20 sps:$4 sm:$0xff]  }
 0x100   :  { %4362 = vmatprep.subr.bf16.mxu0 %v6755_v55  ;;  %4706 = vmatprep.subr.bf16.mxu1 %v6758_v56  ;;  %v6836_v55 = vld [vmem:[#allocation5 + $0x87c] ss:$20 sps:$4 sm:$0xff]  }
 0x101   :  { %v6831_v56 = vld [vmem:[#allocation5 + $0x870] ss:$20 sps:$4 sm:$0xff]  }
 0x103   :  { %4363 = vmatpush1.bf16.msra.mxu0 %v6753_v57  ;;  %4707 = vmatpush1.bf16.msra.mxu1 %v6756_v58  ;;  %v6834_v57 = vld [vmem:[#allocation5 + $0x878] ss:$20 sps:$4 sm:$0xff]   ;;  %v6839_v58 = vld [vmem:[#allocation5 + $0x89c] ss:$20 sps:$4 sm:$0xff]  }
 0x104   :  { %4364 = vmatprep.subr.bf16.mxu0 %v6761_v59  ;;  %4708 = vmatprep.subr.bf16.mxu1 %v6764_v60  ;;  %v6842_v59 = vld [vmem:[#allocation5 + $0x8a4] ss:$20 sps:$4 sm:$0xff]  }
 0x105   :  { %v6837_v60 = vld [vmem:[#allocation5 + $0x898] ss:$20 sps:$4 sm:$0xff]  }
 0x107   :  { %4365 = vmatpush1.bf16.msra.mxu0 %v6759_v61  ;;  %4709 = vmatpush1.bf16.msra.mxu1 %v6762_v62  ;;  %v6840_v61 = vld [vmem:[#allocation5 + $0x8a0] ss:$20 sps:$4 sm:$0xff]   ;;  %v6845_v62 = vld [vmem:[#allocation5 + $0x8c4] ss:$20 sps:$4 sm:$0xff]  }
 0x108   :  { %4366 = vmatprep.subr.bf16.mxu0 %v6767_v63  ;;  %4710 = vmatprep.subr.bf16.mxu1 %v6770_v0  ;;  %v6848_v63 = vld [vmem:[#allocation5 + $0x8cc] ss:$20 sps:$4 sm:$0xff]  }
 0x109   :  { %v6843_v0 = vld [vmem:[#allocation5 + $0x8c0] ss:$20 sps:$4 sm:$0xff]  }
 0x10b   :  { %4367 = vmatpush1.bf16.msra.mxu0 %v6765_v1  ;;  %4711 = vmatpush1.bf16.msra.mxu1 %v6768_v2  ;;  %v6846_v1 = vld [vmem:[#allocation5 + $0x8c8] ss:$20 sps:$4 sm:$0xff]   ;;  %v6851_v2 = vld [vmem:[#allocation5 + $0x8ec] ss:$20 sps:$4 sm:$0xff]  }
 0x10c   :  { %4368 = vmatprep.subr.bf16.mxu0 %v6773_v3  ;;  %4712 = vmatprep.subr.bf16.mxu1 %v6776_v4  ;;  %v6854_v3 = vld [vmem:[#allocation5 + $0x8f4] ss:$20 sps:$4 sm:$0xff]  }
 0x10d   :  { %v6849_v4 = vld [vmem:[#allocation5 + $0x8e8] ss:$20 sps:$4 sm:$0xff]  }
 0x10f   :  { %4369 = vmatpush1.bf16.msra.mxu0 %v6771_v5  ;;  %4713 = vmatpush1.bf16.msra.mxu1 %v6774_v6  ;;  %v6852_v5 = vld [vmem:[#allocation5 + $0x8f0] ss:$20 sps:$4 sm:$0xff]   ;;  %v6857_v6 = vld [vmem:[#allocation5 + $0x914] ss:$20 sps:$4 sm:$0xff]  }
 0x110   :  { %4370 = vmatprep.subr.bf16.mxu0 %v6779_v7  ;;  %4714 = vmatprep.subr.bf16.mxu1 %v6782_v8  ;;  %v6860_v7 = vld [vmem:[#allocation5 + $0x91c] ss:$20 sps:$4 sm:$0xff]  }
 0x111   :  { %v6855_v8 = vld [vmem:[#allocation5 + $0x910] ss:$20 sps:$4 sm:$0xff]  }
 0x113   :  { %4371 = vmatpush1.bf16.msra.mxu0 %v6777_v10  ;;  %4715 = vmatpush1.bf16.msra.mxu1 %v6780_v11  ;;  %v6858_v10 = vld [vmem:[#allocation5 + $0x918] ss:$20 sps:$4 sm:$0xff]   ;;  %v6863_v11 = vld [vmem:[#allocation5 + $0x93c] ss:$20 sps:$4 sm:$0xff]  }
 0x114   :  { %4372 = vmatprep.subr.bf16.mxu0 %v6785_v12  ;;  %4716 = vmatprep.subr.bf16.mxu1 %v6788_v13  ;;  %v6866_v12 = vld [vmem:[#allocation5 + $0x944] ss:$20 sps:$4 sm:$0xff]  }
 0x115   :  { %v6861_v13 = vld [vmem:[#allocation5 + $0x938] ss:$20 sps:$4 sm:$0xff]  }
 0x117   :  { %4373 = vmatpush1.bf16.msra.mxu0 %v6783_v14  ;;  %4717 = vmatpush1.bf16.msra.mxu1 %v6786_v15  ;;  %v6864_v14 = vld [vmem:[#allocation5 + $0x940] ss:$20 sps:$4 sm:$0xff]   ;;  %v6869_v15 = vld [vmem:[#allocation5 + $0x964] ss:$20 sps:$4 sm:$0xff]  }
 0x118   :  { %4374 = vmatprep.subr.bf16.mxu0 %v6791_v16  ;;  %4718 = vmatprep.subr.bf16.mxu1 %v6794_v18  ;;  %v6872_v16 = vld [vmem:[#allocation5 + $0x96c] ss:$20 sps:$4 sm:$0xff]  }
 0x119   :  { %v6867_v18 = vld [vmem:[#allocation5 + $0x960] ss:$20 sps:$4 sm:$0xff]  }
 0x11b   :  { %4375 = vmatpush1.bf16.msra.mxu0 %v6789_v19  ;;  %4719 = vmatpush1.bf16.msra.mxu1 %v6792_v20  ;;  %v6870_v19 = vld [vmem:[#allocation5 + $0x968] ss:$20 sps:$4 sm:$0xff]   ;;  %v6875_v20 = vld [vmem:[#allocation5 + $0x98c] ss:$20 sps:$4 sm:$0xff]  }
 0x11c   :  { %4387 = vmatprep.subr.bf16.mxu0 %v6797_v21  ;;  %4731 = vmatprep.subr.bf16.mxu1 %v6800_v25  ;;  %v6878_v21 = vld [vmem:[#allocation5 + $0x994] ss:$20 sps:$4 sm:$0xff]  }
 0x11d   :  { %v6881_v25 = vld [vmem:[#allocation5 + $0x9b4] ss:$20 sps:$4 sm:$0xff]  }
 0x11e   :  { %4377 = vmatmul.mubr.bf16.vlgmr.msra.gmra.mrb[0].mxu0 %v7716_v28  ;;  %4721 = vmatmul.mubr.bf16.vlgmr.msra.gmra.mrb[0].mxu1 %v7716_v28 }
 0x11f   :  { %4388 = vmatpush1.bf16.msra.mxu0 %v6795_v26  ;;  %4732 = vmatpush1.bf16.msra.mxu1 %v6798_v27  ;;  %v6884_v26 = vld [vmem:[#allocation5 + $0x9bc] ss:$20 sps:$4 sm:$0xff]  }
 0x120   :  { %4389 = vmatprep.subr.bf16.mxu0 %v6803_v31  ;;  %4733 = vmatprep.subr.bf16.mxu1 %v6806_v32  ;;  %v6879_v27 = vld [vmem:[#allocation5 + $0x9b0] ss:$20 sps:$4 sm:$0xff]   ;;  %v6885_v32 = vld [vmem:[#allocation5 + $0x9d8] ss:$20 sps:$4 sm:$0xff]  }
 0x121   :  { %4419 = vmatprep.mubr.bf16.mxu0 %v7718_v33  ;;  %4763 = vmatprep.mubr.bf16.mxu1 %v7718_v33  ;;  %v6890_v31 = vld [vmem:[#allocation5 + $0x9e4] ss:$20 sps:$4 sm:$0xff]  }
 0x123   :  { %4390 = vmatpush1.bf16.msra.mxu0 %v6801_v34  ;;  %4734 = vmatpush1.bf16.msra.mxu1 %v6804_v35  ;;  %v6888_v34 = vld [vmem:[#allocation5 + $0x9e0] ss:$20 sps:$4 sm:$0xff]   ;;  %v6893_v35 = vld [vmem:[#allocation5 + $0xa04] ss:$20 sps:$4 sm:$0xff]  }
 0x124   :  { %4391 = vmatprep.subr.bf16.mxu0 %v6809_v37  ;;  %4735 = vmatprep.subr.bf16.mxu1 %v6812_v38  ;;  %v93_v37 = vld [vmem:[#allocation2 + $0x30] sm:$0xff] }
 0x125   :  { %v109_v38 = vld [vmem:[#allocation2 + $0xb0] sm:$0xff] }
 0x127   :  { %4392 = vmatpush1.bf16.msra.mxu0 %v6807_v39  ;;  %4736 = vmatpush1.bf16.msra.mxu1 %v6810_v40  ;;  %v6896_v39 = vld [vmem:[#allocation5 + $0xa0c] ss:$20 sps:$4 sm:$0xff]  }
 0x128   :  { %4393 = vmatprep.subr.bf16.mxu0 %v6815_v41  ;;  %4737 = vmatprep.subr.bf16.mxu1 %v6818_v42  ;;  %v6891_v40 = vld [vmem:[#allocation5 + $0xa00] ss:$20 sps:$4 sm:$0xff]   ;;  %v6894_v41 = vld [vmem:[#allocation5 + $0xa08] ss:$20 sps:$4 sm:$0xff]   ;;  %v7724_v42 = vpack.c.bf16 %v109_v38, %v93_v37 }
 0x129   :  { %v6971_v37 = vld [vmem:[#allocation5 + $0xc0c] ss:$20 sps:$4 sm:$0xff]   ;;  %v6974_v38 = vld [vmem:[#allocation5 + $0xc14] ss:$20 sps:$4 sm:$0xff]  }
 0x12b   :  { %4394 = vmatpush1.bf16.msra.mxu0 %v6813_v43  ;;  %4738 = vmatpush1.bf16.msra.mxu1 %v6816_v44  ;;  %v96_v43 = vld [vmem:[#allocation2 + $0x48] sm:$0xff] }
 0x12c   :  { %4395 = vmatprep.subr.bf16.mxu0 %v6821_v45  ;;  %4739 = vmatprep.subr.bf16.mxu1 %v6824_v46  ;;  %v112_v44 = vld [vmem:[#allocation2 + $0xc8] sm:$0xff] }
 0x12d   :  { %v6899_v45 = vld [vmem:[#allocation5 + $0xa2c] ss:$20 sps:$4 sm:$0xff]   ;;  %v6902_v46 = vld [vmem:[#allocation5 + $0xa34] ss:$20 sps:$4 sm:$0xff]  }
 0x12f   :  { %4396 = vmatpush1.bf16.msra.mxu0 %v6819_v47  ;;  %4740 = vmatpush1.bf16.msra.mxu1 %v6822_v48  ;;  %v7726_v47 = vpack.c.bf16 %v112_v44, %v96_v43  ;;  %v6897_v48 = vld [vmem:[#allocation5 + $0xa28] ss:$20 sps:$4 sm:$0xff]   ;;  %v6975_v44 = vld [vmem:[#allocation5 + $0xc30] ss:$20 sps:$4 sm:$0xff]  }
 0x130   :  { %4397 = vmatprep.subr.bf16.mxu0 %v6827_v49  ;;  %4741 = vmatprep.subr.bf16.mxu1 %v6830_v51  ;;  %v6900_v49 = vld [vmem:[#allocation5 + $0xa30] ss:$20 sps:$4 sm:$0xff]   ;;  %v6905_v51 = vld [vmem:[#allocation5 + $0xa54] ss:$20 sps:$4 sm:$0xff]  }
 0x131   :  { %v6980_v43 = vld [vmem:[#allocation5 + $0xc3c] ss:$20 sps:$4 sm:$0xff]  }
 0x133   :  { %4398 = vmatpush1.bf16.msra.mxu0 %v6825_v52  ;;  %4742 = vmatpush1.bf16.msra.mxu1 %v6828_v53  ;;  %v6908_v52 = vld [vmem:[#allocation5 + $0xa5c] ss:$20 sps:$4 sm:$0xff]  }
 0x134   :  { %4399 = vmatprep.subr.bf16.mxu0 %v6833_v54  ;;  %4743 = vmatprep.subr.bf16.mxu1 %v6836_v55  ;;  %v6903_v53 = vld [vmem:[#allocation5 + $0xa50] ss:$20 sps:$4 sm:$0xff]   ;;  %v6906_v54 = vld [vmem:[#allocation5 + $0xa58] ss:$20 sps:$4 sm:$0xff]  }
 0x135   :  { %v6911_v55 = vld [vmem:[#allocation5 + $0xa7c] ss:$20 sps:$4 sm:$0xff]  }
 0x137   :  { %4400 = vmatpush1.bf16.msra.mxu0 %v6831_v56  ;;  %4744 = vmatpush1.bf16.msra.mxu1 %v6834_v57  ;;  %v6914_v56 = vld [vmem:[#allocation5 + $0xa84] ss:$20 sps:$4 sm:$0xff]  }
 0x138   :  { %4401 = vmatprep.subr.bf16.mxu0 %v6839_v58  ;;  %4745 = vmatprep.subr.bf16.mxu1 %v6842_v59  ;;  %v6909_v57 = vld [vmem:[#allocation5 + $0xa78] ss:$20 sps:$4 sm:$0xff]   ;;  %v6912_v58 = vld [vmem:[#allocation5 + $0xa80] ss:$20 sps:$4 sm:$0xff]  }
 0x139   :  { %v6917_v59 = vld [vmem:[#allocation5 + $0xaa4] ss:$20 sps:$4 sm:$0xff]  }
 0x13b   :  { %4402 = vmatpush1.bf16.msra.mxu0 %v6837_v60  ;;  %4746 = vmatpush1.bf16.msra.mxu1 %v6840_v61  ;;  %v6920_v60 = vld [vmem:[#allocation5 + $0xaac] ss:$20 sps:$4 sm:$0xff]  }
 0x13c   :  { %4403 = vmatprep.subr.bf16.mxu0 %v6845_v62  ;;  %4747 = vmatprep.subr.bf16.mxu1 %v6848_v63  ;;  %v6915_v61 = vld [vmem:[#allocation5 + $0xaa0] ss:$20 sps:$4 sm:$0xff]   ;;  %v6918_v62 = vld [vmem:[#allocation5 + $0xaa8] ss:$20 sps:$4 sm:$0xff]  }
 0x13d   :  { %v6923_v63 = vld [vmem:[#allocation5 + $0xacc] ss:$20 sps:$4 sm:$0xff]  }
 0x13f   :  { %4404 = vmatpush1.bf16.msra.mxu0 %v6843_v0  ;;  %4748 = vmatpush1.bf16.msra.mxu1 %v6846_v1  ;;  %v6926_v0 = vld [vmem:[#allocation5 + $0xad4] ss:$20 sps:$4 sm:$0xff]  }
 0x140   :  { %4405 = vmatprep.subr.bf16.mxu0 %v6851_v2  ;;  %4749 = vmatprep.subr.bf16.mxu1 %v6854_v3  ;;  %v6921_v1 = vld [vmem:[#allocation5 + $0xac8] ss:$20 sps:$4 sm:$0xff]   ;;  %v6924_v2 = vld [vmem:[#allocation5 + $0xad0] ss:$20 sps:$4 sm:$0xff]  }
 0x141   :  { %v6929_v3 = vld [vmem:[#allocation5 + $0xaf4] ss:$20 sps:$4 sm:$0xff]  }
 0x143   :  { %4406 = vmatpush1.bf16.msra.mxu0 %v6849_v4  ;;  %4750 = vmatpush1.bf16.msra.mxu1 %v6852_v5  ;;  %v6932_v4 = vld [vmem:[#allocation5 + $0xafc] ss:$20 sps:$4 sm:$0xff]  }
 0x144   :  { %4407 = vmatprep.subr.bf16.mxu0 %v6857_v6  ;;  %4751 = vmatprep.subr.bf16.mxu1 %v6860_v7  ;;  %v6927_v5 = vld [vmem:[#allocation5 + $0xaf0] ss:$20 sps:$4 sm:$0xff]   ;;  %v6930_v6 = vld [vmem:[#allocation5 + $0xaf8] ss:$20 sps:$4 sm:$0xff]  }
 0x145   :  { %v6935_v7 = vld [vmem:[#allocation5 + $0xb1c] ss:$20 sps:$4 sm:$0xff]  }
 0x147   :  { %4408 = vmatpush1.bf16.msra.mxu0 %v6855_v8  ;;  %4752 = vmatpush1.bf16.msra.mxu1 %v6858_v10  ;;  %v6938_v8 = vld [vmem:[#allocation5 + $0xb24] ss:$20 sps:$4 sm:$0xff]  }
 0x148   :  { %4409 = vmatprep.subr.bf16.mxu0 %v6863_v11  ;;  %4753 = vmatprep.subr.bf16.mxu1 %v6866_v12  ;;  %v6933_v10 = vld [vmem:[#allocation5 + $0xb18] ss:$20 sps:$4 sm:$0xff]   ;;  %v6936_v11 = vld [vmem:[#allocation5 + $0xb20] ss:$20 sps:$4 sm:$0xff]  }
 0x149   :  { %v6941_v12 = vld [vmem:[#allocation5 + $0xb44] ss:$20 sps:$4 sm:$0xff]  }
 0x14b   :  { %4410 = vmatpush1.bf16.msra.mxu0 %v6861_v13  ;;  %4754 = vmatpush1.bf16.msra.mxu1 %v6864_v14  ;;  %v6944_v13 = vld [vmem:[#allocation5 + $0xb4c] ss:$20 sps:$4 sm:$0xff]  }
 0x14c   :  { %4411 = vmatprep.subr.bf16.mxu0 %v6869_v15  ;;  %4755 = vmatprep.subr.bf16.mxu1 %v6872_v16  ;;  %v6939_v14 = vld [vmem:[#allocation5 + $0xb40] ss:$20 sps:$4 sm:$0xff]   ;;  %v6942_v15 = vld [vmem:[#allocation5 + $0xb48] ss:$20 sps:$4 sm:$0xff]  }
 0x14d   :  { %v6947_v16 = vld [vmem:[#allocation5 + $0xb6c] ss:$20 sps:$4 sm:$0xff]  }
 0x14f   :  { %4412 = vmatpush1.bf16.msra.mxu0 %v6867_v18  ;;  %4756 = vmatpush1.bf16.msra.mxu1 %v6870_v19  ;;  %v6950_v18 = vld [vmem:[#allocation5 + $0xb74] ss:$20 sps:$4 sm:$0xff]  }
 0x150   :  { %4413 = vmatprep.subr.bf16.mxu0 %v6875_v20  ;;  %4757 = vmatprep.subr.bf16.mxu1 %v6878_v21  ;;  %v6945_v19 = vld [vmem:[#allocation5 + $0xb68] ss:$20 sps:$4 sm:$0xff]   ;;  %v6948_v20 = vld [vmem:[#allocation5 + $0xb70] ss:$20 sps:$4 sm:$0xff]  }
 0x151   :  { %v6953_v21 = vld [vmem:[#allocation5 + $0xb94] ss:$20 sps:$4 sm:$0xff]  }
 0x153   :  { %4414 = vmatpush1.bf16.msra.mxu0 %v6873_v22  ;;  %4758 = vmatpush1.bf16.msra.mxu1 %v6876_v23  ;;  %v6956_v22 = vld [vmem:[#allocation5 + $0xb9c] ss:$20 sps:$4 sm:$0xff]  }
 0x154   :  { %4415 = vmatprep.subr.bf16.mxu0 %v6881_v25  ;;  %4759 = vmatprep.subr.bf16.mxu1 %v6884_v26  ;;  %v6951_v23 = vld [vmem:[#allocation5 + $0xb90] ss:$20 sps:$4 sm:$0xff]   ;;  %v6954_v25 = vld [vmem:[#allocation5 + $0xb98] ss:$20 sps:$4 sm:$0xff]  }
 0x155   :  { %v6959_v26 = vld [vmem:[#allocation5 + $0xbbc] ss:$20 sps:$4 sm:$0xff]  }
 0x157   :  { %4416 = vmatpush1.bf16.msra.mxu0 %v6879_v27  ;;  %4760 = vmatpush1.bf16.msra.mxu1 %v6882_v29  ;;  %v6962_v27 = vld [vmem:[#allocation5 + $0xbc4] ss:$20 sps:$4 sm:$0xff]  }
 0x158   :  { %4417 = vmatprep.subr.bf16.mxu0 %v6887_v30  ;;  %4761 = vmatprep.subr.bf16.mxu1 %v6890_v31  ;;  %v6957_v29 = vld [vmem:[#allocation5 + $0xbb8] ss:$20 sps:$4 sm:$0xff]   ;;  %v6960_v30 = vld [vmem:[#allocation5 + $0xbc0] ss:$20 sps:$4 sm:$0xff]  }
 0x159   :  { %v6965_v31 = vld [vmem:[#allocation5 + $0xbe4] ss:$20 sps:$4 sm:$0xff]  }
 0x15b   :  { %4418 = vmatpush1.bf16.msra.mxu0 %v6885_v32  ;;  %4762 = vmatpush1.bf16.msra.mxu1 %v6888_v34  ;;  %v6968_v32 = vld [vmem:[#allocation5 + $0xbec] ss:$20 sps:$4 sm:$0xff]  }
 0x15c   :  { %4430 = vmatprep.subr.bf16.mxu0 %v6893_v35  ;;  %4774 = vmatprep.subr.bf16.mxu1 %v6896_v39  ;;  %v6963_v34 = vld [vmem:[#allocation5 + $0xbe0] ss:$20 sps:$4 sm:$0xff]   ;;  %v6966_v35 = vld [vmem:[#allocation5 + $0xbe8] ss:$20 sps:$4 sm:$0xff]  }
 0x15d   :  { %v6969_v39 = vld [vmem:[#allocation5 + $0xc08] ss:$20 sps:$4 sm:$0xff]  }
 0x15e   :  { %4420 = vmatmul.mubr.bf16.vlgmr.msra.gmra.mrb[0].mxu0 %v7724_v42  ;;  %4764 = vmatmul.mubr.bf16.vlgmr.msra.gmra.mrb[0].mxu1 %v7724_v42 }
 0x15f   :  { %4431 = vmatpush1.bf16.msra.mxu0 %v6891_v40  ;;  %4775 = vmatpush1.bf16.msra.mxu1 %v6894_v41  ;;  %v6972_v40 = vld [vmem:[#allocation5 + $0xc10] ss:$20 sps:$4 sm:$0xff]   ;;  %v6977_v41 = vld [vmem:[#allocation5 + $0xc34] ss:$20 sps:$4 sm:$0xff]  }
 0x160   :  { %4432 = vmatprep.subr.bf16.mxu0 %v6899_v45  ;;  %4776 = vmatprep.subr.bf16.mxu1 %v6902_v46  ;;  %v6978_v45 = vld [vmem:[#allocation5 + $0xc38] ss:$20 sps:$4 sm:$0xff]   ;;  %v6983_v46 = vld [vmem:[#allocation5 + $0xc5c] ss:$20 sps:$4 sm:$0xff]  }
 0x161   :  { %4462 = vmatprep.mubr.bf16.mxu0 %v7726_v47  ;;  %4806 = vmatprep.mubr.bf16.mxu1 %v7726_v47 }
 0x163   :  { %4433 = vmatpush1.bf16.msra.mxu0 %v6897_v48  ;;  %4777 = vmatpush1.bf16.msra.mxu1 %v6900_v49  ;;  %v6986_v48 = vld [vmem:[#allocation5 + $0xc64] ss:$20 sps:$4 sm:$0xff]  }
 0x164   :  { %4434 = vmatprep.subr.bf16.mxu0 %v6905_v51  ;;  %4778 = vmatprep.subr.bf16.mxu1 %v6908_v52  ;;  %v6981_v49 = vld [vmem:[#allocation5 + $0xc58] ss:$20 sps:$4 sm:$0xff]   ;;  %v6984_v51 = vld [vmem:[#allocation5 + $0xc60] ss:$20 sps:$4 sm:$0xff]  }
 0x165   :  { %v6989_v52 = vld [vmem:[#allocation5 + $0xc84] ss:$20 sps:$4 sm:$0xff]  }
 0x167   :  { %4435 = vmatpush1.bf16.msra.mxu0 %v6903_v53  ;;  %4779 = vmatpush1.bf16.msra.mxu1 %v6906_v54  ;;  %v6992_v53 = vld [vmem:[#allocation5 + $0xc8c] ss:$20 sps:$4 sm:$0xff]  }
 0x168   :  { %4436 = vmatprep.subr.bf16.mxu0 %v6911_v55  ;;  %4780 = vmatprep.subr.bf16.mxu1 %v6914_v56  ;;  %v95_v54 = vld [vmem:[#allocation2 + $0x40] sm:$0xff]  ;;  %v98_v56 = vld [vmem:[#allocation2 + $0x58] sm:$0xff] }
 0x169   :  { %v111_v55 = vld [vmem:[#allocation2 + $0xc0] sm:$0xff] }
 0x16b   :  { %4437 = vmatpush1.bf16.msra.mxu0 %v6909_v57  ;;  %4781 = vmatpush1.bf16.msra.mxu1 %v6912_v58  ;;  %v114_v57 = vld [vmem:[#allocation2 + $0xd8] sm:$0xff]  ;;  %v7732_v58 = vpack.c.bf16 %v111_v55, %v95_v54  ;;  %v7067_v55 = vld [vmem:[#allocation5 + $0xe8c] ss:$20 sps:$4 sm:$0xff]  }
 0x16c   :  { %4438 = vmatprep.subr.bf16.mxu0 %v6917_v59  ;;  %4782 = vmatprep.subr.bf16.mxu1 %v6920_v60  ;;  %v6987_v59 = vld [vmem:[#allocation5 + $0xc80] ss:$20 sps:$4 sm:$0xff]   ;;  %v6990_v60 = vld [vmem:[#allocation5 + $0xc88] ss:$20 sps:$4 sm:$0xff]  }
 0x16d   :  { %v7062_v54 = vld [vmem:[#allocation5 + $0xe68] ss:$20 sps:$4 sm:$0xff]  }
 0x16f   :  { %4439 = vmatpush1.bf16.msra.mxu0 %v6915_v61  ;;  %4783 = vmatpush1.bf16.msra.mxu1 %v6918_v62  ;;  %v6995_v61 = vld [vmem:[#allocation5 + $0xcac] ss:$20 sps:$4 sm:$0xff]   ;;  %v6998_v62 = vld [vmem:[#allocation5 + $0xcb4] ss:$20 sps:$4 sm:$0xff]  }
 0x170   :  { %4440 = vmatprep.subr.bf16.mxu0 %v6923_v63  ;;  %4784 = vmatprep.subr.bf16.mxu1 %v6926_v0  ;;  %v7734_v63 = vpack.c.bf16 %v114_v57, %v98_v56  ;;  %v6993_v0 = vld [vmem:[#allocation5 + $0xca8] ss:$20 sps:$4 sm:$0xff]  }
 0x171   :  { %v7070_v56 = vld [vmem:[#allocation5 + $0xe94] ss:$20 sps:$4 sm:$0xff]  }
 0x172   :  { %v7065_v57 = vld [vmem:[#allocation5 + $0xe88] ss:$20 sps:$4 sm:$0xff]  }
 0x173   :  { %4441 = vmatpush1.bf16.msra.mxu0 %v6921_v1  ;;  %4785 = vmatpush1.bf16.msra.mxu1 %v6924_v2  ;;  %v6996_v1 = vld [vmem:[#allocation5 + $0xcb0] ss:$20 sps:$4 sm:$0xff]   ;;  %v7001_v2 = vld [vmem:[#allocation5 + $0xcd4] ss:$20 sps:$4 sm:$0xff]  }
 0x174   :  { %4442 = vmatprep.subr.bf16.mxu0 %v6929_v3  ;;  %4786 = vmatprep.subr.bf16.mxu1 %v6932_v4  ;;  %v7004_v3 = vld [vmem:[#allocation5 + $0xcdc] ss:$20 sps:$4 sm:$0xff]  }
 0x175   :  { %v6999_v4 = vld [vmem:[#allocation5 + $0xcd0] ss:$20 sps:$4 sm:$0xff]  }
 0x177   :  { %4443 = vmatpush1.bf16.msra.mxu0 %v6927_v5  ;;  %4787 = vmatpush1.bf16.msra.mxu1 %v6930_v6  ;;  %v7002_v5 = vld [vmem:[#allocation5 + $0xcd8] ss:$20 sps:$4 sm:$0xff]   ;;  %v7007_v6 = vld [vmem:[#allocation5 + $0xcfc] ss:$20 sps:$4 sm:$0xff]  }
 0x178   :  { %4444 = vmatprep.subr.bf16.mxu0 %v6935_v7  ;;  %4788 = vmatprep.subr.bf16.mxu1 %v6938_v8  ;;  %v7010_v7 = vld [vmem:[#allocation5 + $0xd04] ss:$20 sps:$4 sm:$0xff]  }
 0x179   :  { %v7005_v8 = vld [vmem:[#allocation5 + $0xcf8] ss:$20 sps:$4 sm:$0xff]  }
 0x17b   :  { %4445 = vmatpush1.bf16.msra.mxu0 %v6933_v10  ;;  %4789 = vmatpush1.bf16.msra.mxu1 %v6936_v11  ;;  %v7008_v10 = vld [vmem:[#allocation5 + $0xd00] ss:$20 sps:$4 sm:$0xff]   ;;  %v7013_v11 = vld [vmem:[#allocation5 + $0xd24] ss:$20 sps:$4 sm:$0xff]  }
 0x17c   :  { %4446 = vmatprep.subr.bf16.mxu0 %v6941_v12  ;;  %4790 = vmatprep.subr.bf16.mxu1 %v6944_v13  ;;  %v7016_v12 = vld [vmem:[#allocation5 + $0xd2c] ss:$20 sps:$4 sm:$0xff]  }
 0x17d   :  { %v7011_v13 = vld [vmem:[#allocation5 + $0xd20] ss:$20 sps:$4 sm:$0xff]  }
 0x17f   :  { %4447 = vmatpush1.bf16.msra.mxu0 %v6939_v14  ;;  %4791 = vmatpush1.bf16.msra.mxu1 %v6942_v15  ;;  %v7014_v14 = vld [vmem:[#allocation5 + $0xd28] ss:$20 sps:$4 sm:$0xff]   ;;  %v7019_v15 = vld [vmem:[#allocation5 + $0xd4c] ss:$20 sps:$4 sm:$0xff]  }
 0x180   :  { %4448 = vmatprep.subr.bf16.mxu0 %v6947_v16  ;;  %4792 = vmatprep.subr.bf16.mxu1 %v6950_v18  ;;  %v7022_v16 = vld [vmem:[#allocation5 + $0xd54] ss:$20 sps:$4 sm:$0xff]  }
 0x181   :  { %v7017_v18 = vld [vmem:[#allocation5 + $0xd48] ss:$20 sps:$4 sm:$0xff]  }
 0x183   :  { %4449 = vmatpush1.bf16.msra.mxu0 %v6945_v19  ;;  %4793 = vmatpush1.bf16.msra.mxu1 %v6948_v20  ;;  %v7020_v19 = vld [vmem:[#allocation5 + $0xd50] ss:$20 sps:$4 sm:$0xff]   ;;  %v7025_v20 = vld [vmem:[#allocation5 + $0xd74] ss:$20 sps:$4 sm:$0xff]  }
 0x184   :  { %4450 = vmatprep.subr.bf16.mxu0 %v6953_v21  ;;  %4794 = vmatprep.subr.bf16.mxu1 %v6956_v22  ;;  %v7028_v21 = vld [vmem:[#allocation5 + $0xd7c] ss:$20 sps:$4 sm:$0xff]  }
 0x185   :  { %v7023_v22 = vld [vmem:[#allocation5 + $0xd70] ss:$20 sps:$4 sm:$0xff]  }
 0x187   :  { %4451 = vmatpush1.bf16.msra.mxu0 %v6951_v23  ;;  %4795 = vmatpush1.bf16.msra.mxu1 %v6954_v25  ;;  %v7026_v23 = vld [vmem:[#allocation5 + $0xd78] ss:$20 sps:$4 sm:$0xff]   ;;  %v7031_v25 = vld [vmem:[#allocation5 + $0xd9c] ss:$20 sps:$4 sm:$0xff]  }
 0x188   :  { %4452 = vmatprep.subr.bf16.mxu0 %v6959_v26  ;;  %4796 = vmatprep.subr.bf16.mxu1 %v6962_v27  ;;  %v7034_v26 = vld [vmem:[#allocation5 + $0xda4] ss:$20 sps:$4 sm:$0xff]  }
 0x189   :  { %v7029_v27 = vld [vmem:[#allocation5 + $0xd98] ss:$20 sps:$4 sm:$0xff]  }
 0x18b   :  { %4453 = vmatpush1.bf16.msra.mxu0 %v6957_v29  ;;  %4797 = vmatpush1.bf16.msra.mxu1 %v6960_v30  ;;  %v7032_v29 = vld [vmem:[#allocation5 + $0xda0] ss:$20 sps:$4 sm:$0xff]   ;;  %v7037_v30 = vld [vmem:[#allocation5 + $0xdc4] ss:$20 sps:$4 sm:$0xff]  }
 0x18c   :  { %4454 = vmatprep.subr.bf16.mxu0 %v6965_v31  ;;  %4798 = vmatprep.subr.bf16.mxu1 %v6968_v32  ;;  %v7040_v31 = vld [vmem:[#allocation5 + $0xdcc] ss:$20 sps:$4 sm:$0xff]  }
 0x18d   :  { %v7035_v32 = vld [vmem:[#allocation5 + $0xdc0] ss:$20 sps:$4 sm:$0xff]  }
 0x18f   :  { %4455 = vmatpush1.bf16.msra.mxu0 %v6963_v34  ;;  %4799 = vmatpush1.bf16.msra.mxu1 %v6966_v35  ;;  %v7038_v34 = vld [vmem:[#allocation5 + $0xdc8] ss:$20 sps:$4 sm:$0xff]   ;;  %v7043_v35 = vld [vmem:[#allocation5 + $0xdec] ss:$20 sps:$4 sm:$0xff]  }
 0x190   :  { %4456 = vmatprep.subr.bf16.mxu0 %v6971_v37  ;;  %4800 = vmatprep.subr.bf16.mxu1 %v6974_v38  ;;  %v7046_v37 = vld [vmem:[#allocation5 + $0xdf4] ss:$20 sps:$4 sm:$0xff]  }
 0x191   :  { %v7041_v38 = vld [vmem:[#allocation5 + $0xde8] ss:$20 sps:$4 sm:$0xff]  }
 0x193   :  { %4457 = vmatpush1.bf16.msra.mxu0 %v6969_v39  ;;  %4801 = vmatpush1.bf16.msra.mxu1 %v6972_v40  ;;  %v7044_v39 = vld [vmem:[#allocation5 + $0xdf0] ss:$20 sps:$4 sm:$0xff]   ;;  %v7049_v40 = vld [vmem:[#allocation5 + $0xe14] ss:$20 sps:$4 sm:$0xff]  }
 0x194   :  { %4458 = vmatprep.subr.bf16.mxu0 %v6977_v41  ;;  %4802 = vmatprep.subr.bf16.mxu1 %v6980_v43  ;;  %v7052_v41 = vld [vmem:[#allocation5 + $0xe1c] ss:$20 sps:$4 sm:$0xff]  }
 0x195   :  { %v7047_v43 = vld [vmem:[#allocation5 + $0xe10] ss:$20 sps:$4 sm:$0xff]  }
 0x197   :  { %4459 = vmatpush1.bf16.msra.mxu0 %v6975_v44  ;;  %4803 = vmatpush1.bf16.msra.mxu1 %v6978_v45  ;;  %v7050_v44 = vld [vmem:[#allocation5 + $0xe18] ss:$20 sps:$4 sm:$0xff]   ;;  %v7055_v45 = vld [vmem:[#allocation5 + $0xe3c] ss:$20 sps:$4 sm:$0xff]  }
 0x198   :  { %4460 = vmatprep.subr.bf16.mxu0 %v6983_v46  ;;  %4804 = vmatprep.subr.bf16.mxu1 %v6986_v48  ;;  %v7058_v46 = vld [vmem:[#allocation5 + $0xe44] ss:$20 sps:$4 sm:$0xff]  }
 0x199   :  { %v7053_v48 = vld [vmem:[#allocation5 + $0xe38] ss:$20 sps:$4 sm:$0xff]  }
 0x19b   :  { %4461 = vmatpush1.bf16.msra.mxu0 %v6981_v49  ;;  %4805 = vmatpush1.bf16.msra.mxu1 %v6984_v51  ;;  %v7056_v49 = vld [vmem:[#allocation5 + $0xe40] ss:$20 sps:$4 sm:$0xff]   ;;  %v7061_v51 = vld [vmem:[#allocation5 + $0xe64] ss:$20 sps:$4 sm:$0xff]  }
 0x19c   :  { %4473 = vmatprep.subr.bf16.mxu0 %v6989_v52  ;;  %4817 = vmatprep.subr.bf16.mxu1 %v6992_v53  ;;  %v7064_v52 = vld [vmem:[#allocation5 + $0xe6c] ss:$20 sps:$4 sm:$0xff]  }
 0x19d   :  { %v7059_v53 = vld [vmem:[#allocation5 + $0xe60] ss:$20 sps:$4 sm:$0xff]  }
 0x19e   :  { %4463 = vmatmul.mubr.bf16.vlgmr.msra.gmra.mrb[0].mxu0 %v7732_v58  ;;  %4807 = vmatmul.mubr.bf16.vlgmr.msra.gmra.mrb[0].mxu1 %v7732_v58 }
 0x19f   :  { %4474 = vmatpush1.bf16.msra.mxu0 %v6987_v59  ;;  %4818 = vmatpush1.bf16.msra.mxu1 %v6990_v60  ;;  %v7068_v59 = vld [vmem:[#allocation5 + $0xe90] ss:$20 sps:$4 sm:$0xff]   ;;  %v7073_v60 = vld [vmem:[#allocation5 + $0xeb4] ss:$20 sps:$4 sm:$0xff]  }
 0x1a0   :  { %4475 = vmatprep.subr.bf16.mxu0 %v6995_v61  ;;  %4819 = vmatprep.subr.bf16.mxu1 %v6998_v62  ;;  %v7076_v61 = vld [vmem:[#allocation5 + $0xebc] ss:$20 sps:$4 sm:$0xff]  }
 0x1a1   :  { %4505 = vmatprep.mubr.bf16.mxu0 %v7734_v63  ;;  %4849 = vmatprep.mubr.bf16.mxu1 %v7734_v63  ;;  %v7071_v62 = vld [vmem:[#allocation5 + $0xeb0] ss:$20 sps:$4 sm:$0xff]  }
 0x1a3   :  { %4476 = vmatpush1.bf16.msra.mxu0 %v6993_v0  ;;  %4820 = vmatpush1.bf16.msra.mxu1 %v6996_v1  ;;  %v7074_v0 = vld [vmem:[#allocation5 + $0xeb8] ss:$20 sps:$4 sm:$0xff]   ;;  %v7079_v1 = vld [vmem:[#allocation5 + $0xedc] ss:$20 sps:$4 sm:$0xff]  }
 0x1a4   :  { %4477 = vmatprep.subr.bf16.mxu0 %v7001_v2  ;;  %4821 = vmatprep.subr.bf16.mxu1 %v7004_v3  ;;  %v7082_v2 = vld [vmem:[#allocation5 + $0xee4] ss:$20 sps:$4 sm:$0xff]  }
 0x1a5   :  { %v7077_v3 = vld [vmem:[#allocation5 + $0xed8] ss:$20 sps:$4 sm:$0xff]  }
 0x1a7   :  { %4478 = vmatpush1.bf16.msra.mxu0 %v6999_v4  ;;  %4822 = vmatpush1.bf16.msra.mxu1 %v7002_v5  ;;  %v7080_v4 = vld [vmem:[#allocation5 + $0xee0] ss:$20 sps:$4 sm:$0xff]  }
 0x1a8   :  { %4479 = vmatprep.subr.bf16.mxu0 %v7007_v6  ;;  %4823 = vmatprep.subr.bf16.mxu1 %v7010_v7  ;;  %v97_v5 = vld [vmem:[#allocation2 + $0x50] sm:$0xff]  ;;  %v7085_v7 = vld [vmem:[#allocation5 + $0xf04] ss:$20 sps:$4 sm:$0xff]  }
 0x1a9   :  { %v113_v6 = vld [vmem:[#allocation2 + $0xd0] sm:$0xff] }
 0x1ab   :  { %4480 = vmatpush1.bf16.msra.mxu0 %v7005_v8  ;;  %4824 = vmatpush1.bf16.msra.mxu1 %v7008_v10  ;;  %v7088_v8 = vld [vmem:[#allocation5 + $0xf0c] ss:$20 sps:$4 sm:$0xff]  }
 0x1ac   :  { %4481 = vmatprep.subr.bf16.mxu0 %v7013_v11  ;;  %4825 = vmatprep.subr.bf16.mxu1 %v7016_v12  ;;  %v7083_v10 = vld [vmem:[#allocation5 + $0xf00] ss:$20 sps:$4 sm:$0xff]   ;;  %v7086_v11 = vld [vmem:[#allocation5 + $0xf08] ss:$20 sps:$4 sm:$0xff]   ;;  %v7740_v12 = vpack.c.bf16 %v113_v6, %v97_v5  ;;  %v7157_v6 = vld [vmem:[#allocation5 + $0x10e4] ss:$20 sps:$4 sm:$0xff]  }
 0x1ad   :  { %v7152_v5 = vld [vmem:[#allocation5 + $0x10c0] ss:$20 sps:$4 sm:$0xff]  }
 0x1af   :  { %4482 = vmatpush1.bf16.msra.mxu0 %v7011_v13  ;;  %4826 = vmatpush1.bf16.msra.mxu1 %v7014_v14  ;;  %v100_v13 = vld [vmem:[#allocation2 + $0x68] sm:$0xff] }
 0x1b0   :  { %4483 = vmatprep.subr.bf16.mxu0 %v7019_v15  ;;  %4827 = vmatprep.subr.bf16.mxu1 %v7022_v16  ;;  %v116_v14 = vld [vmem:[#allocation2 + $0xe8] sm:$0xff] }
 0x1b1   :  { %v7091_v15 = vld [vmem:[#allocation5 + $0xf2c] ss:$20 sps:$4 sm:$0xff]   ;;  %v7094_v16 = vld [vmem:[#allocation5 + $0xf34] ss:$20 sps:$4 sm:$0xff]  }
 0x1b3   :  { %4484 = vmatpush1.bf16.msra.mxu0 %v7017_v18  ;;  %4828 = vmatpush1.bf16.msra.mxu1 %v7020_v19  ;;  %v7742_v18 = vpack.c.bf16 %v116_v14, %v100_v13  ;;  %v7089_v19 = vld [vmem:[#allocation5 + $0xf28] ss:$20 sps:$4 sm:$0xff]  }
 0x1b4   :  { %4485 = vmatprep.subr.bf16.mxu0 %v7025_v20  ;;  %4829 = vmatprep.subr.bf16.mxu1 %v7028_v21  ;;  %v7092_v20 = vld [vmem:[#allocation5 + $0xf30] ss:$20 sps:$4 sm:$0xff]   ;;  %v7097_v21 = vld [vmem:[#allocation5 + $0xf54] ss:$20 sps:$4 sm:$0xff]  }
 0x1b5   :  { %v7166_v13 = vld [vmem:[#allocation5 + $0x1114] ss:$20 sps:$4 sm:$0xff]  }
 0x1b6   :  { %v7161_v14 = vld [vmem:[#allocation5 + $0x1108] ss:$20 sps:$4 sm:$0xff]  }
 0x1b7   :  { %4486 = vmatpush1.bf16.msra.mxu0 %v7023_v22  ;;  %4830 = vmatpush1.bf16.msra.mxu1 %v7026_v23  ;;  %v7100_v22 = vld [vmem:[#allocation5 + $0xf5c] ss:$20 sps:$4 sm:$0xff]  }
 0x1b8   :  { %4487 = vmatprep.subr.bf16.mxu0 %v7031_v25  ;;  %4831 = vmatprep.subr.bf16.mxu1 %v7034_v26  ;;  %v7095_v23 = vld [vmem:[#allocation5 + $0xf50] ss:$20 sps:$4 sm:$0xff]   ;;  %v7098_v25 = vld [vmem:[#allocation5 + $0xf58] ss:$20 sps:$4 sm:$0xff]  }
 0x1b9   :  { %v7103_v26 = vld [vmem:[#allocation5 + $0xf7c] ss:$20 sps:$4 sm:$0xff]  }
 0x1bb   :  { %4488 = vmatpush1.bf16.msra.mxu0 %v7029_v27  ;;  %4832 = vmatpush1.bf16.msra.mxu1 %v7032_v29  ;;  %v7106_v27 = vld [vmem:[#allocation5 + $0xf84] ss:$20 sps:$4 sm:$0xff]  }
 0x1bc   :  { %4489 = vmatprep.subr.bf16.mxu0 %v7037_v30  ;;  %4833 = vmatprep.subr.bf16.mxu1 %v7040_v31  ;;  %v7101_v29 = vld [vmem:[#allocation5 + $0xf78] ss:$20 sps:$4 sm:$0xff]   ;;  %v7104_v30 = vld [vmem:[#allocation5 + $0xf80] ss:$20 sps:$4 sm:$0xff]  }
 0x1bd   :  { %v7109_v31 = vld [vmem:[#allocation5 + $0xfa4] ss:$20 sps:$4 sm:$0xff]  }
 0x1bf   :  { %4490 = vmatpush1.bf16.msra.mxu0 %v7035_v32  ;;  %4834 = vmatpush1.bf16.msra.mxu1 %v7038_v34  ;;  %v7112_v32 = vld [vmem:[#allocation5 + $0xfac] ss:$20 sps:$4 sm:$0xff]  }
 0x1c0   :  { %4491 = vmatprep.subr.bf16.mxu0 %v7043_v35  ;;  %4835 = vmatprep.subr.bf16.mxu1 %v7046_v37  ;;  %v7107_v34 = vld [vmem:[#allocation5 + $0xfa0] ss:$20 sps:$4 sm:$0xff]   ;;  %v7110_v35 = vld [vmem:[#allocation5 + $0xfa8] ss:$20 sps:$4 sm:$0xff]  }
 0x1c1   :  { %v7115_v37 = vld [vmem:[#allocation5 + $0xfcc] ss:$20 sps:$4 sm:$0xff]  }
 0x1c3   :  { %4492 = vmatpush1.bf16.msra.mxu0 %v7041_v38  ;;  %4836 = vmatpush1.bf16.msra.mxu1 %v7044_v39  ;;  %v7118_v38 = vld [vmem:[#allocation5 + $0xfd4] ss:$20 sps:$4 sm:$0xff]  }
 0x1c4   :  { %4493 = vmatprep.subr.bf16.mxu0 %v7049_v40  ;;  %4837 = vmatprep.subr.bf16.mxu1 %v7052_v41  ;;  %v7113_v39 = vld [vmem:[#allocation5 + $0xfc8] ss:$20 sps:$4 sm:$0xff]   ;;  %v7116_v40 = vld [vmem:[#allocation5 + $0xfd0] ss:$20 sps:$4 sm:$0xff]  }
 0x1c5   :  { %v7121_v41 = vld [vmem:[#allocation5 + $0xff4] ss:$20 sps:$4 sm:$0xff]  }
 0x1c7   :  { %4494 = vmatpush1.bf16.msra.mxu0 %v7047_v43  ;;  %4838 = vmatpush1.bf16.msra.mxu1 %v7050_v44  ;;  %v7124_v43 = vld [vmem:[#allocation5 + $0xffc] ss:$20 sps:$4 sm:$0xff]  }
 0x1c8   :  { %4495 = vmatprep.subr.bf16.mxu0 %v7055_v45  ;;  %4839 = vmatprep.subr.bf16.mxu1 %v7058_v46  ;;  %v7119_v44 = vld [vmem:[#allocation5 + $0xff0] ss:$20 sps:$4 sm:$0xff]   ;;  %v7122_v45 = vld [vmem:[#allocation5 + $0xff8] ss:$20 sps:$4 sm:$0xff]  }
 0x1c9   :  { %v7127_v46 = vld [vmem:[#allocation5 + $0x101c] ss:$20 sps:$4 sm:$0xff]  }
 0x1cb   :  { %4496 = vmatpush1.bf16.msra.mxu0 %v7053_v48  ;;  %4840 = vmatpush1.bf16.msra.mxu1 %v7056_v49  ;;  %v7130_v48 = vld [vmem:[#allocation5 + $0x1024] ss:$20 sps:$4 sm:$0xff]  }
 0x1cc   :  { %4497 = vmatprep.subr.bf16.mxu0 %v7061_v51  ;;  %4841 = vmatprep.subr.bf16.mxu1 %v7064_v52  ;;  %v7125_v49 = vld [vmem:[#allocation5 + $0x1018] ss:$20 sps:$4 sm:$0xff]   ;;  %v7128_v51 = vld [vmem:[#allocation5 + $0x1020] ss:$20 sps:$4 sm:$0xff]  }
 0x1cd   :  { %v7133_v52 = vld [vmem:[#allocation5 + $0x1044] ss:$20 sps:$4 sm:$0xff]  }
 0x1cf   :  { %4498 = vmatpush1.bf16.msra.mxu0 %v7059_v53  ;;  %4842 = vmatpush1.bf16.msra.mxu1 %v7062_v54  ;;  %v7136_v53 = vld [vmem:[#allocation5 + $0x104c] ss:$20 sps:$4 sm:$0xff]  }
 0x1d0   :  { %4499 = vmatprep.subr.bf16.mxu0 %v7067_v55  ;;  %4843 = vmatprep.subr.bf16.mxu1 %v7070_v56  ;;  %v7131_v54 = vld [vmem:[#allocation5 + $0x1040] ss:$20 sps:$4 sm:$0xff]   ;;  %v7134_v55 = vld [vmem:[#allocation5 + $0x1048] ss:$20 sps:$4 sm:$0xff]  }
 0x1d1   :  { %v7139_v56 = vld [vmem:[#allocation5 + $0x106c] ss:$20 sps:$4 sm:$0xff]  }
 0x1d3   :  { %4500 = vmatpush1.bf16.msra.mxu0 %v7065_v57  ;;  %4844 = vmatpush1.bf16.msra.mxu1 %v7068_v59  ;;  %v7142_v57 = vld [vmem:[#allocation5 + $0x1074] ss:$20 sps:$4 sm:$0xff]  }
 0x1d4   :  { %4501 = vmatprep.subr.bf16.mxu0 %v7073_v60  ;;  %4845 = vmatprep.subr.bf16.mxu1 %v7076_v61  ;;  %v7137_v59 = vld [vmem:[#allocation5 + $0x1068] ss:$20 sps:$4 sm:$0xff]   ;;  %v7140_v60 = vld [vmem:[#allocation5 + $0x1070] ss:$20 sps:$4 sm:$0xff]  }
 0x1d5   :  { %v7145_v61 = vld [vmem:[#allocation5 + $0x1094] ss:$20 sps:$4 sm:$0xff]  }
 0x1d7   :  { %4502 = vmatpush1.bf16.msra.mxu0 %v7071_v62  ;;  %4846 = vmatpush1.bf16.msra.mxu1 %v7074_v0  ;;  %v7148_v62 = vld [vmem:[#allocation5 + $0x109c] ss:$20 sps:$4 sm:$0xff]  }
 0x1d8   :  { %4503 = vmatprep.subr.bf16.mxu0 %v7079_v1  ;;  %4847 = vmatprep.subr.bf16.mxu1 %v7082_v2  ;;  %v7143_v0 = vld [vmem:[#allocation5 + $0x1090] ss:$20 sps:$4 sm:$0xff]   ;;  %v7146_v1 = vld [vmem:[#allocation5 + $0x1098] ss:$20 sps:$4 sm:$0xff]  }
 0x1d9   :  { %v7151_v2 = vld [vmem:[#allocation5 + $0x10bc] ss:$20 sps:$4 sm:$0xff]  }
 0x1db   :  { %4504 = vmatpush1.bf16.msra.mxu0 %v7077_v3  ;;  %4848 = vmatpush1.bf16.msra.mxu1 %v7080_v4  ;;  %v7154_v3 = vld [vmem:[#allocation5 + $0x10c4] ss:$20 sps:$4 sm:$0xff]  }
 0x1dc   :  { %4516 = vmatprep.subr.bf16.mxu0 %v7085_v7  ;;  %4860 = vmatprep.subr.bf16.mxu1 %v7088_v8  ;;  %v7149_v4 = vld [vmem:[#allocation5 + $0x10b8] ss:$20 sps:$4 sm:$0xff]   ;;  %v7155_v8 = vld [vmem:[#allocation5 + $0x10e0] ss:$20 sps:$4 sm:$0xff]  }
 0x1dd   :  { %v7160_v7 = vld [vmem:[#allocation5 + $0x10ec] ss:$20 sps:$4 sm:$0xff]  }
 0x1de   :  { %4506 = vmatmul.mubr.bf16.vlgmr.msra.gmra.mrb[0].mxu0 %v7740_v12  ;;  %4850 = vmatmul.mubr.bf16.vlgmr.msra.gmra.mrb[0].mxu1 %v7740_v12 }
 0x1df   :  { %4517 = vmatpush1.bf16.msra.mxu0 %v7083_v10  ;;  %4861 = vmatpush1.bf16.msra.mxu1 %v7086_v11  ;;  %v7158_v10 = vld [vmem:[#allocation5 + $0x10e8] ss:$20 sps:$4 sm:$0xff]   ;;  %v7163_v11 = vld [vmem:[#allocation5 + $0x110c] ss:$20 sps:$4 sm:$0xff]  }
 0x1e0   :  { %4518 = vmatprep.subr.bf16.mxu0 %v7091_v15  ;;  %4862 = vmatprep.subr.bf16.mxu1 %v7094_v16  ;;  %v7164_v15 = vld [vmem:[#allocation5 + $0x1110] ss:$20 sps:$4 sm:$0xff]   ;;  %v7169_v16 = vld [vmem:[#allocation5 + $0x1134] ss:$20 sps:$4 sm:$0xff]  }
 0x1e1   :  { %4548 = vmatprep.mubr.bf16.mxu0 %v7742_v18  ;;  %4892 = vmatprep.mubr.bf16.mxu1 %v7742_v18 }
 0x1e3   :  { %4519 = vmatpush1.bf16.msra.mxu0 %v7089_v19  ;;  %4863 = vmatpush1.bf16.msra.mxu1 %v7092_v20  ;;  %v7172_v19 = vld [vmem:[#allocation5 + $0x113c] ss:$20 sps:$4 sm:$0xff]  }
 0x1e4   :  { %4520 = vmatprep.subr.bf16.mxu0 %v7097_v21  ;;  %4864 = vmatprep.subr.bf16.mxu1 %v7100_v22  ;;  %v7167_v20 = vld [vmem:[#allocation5 + $0x1130] ss:$20 sps:$4 sm:$0xff]   ;;  %v7170_v21 = vld [vmem:[#allocation5 + $0x1138] ss:$20 sps:$4 sm:$0xff]  }
 0x1e5   :  { %v7175_v22 = vld [vmem:[#allocation5 + $0x115c] ss:$20 sps:$4 sm:$0xff]  }
 0x1e7   :  { %4521 = vmatpush1.bf16.msra.mxu0 %v7095_v23  ;;  %4865 = vmatpush1.bf16.msra.mxu1 %v7098_v25  ;;  %v7178_v23 = vld [vmem:[#allocation5 + $0x1164] ss:$20 sps:$4 sm:$0xff]  }
 0x1e8   :  { %4522 = vmatprep.subr.bf16.mxu0 %v7103_v26  ;;  %4866 = vmatprep.subr.bf16.mxu1 %v7106_v27  ;;  %v7173_v25 = vld [vmem:[#allocation5 + $0x1158] ss:$20 sps:$4 sm:$0xff]   ;;  %v7176_v26 = vld [vmem:[#allocation5 + $0x1160] ss:$20 sps:$4 sm:$0xff]  }
 0x1e9   :  { %v7181_v27 = vld [vmem:[#allocation5 + $0x1184] ss:$20 sps:$4 sm:$0xff]  }
 0x1eb   :  { %4523 = vmatpush1.bf16.msra.mxu0 %v7101_v29  ;;  %4867 = vmatpush1.bf16.msra.mxu1 %v7104_v30  ;;  %v7184_v29 = vld [vmem:[#allocation5 + $0x118c] ss:$20 sps:$4 sm:$0xff]  }
 0x1ec   :  { %4524 = vmatprep.subr.bf16.mxu0 %v7109_v31  ;;  %4868 = vmatprep.subr.bf16.mxu1 %v7112_v32  ;;  %v99_v30 = vld [vmem:[#allocation2 + $0x60] sm:$0xff]  ;;  %v102_v32 = vld [vmem:[#allocation2 + $0x78] sm:$0xff] }
 0x1ed   :  { %v115_v31 = vld [vmem:[#allocation2 + $0xe0] sm:$0xff] }
 0x1ef   :  { %4525 = vmatpush1.bf16.msra.mxu0 %v7107_v34  ;;  %4869 = vmatpush1.bf16.msra.mxu1 %v7110_v35  ;;  %v118_v34 = vld [vmem:[#allocation2 + $0xf8] sm:$0xff]  ;;  %v7179_v35 = vld [vmem:[#allocation5 + $0x1180] ss:$20 sps:$4 sm:$0xff]  }
 0x1f0   :  { %4526 = vmatprep.subr.bf16.mxu0 %v7115_v37  ;;  %4870 = vmatprep.subr.bf16.mxu1 %v7118_v38  ;;  %v7748_v37 = vpack.c.bf16 %v115_v31, %v99_v30  ;;  %v7182_v38 = vld [vmem:[#allocation5 + $0x1188] ss:$20 sps:$4 sm:$0xff]   ;;  %v7248_v30 = vld [vmem:[#allocation5 + $0x1340] ss:$20 sps:$4 sm:$0xff]   ;;  %v7253_v31 = vld [vmem:[#allocation5 + $0x1364] ss:$20 sps:$4 sm:$0xff]  }
 0x1f3   :  { %4527 = vmatpush1.bf16.msra.mxu0 %v7113_v39  ;;  %4871 = vmatpush1.bf16.msra.mxu1 %v7116_v40  ;;  %v7187_v39 = vld [vmem:[#allocation5 + $0x11ac] ss:$20 sps:$4 sm:$0xff]   ;;  %v7190_v40 = vld [vmem:[#allocation5 + $0x11b4] ss:$20 sps:$4 sm:$0xff]  }
 0x1f4   :  { %4528 = vmatprep.subr.bf16.mxu0 %v7121_v41  ;;  %4872 = vmatprep.subr.bf16.mxu1 %v7124_v43  ;;  %v7750_v41 = vpack.c.bf16 %v118_v34, %v102_v32  ;;  %v7185_v43 = vld [vmem:[#allocation5 + $0x11a8] ss:$20 sps:$4 sm:$0xff]   ;;  %v7256_v32 = vld [vmem:[#allocation5 + $0x136c] ss:$20 sps:$4 sm:$0xff]  }
 0x1f5   :  { %v7251_v34 = vld [vmem:[#allocation5 + $0x1360] ss:$20 sps:$4 sm:$0xff]  }
 0x1f7   :  { %4529 = vmatpush1.bf16.msra.mxu0 %v7119_v44  ;;  %4873 = vmatpush1.bf16.msra.mxu1 %v7122_v45  ;;  %v7188_v44 = vld [vmem:[#allocation5 + $0x11b0] ss:$20 sps:$4 sm:$0xff]   ;;  %v7193_v45 = vld [vmem:[#allocation5 + $0x11d4] ss:$20 sps:$4 sm:$0xff]  }
 0x1f8   :  { %4530 = vmatprep.subr.bf16.mxu0 %v7127_v46  ;;  %4874 = vmatprep.subr.bf16.mxu1 %v7130_v48  ;;  %v7196_v46 = vld [vmem:[#allocation5 + $0x11dc] ss:$20 sps:$4 sm:$0xff]  }
 0x1f9   :  { %v7191_v48 = vld [vmem:[#allocation5 + $0x11d0] ss:$20 sps:$4 sm:$0xff]  }
 0x1fb   :  { %4531 = vmatpush1.bf16.msra.mxu0 %v7125_v49  ;;  %4875 = vmatpush1.bf16.msra.mxu1 %v7128_v51  ;;  %v7194_v49 = vld [vmem:[#allocation5 + $0x11d8] ss:$20 sps:$4 sm:$0xff]   ;;  %v7199_v51 = vld [vmem:[#allocation5 + $0x11fc] ss:$20 sps:$4 sm:$0xff]  }
 0x1fc   :  { %4532 = vmatprep.subr.bf16.mxu0 %v7133_v52  ;;  %4876 = vmatprep.subr.bf16.mxu1 %v7136_v53  ;;  %v7202_v52 = vld [vmem:[#allocation5 + $0x1204] ss:$20 sps:$4 sm:$0xff]  }
 0x1fd   :  { %v7197_v53 = vld [vmem:[#allocation5 + $0x11f8] ss:$20 sps:$4 sm:$0xff]  }
 0x1ff   :  { %4533 = vmatpush1.bf16.msra.mxu0 %v7131_v54  ;;  %4877 = vmatpush1.bf16.msra.mxu1 %v7134_v55  ;;  %v7200_v54 = vld [vmem:[#allocation5 + $0x1200] ss:$20 sps:$4 sm:$0xff]   ;;  %v7205_v55 = vld [vmem:[#allocation5 + $0x1224] ss:$20 sps:$4 sm:$0xff]  }
 0x200   :  { %4534 = vmatprep.subr.bf16.mxu0 %v7139_v56  ;;  %4878 = vmatprep.subr.bf16.mxu1 %v7142_v57  ;;  %v7208_v56 = vld [vmem:[#allocation5 + $0x122c] ss:$20 sps:$4 sm:$0xff]  }
 0x201   :  { %v7203_v57 = vld [vmem:[#allocation5 + $0x1220] ss:$20 sps:$4 sm:$0xff]  }
 0x203   :  { %4535 = vmatpush1.bf16.msra.mxu0 %v7137_v59  ;;  %4879 = vmatpush1.bf16.msra.mxu1 %v7140_v60  ;;  %v7206_v59 = vld [vmem:[#allocation5 + $0x1228] ss:$20 sps:$4 sm:$0xff]   ;;  %v7211_v60 = vld [vmem:[#allocation5 + $0x124c] ss:$20 sps:$4 sm:$0xff]  }
 0x204   :  { %4536 = vmatprep.subr.bf16.mxu0 %v7145_v61  ;;  %4880 = vmatprep.subr.bf16.mxu1 %v7148_v62  ;;  %v7214_v61 = vld [vmem:[#allocation5 + $0x1254] ss:$20 sps:$4 sm:$0xff]  }
 0x205   :  { %v7209_v62 = vld [vmem:[#allocation5 + $0x1248] ss:$20 sps:$4 sm:$0xff]  }
 0x207   :  { %4537 = vmatpush1.bf16.msra.mxu0 %v7143_v0  ;;  %4881 = vmatpush1.bf16.msra.mxu1 %v7146_v1  ;;  %v7212_v0 = vld [vmem:[#allocation5 + $0x1250] ss:$20 sps:$4 sm:$0xff]   ;;  %v7217_v1 = vld [vmem:[#allocation5 + $0x1274] ss:$20 sps:$4 sm:$0xff]  }
 0x208   :  { %4538 = vmatprep.subr.bf16.mxu0 %v7151_v2  ;;  %4882 = vmatprep.subr.bf16.mxu1 %v7154_v3  ;;  %v7220_v2 = vld [vmem:[#allocation5 + $0x127c] ss:$20 sps:$4 sm:$0xff]  }
 0x209   :  { %v7215_v3 = vld [vmem:[#allocation5 + $0x1270] ss:$20 sps:$4 sm:$0xff]  }
 0x20b   :  { %4539 = vmatpush1.bf16.msra.mxu0 %v7149_v4  ;;  %4883 = vmatpush1.bf16.msra.mxu1 %v7152_v5  ;;  %v7218_v4 = vld [vmem:[#allocation5 + $0x1278] ss:$20 sps:$4 sm:$0xff]   ;;  %v7223_v5 = vld [vmem:[#allocation5 + $0x129c] ss:$20 sps:$4 sm:$0xff]  }
 0x20c   :  { %4540 = vmatprep.subr.bf16.mxu0 %v7157_v6  ;;  %4884 = vmatprep.subr.bf16.mxu1 %v7160_v7  ;;  %v7226_v6 = vld [vmem:[#allocation5 + $0x12a4] ss:$20 sps:$4 sm:$0xff]  }
 0x20d   :  { %v7221_v7 = vld [vmem:[#allocation5 + $0x1298] ss:$20 sps:$4 sm:$0xff]  }
 0x20f   :  { %4541 = vmatpush1.bf16.msra.mxu0 %v7155_v8  ;;  %4885 = vmatpush1.bf16.msra.mxu1 %v7158_v10  ;;  %v7224_v8 = vld [vmem:[#allocation5 + $0x12a0] ss:$20 sps:$4 sm:$0xff]   ;;  %v7229_v10 = vld [vmem:[#allocation5 + $0x12c4] ss:$20 sps:$4 sm:$0xff]  }
 0x210   :  { %4542 = vmatprep.subr.bf16.mxu0 %v7163_v11  ;;  %4886 = vmatprep.subr.bf16.mxu1 %v7166_v13  ;;  %v7232_v11 = vld [vmem:[#allocation5 + $0x12cc] ss:$20 sps:$4 sm:$0xff]  }
 0x211   :  { %v7227_v13 = vld [vmem:[#allocation5 + $0x12c0] ss:$20 sps:$4 sm:$0xff]  }
 0x213   :  { %4543 = vmatpush1.bf16.msra.mxu0 %v7161_v14  ;;  %4887 = vmatpush1.bf16.msra.mxu1 %v7164_v15  ;;  %v7230_v14 = vld [vmem:[#allocation5 + $0x12c8] ss:$20 sps:$4 sm:$0xff]   ;;  %v7235_v15 = vld [vmem:[#allocation5 + $0x12ec] ss:$20 sps:$4 sm:$0xff]  }
 0x214   :  { %4544 = vmatprep.subr.bf16.mxu0 %v7169_v16  ;;  %4888 = vmatprep.subr.bf16.mxu1 %v7172_v19  ;;  %v7238_v16 = vld [vmem:[#allocation5 + $0x12f4] ss:$20 sps:$4 sm:$0xff]  }
 0x215   :  { %v7233_v19 = vld [vmem:[#allocation5 + $0x12e8] ss:$20 sps:$4 sm:$0xff]  }
 0x217   :  { %4545 = vmatpush1.bf16.msra.mxu0 %v7167_v20  ;;  %4889 = vmatpush1.bf16.msra.mxu1 %v7170_v21  ;;  %v7236_v20 = vld [vmem:[#allocation5 + $0x12f0] ss:$20 sps:$4 sm:$0xff]   ;;  %v7241_v21 = vld [vmem:[#allocation5 + $0x1314] ss:$20 sps:$4 sm:$0xff]  }
 0x218   :  { %4546 = vmatprep.subr.bf16.mxu0 %v7175_v22  ;;  %4890 = vmatprep.subr.bf16.mxu1 %v7178_v23  ;;  %v7244_v22 = vld [vmem:[#allocation5 + $0x131c] ss:$20 sps:$4 sm:$0xff]  }
 0x219   :  { %v7239_v23 = vld [vmem:[#allocation5 + $0x1310] ss:$20 sps:$4 sm:$0xff]  }
 0x21b   :  { %4547 = vmatpush1.bf16.msra.mxu0 %v7173_v25  ;;  %4891 = vmatpush1.bf16.msra.mxu1 %v7176_v26  ;;  %v7242_v25 = vld [vmem:[#allocation5 + $0x1318] ss:$20 sps:$4 sm:$0xff]   ;;  %v7247_v26 = vld [vmem:[#allocation5 + $0x133c] ss:$20 sps:$4 sm:$0xff]  }
 0x21c   :  { %4559 = vmatprep.subr.bf16.mxu0 %v7181_v27  ;;  %4903 = vmatprep.subr.bf16.mxu1 %v7184_v29  ;;  %v7250_v27 = vld [vmem:[#allocation5 + $0x1344] ss:$20 sps:$4 sm:$0xff]  }
 0x21d   :  { %v7245_v29 = vld [vmem:[#allocation5 + $0x1338] ss:$20 sps:$4 sm:$0xff]  }
 0x21e   :  { %4549 = vmatmul.mubr.bf16.vlgmr.msra.gmra.mrb[0].mxu0 %v7748_v37  ;;  %4893 = vmatmul.mubr.bf16.vlgmr.msra.gmra.mrb[0].mxu1 %v7748_v37 }
 0x21f   :  { %4560 = vmatpush1.bf16.msra.mxu0 %v7179_v35  ;;  %4904 = vmatpush1.bf16.msra.mxu1 %v7182_v38  ;;  %v7254_v35 = vld [vmem:[#allocation5 + $0x1368] ss:$20 sps:$4 sm:$0xff]   ;;  %v7259_v38 = vld [vmem:[#allocation5 + $0x138c] ss:$20 sps:$4 sm:$0xff]  }
 0x220   :  { %4561 = vmatprep.subr.bf16.mxu0 %v7187_v39  ;;  %4905 = vmatprep.subr.bf16.mxu1 %v7190_v40  ;;  %v7262_v39 = vld [vmem:[#allocation5 + $0x1394] ss:$20 sps:$4 sm:$0xff]  }
 0x221   :  { %4591 = vmatprep.mubr.bf16.mxu0 %v7750_v41  ;;  %4935 = vmatprep.mubr.bf16.mxu1 %v7750_v41  ;;  %v7257_v40 = vld [vmem:[#allocation5 + $0x1388] ss:$20 sps:$4 sm:$0xff]  }
 0x223   :  { %4562 = vmatpush1.bf16.msra.mxu0 %v7185_v43  ;;  %4906 = vmatpush1.bf16.msra.mxu1 %v7188_v44  ;;  %v7260_v43 = vld [vmem:[#allocation5 + $0x1390] ss:$20 sps:$4 sm:$0xff]   ;;  %v7265_v44 = vld [vmem:[#allocation5 + $0x13b4] ss:$20 sps:$4 sm:$0xff]  }
 0x224   :  { %4563 = vmatprep.subr.bf16.mxu0 %v7193_v45  ;;  %4907 = vmatprep.subr.bf16.mxu1 %v7196_v46  ;;  %v7268_v45 = vld [vmem:[#allocation5 + $0x13bc] ss:$20 sps:$4 sm:$0xff]  }
 0x225   :  { %v7263_v46 = vld [vmem:[#allocation5 + $0x13b0] ss:$20 sps:$4 sm:$0xff]  }
 0x227   :  { %4564 = vmatpush1.bf16.msra.mxu0 %v7191_v48  ;;  %4908 = vmatpush1.bf16.msra.mxu1 %v7194_v49  ;;  %v7266_v48 = vld [vmem:[#allocation5 + $0x13b8] ss:$20 sps:$4 sm:$0xff]   ;;  %v7271_v49 = vld [vmem:[#allocation5 + $0x13dc] ss:$20 sps:$4 sm:$0xff]  }
 0x228   :  { %4565 = vmatprep.subr.bf16.mxu0 %v7199_v51  ;;  %4909 = vmatprep.subr.bf16.mxu1 %v7202_v52  ;;  %v7274_v51 = vld [vmem:[#allocation5 + $0x13e4] ss:$20 sps:$4 sm:$0xff]  }
 0x229   :  { %v7269_v52 = vld [vmem:[#allocation5 + $0x13d8] ss:$20 sps:$4 sm:$0xff]  }
 0x22b   :  { %4566 = vmatpush1.bf16.msra.mxu0 %v7197_v53  ;;  %4910 = vmatpush1.bf16.msra.mxu1 %v7200_v54  ;;  %v7272_v53 = vld [vmem:[#allocation5 + $0x13e0] ss:$20 sps:$4 sm:$0xff]  }
 0x22c   :  { %4567 = vmatprep.subr.bf16.mxu0 %v7205_v55  ;;  %4911 = vmatprep.subr.bf16.mxu1 %v7208_v56  ;;  %v101_v54 = vld [vmem:[#allocation2 + $0x70] sm:$0xff] }
 0x22d   :  { %v117_v55 = vld [vmem:[#allocation2 + $0xf0] sm:$0xff] }
 0x22e   :  { %v7275_v56 = vld [vmem:[#allocation5 + $0x150] ss:$20 sps:$4 sm:$0xff]  }
 0x22f   :  { %4568 = vmatpush1.bf16.msra.mxu0 %v7203_v57  ;;  %4912 = vmatpush1.bf16.msra.mxu1 %v7206_v59  ;;  %v7277_v57 = vld [vmem:[#allocation5 + $0x3d0] ss:$20 sps:$4 sm:$0xff]   ;;  %v7756_v59 = vpack.c.bf16 %v117_v55, %v101_v54  ;;  %v7327_v54 = vld [vmem:[#allocation5 + $0x718] ss:$20 sps:$4 sm:$0xff]  }
 0x230   :  { %4569 = vmatprep.subr.bf16.mxu0 %v7211_v60  ;;  %4913 = vmatprep.subr.bf16.mxu1 %v7214_v61  ;;  %v7276_v60 = vld [vmem:[#allocation5 + $0x10] ss:$20 sps:$4 sm:$0xff]   ;;  %v7329_v55 = vld [vmem:[#allocation5 + $0x998] ss:$20 sps:$4 sm:$0xff]  }
 0x231   :  { %v7278_v61 = vld [vmem:[#allocation5 + $0x290] ss:$20 sps:$4 sm:$0xff]  }
 0x233   :  { %4570 = vmatpush1.bf16.msra.mxu0 %v7209_v62  ;;  %4914 = vmatpush1.bf16.msra.mxu1 %v7212_v0  ;;  %v7279_v62 = vld [vmem:[#allocation5 + $0x178] ss:$20 sps:$4 sm:$0xff]  }
 0x234   :  { %4571 = vmatprep.subr.bf16.mxu0 %v7217_v1  ;;  %4915 = vmatprep.subr.bf16.mxu1 %v7220_v2  ;;  %v7281_v0 = vld [vmem:[#allocation5 + $0x3f8] ss:$20 sps:$4 sm:$0xff]  }
 0x235   :  { %v7280_v1 = vld [vmem:[#allocation5 + $0x38] ss:$20 sps:$4 sm:$0xff]  }
 0x236   :  { %v7282_v2 = vld [vmem:[#allocation5 + $0x2b8] ss:$20 sps:$4 sm:$0xff]  }
 0x237   :  { %4572 = vmatpush1.bf16.msra.mxu0 %v7215_v3  ;;  %4916 = vmatpush1.bf16.msra.mxu1 %v7218_v4  ;;  %v7283_v3 = vld [vmem:[#allocation5 + $0x1a0] ss:$20 sps:$4 sm:$0xff]  }
 0x238   :  { %4573 = vmatprep.subr.bf16.mxu0 %v7223_v5  ;;  %4917 = vmatprep.subr.bf16.mxu1 %v7226_v6  ;;  %v7285_v4 = vld [vmem:[#allocation5 + $0x420] ss:$20 sps:$4 sm:$0xff]  }
 0x239   :  { %v7284_v5 = vld [vmem:[#allocation5 + $0x60] ss:$20 sps:$4 sm:$0xff]  }
 0x23a   :  { %v7286_v6 = vld [vmem:[#allocation5 + $0x2e0] ss:$20 sps:$4 sm:$0xff]  }
 0x23b   :  { %4574 = vmatpush1.bf16.msra.mxu0 %v7221_v7  ;;  %4918 = vmatpush1.bf16.msra.mxu1 %v7224_v8  ;;  %v7287_v7 = vld [vmem:[#allocation5 + $0x1c8] ss:$20 sps:$4 sm:$0xff]  }
 0x23c   :  { %4575 = vmatprep.subr.bf16.mxu0 %v7229_v10  ;;  %4919 = vmatprep.subr.bf16.mxu1 %v7232_v11  ;;  %v7289_v8 = vld [vmem:[#allocation5 + $0x448] ss:$20 sps:$4 sm:$0xff]  }
 0x23d   :  { %v7288_v10 = vld [vmem:[#allocation5 + $0x88] ss:$20 sps:$4 sm:$0xff]  }
 0x23e   :  { %v7290_v11 = vld [vmem:[#allocation5 + $0x308] ss:$20 sps:$4 sm:$0xff]  }
 0x23f   :  { %4576 = vmatpush1.bf16.msra.mxu0 %v7227_v13  ;;  %4920 = vmatpush1.bf16.msra.mxu1 %v7230_v14  ;;  %v7291_v13 = vld [vmem:[#allocation5 + $0x1f0] ss:$20 sps:$4 sm:$0xff]  }
 0x240   :  { %4577 = vmatprep.subr.bf16.mxu0 %v7235_v15  ;;  %4921 = vmatprep.subr.bf16.mxu1 %v7238_v16  ;;  %v7293_v14 = vld [vmem:[#allocation5 + $0x470] ss:$20 sps:$4 sm:$0xff]   ;;  %v7295_v15 = vld [vmem:[#allocation5 + $0x218] ss:$20 sps:$4 sm:$0xff]  }
 0x241   :  { %v7297_v16 = vld [vmem:[#allocation5 + $0x498] ss:$20 sps:$4 sm:$0xff]  }
 0x243   :  { %4578 = vmatpush1.bf16.msra.mxu0 %v7233_v19  ;;  %4922 = vmatpush1.bf16.msra.mxu1 %v7236_v20  ;;  %v7296_v19 = vld [vmem:[#allocation5 + $0xd8] ss:$20 sps:$4 sm:$0xff]  }
 0x244   :  { %4579 = vmatprep.subr.bf16.mxu0 %v7241_v21  ;;  %4923 = vmatprep.subr.bf16.mxu1 %v7244_v22  ;;  %v7298_v20 = vld [vmem:[#allocation5 + $0x358] ss:$20 sps:$4 sm:$0xff]   ;;  %v7299_v21 = vld [vmem:[#allocation5 + $0x240] ss:$20 sps:$4 sm:$0xff]  }
 0x245   :  { %v7301_v22 = vld [vmem:[#allocation5 + $0x4c0] ss:$20 sps:$4 sm:$0xff]  }
 0x247   :  { %4580 = vmatpush1.bf16.msra.mxu0 %v7239_v23  ;;  %4924 = vmatpush1.bf16.msra.mxu1 %v7242_v25  ;;  %v7300_v23 = vld [vmem:[#allocation5 + $0x100] ss:$20 sps:$4 sm:$0xff]  }
 0x248   :  { %4581 = vmatprep.subr.bf16.mxu0 %v7247_v26  ;;  %4925 = vmatprep.subr.bf16.mxu1 %v7250_v27  ;;  %v7302_v25 = vld [vmem:[#allocation5 + $0x380] ss:$20 sps:$4 sm:$0xff]   ;;  %v7303_v26 = vld [vmem:[#allocation5 + $0x268] ss:$20 sps:$4 sm:$0xff]  }
 0x249   :  { %v7305_v27 = vld [vmem:[#allocation5 + $0x4e8] ss:$20 sps:$4 sm:$0xff]  }
 0x24b   :  { %4582 = vmatpush1.bf16.msra.mxu0 %v7245_v29  ;;  %4926 = vmatpush1.bf16.msra.mxu1 %v7248_v30  ;;  %v7304_v29 = vld [vmem:[#allocation5 + $0x128] ss:$20 sps:$4 sm:$0xff]  }
 0x24c   :  { %4583 = vmatprep.subr.bf16.mxu0 %v7253_v31  ;;  %4927 = vmatprep.subr.bf16.mxu1 %v7256_v32  ;;  %v7306_v30 = vld [vmem:[#allocation5 + $0x3a8] ss:$20 sps:$4 sm:$0xff]   ;;  %v7307_v31 = vld [vmem:[#allocation5 + $0x650] ss:$20 sps:$4 sm:$0xff]  }
 0x24d   :  { %v7309_v32 = vld [vmem:[#allocation5 + $0x8d0] ss:$20 sps:$4 sm:$0xff]  }
 0x24f   :  { %4584 = vmatpush1.bf16.msra.mxu0 %v7251_v34  ;;  %4928 = vmatpush1.bf16.msra.mxu1 %v7254_v35  ;;  %v7308_v34 = vld [vmem:[#allocation5 + $0x510] ss:$20 sps:$4 sm:$0xff]  }
 0x250   :  { %4585 = vmatprep.subr.bf16.mxu0 %v7259_v38  ;;  %4929 = vmatprep.subr.bf16.mxu1 %v7262_v39  ;;  %v7310_v35 = vld [vmem:[#allocation5 + $0x790] ss:$20 sps:$4 sm:$0xff]   ;;  %v7311_v38 = vld [vmem:[#allocation5 + $0x678] ss:$20 sps:$4 sm:$0xff]  }
 0x251   :  { %v7313_v39 = vld [vmem:[#allocation5 + $0x8f8] ss:$20 sps:$4 sm:$0xff]  }
 0x253   :  { %4586 = vmatpush1.bf16.msra.mxu0 %v7257_v40  ;;  %4930 = vmatpush1.bf16.msra.mxu1 %v7260_v43  ;;  %v7312_v40 = vld [vmem:[#allocation5 + $0x538] ss:$20 sps:$4 sm:$0xff]  }
 0x254   :  { %4587 = vmatprep.subr.bf16.mxu0 %v7265_v44  ;;  %4931 = vmatprep.subr.bf16.mxu1 %v7268_v45  ;;  %v7314_v43 = vld [vmem:[#allocation5 + $0x7b8] ss:$20 sps:$4 sm:$0xff]   ;;  %v7315_v44 = vld [vmem:[#allocation5 + $0x6a0] ss:$20 sps:$4 sm:$0xff]  }
 0x255   :  { %v7317_v45 = vld [vmem:[#allocation5 + $0x920] ss:$20 sps:$4 sm:$0xff]  }
 0x257   :  { %4588 = vmatpush1.bf16.msra.mxu0 %v7263_v46  ;;  %4932 = vmatpush1.bf16.msra.mxu1 %v7266_v48  ;;  %v7316_v46 = vld [vmem:[#allocation5 + $0x560] ss:$20 sps:$4 sm:$0xff]  }
 0x258   :  { %4589 = vmatprep.subr.bf16.mxu0 %v7271_v49  ;;  %4933 = vmatprep.subr.bf16.mxu1 %v7274_v51  ;;  %v7318_v48 = vld [vmem:[#allocation5 + $0x7e0] ss:$20 sps:$4 sm:$0xff]   ;;  %v7320_v49 = vld [vmem:[#allocation5 + $0x588] ss:$20 sps:$4 sm:$0xff]  }
 0x259   :  { %v7322_v51 = vld [vmem:[#allocation5 + $0x808] ss:$20 sps:$4 sm:$0xff]  }
 0x25b   :  { %4590 = vmatpush1.bf16.msra.mxu0 %v7269_v52  ;;  %4934 = vmatpush1.bf16.msra.mxu1 %v7272_v53  ;;  %v7323_v52 = vld [vmem:[#allocation5 + $0x6f0] ss:$20 sps:$4 sm:$0xff]  }
 0x25c   :  { %6235 = vmatprep.subr.bf16.mxu0 %v7275_v56  ;;  %6257 = vmatprep.subr.bf16.mxu1 %v7277_v57  ;;  %v7325_v53 = vld [vmem:[#allocation5 + $0x970] ss:$20 sps:$4 sm:$0xff]   ;;  %v7328_v56 = vld [vmem:[#allocation5 + $0x5d8] ss:$20 sps:$4 sm:$0xff]  }
 0x25d   :  { %v7330_v57 = vld [vmem:[#allocation5 + $0x858] ss:$20 sps:$4 sm:$0xff]  }
 0x25e   :  { %4592 = vmatmul.mubr.bf16.vlgmr.msra.gmra.mrb[0].mxu0 %v7756_v59  ;;  %4936 = vmatmul.mubr.bf16.vlgmr.msra.gmra.mrb[0].mxu1 %v7756_v59 }
 0x25f   :  { %6236 = vmatpush3.bf16.msra.mxu0 %v7276_v60  ;;  %6258 = vmatpush3.bf16.msra.mxu1 %v7278_v61  ;;  %v7331_v60 = vld [vmem:[#allocation5 + $0x740] ss:$20 sps:$4 sm:$0xff]  }
 0x260   :  { %6237 = vmatprep.subr.bf16.mxu0 %v7279_v62  ;;  %6259 = vmatprep.subr.bf16.mxu1 %v7281_v0  ;;  %v7333_v61 = vld [vmem:[#allocation5 + $0x9c0] ss:$20 sps:$4 sm:$0xff]  }
 0x261   :  { %4978 = vmatprep.mubr.bf16.mxu0 %v7696_v50  ;;  %5019 = vmatprep.mubr.bf16.mxu1 %v7704_v36  ;;  %v7292_v50 = vld [vmem:[#allocation5 + $0xb0] ss:$20 sps:$4 sm:$0xff]   ;;  %v7332_v62 = vld [vmem:[#allocation5 + $0x600] ss:$20 sps:$4 sm:$0xff]  }
 0x262   :  { %v7294_v36 = vld [vmem:[#allocation5 + $0x330] ss:$20 sps:$4 sm:$0xff]   ;;  %v7334_v0 = vld [vmem:[#allocation5 + $0x880] ss:$20 sps:$4 sm:$0xff]  }
 0x263   :  { %6238 = vmatpush3.bf16.msra.mxu0 %v7280_v1  ;;  %6260 = vmatpush3.bf16.msra.mxu1 %v7282_v2  ;;  %v7335_v1 = vld [vmem:[#allocation5 + $0x768] ss:$20 sps:$4 sm:$0xff]  }
 0x264   :  { %6239 = vmatprep.subr.bf16.mxu0 %v7283_v3  ;;  %6261 = vmatprep.subr.bf16.mxu1 %v7285_v4  ;;  %v7337_v2 = vld [vmem:[#allocation5 + $0x9e8] ss:$20 sps:$4 sm:$0xff]  }
 0x265   :  { %v7336_v3 = vld [vmem:[#allocation5 + $0x628] ss:$20 sps:$4 sm:$0xff]  }
 0x266   :  { %v7338_v4 = vld [vmem:[#allocation5 + $0x8a8] ss:$20 sps:$4 sm:$0xff]  }
 0x267   :  { %6240 = vmatpush3.bf16.msra.mxu0 %v7284_v5  ;;  %6262 = vmatpush3.bf16.msra.mxu1 %v7286_v6  ;;  %v7339_v5 = vld [vmem:[#allocation5 + $0xb50] ss:$20 sps:$4 sm:$0xff]  }
 0x268   :  { %6241 = vmatprep.subr.bf16.mxu0 %v7287_v7  ;;  %6263 = vmatprep.subr.bf16.mxu1 %v7289_v8  ;;  %v7341_v6 = vld [vmem:[#allocation5 + $0xdd0] ss:$20 sps:$4 sm:$0xff]  }
 0x269   :  { %v7340_v7 = vld [vmem:[#allocation5 + $0xa10] ss:$20 sps:$4 sm:$0xff]  }
 0x26a   :  { %v7342_v8 = vld [vmem:[#allocation5 + $0xc90] ss:$20 sps:$4 sm:$0xff]  }
 0x26b   :  { %6242 = vmatpush3.bf16.msra.mxu0 %v7288_v10  ;;  %6264 = vmatpush3.bf16.msra.mxu1 %v7290_v11  ;;  %v7343_v10 = vld [vmem:[#allocation5 + $0xb78] ss:$20 sps:$4 sm:$0xff]  }
 0x26c   :  { %6243 = vmatprep.subr.bf16.mxu0 %v7291_v13  ;;  %6265 = vmatprep.subr.bf16.mxu1 %v7293_v14  ;;  %v7345_v11 = vld [vmem:[#allocation5 + $0xdf8] ss:$20 sps:$4 sm:$0xff]  }
 0x26d   :  { %v7344_v13 = vld [vmem:[#allocation5 + $0xa38] ss:$20 sps:$4 sm:$0xff]  }
 0x26e   :  { %v7346_v14 = vld [vmem:[#allocation5 + $0xcb8] ss:$20 sps:$4 sm:$0xff]  }
 0x26f   :  { %6244 = vmatpush3.bf16.msra.mxu0 %v7292_v50  ;;  %6266 = vmatpush3.bf16.msra.mxu1 %v7294_v36  ;;  %v7347_v50 = vld [vmem:[#allocation5 + $0xba0] ss:$20 sps:$4 sm:$0xff]  }
 0x270   :  { %6245 = vmatprep.subr.bf16.mxu0 %v7295_v15  ;;  %6267 = vmatprep.subr.bf16.mxu1 %v7297_v16  ;;  %v7349_v36 = vld [vmem:[#allocation5 + $0xe20] ss:$20 sps:$4 sm:$0xff]  }
 0x271   :  { %v7348_v15 = vld [vmem:[#allocation5 + $0xa60] ss:$20 sps:$4 sm:$0xff]  }
 0x272   :  { %v7350_v16 = vld [vmem:[#allocation5 + $0xce0] ss:$20 sps:$4 sm:$0xff]  }
 0x273   :  { %6246 = vmatpush3.bf16.msra.mxu0 %v7296_v19  ;;  %6268 = vmatpush3.bf16.msra.mxu1 %v7298_v20  ;;  %v7352_v19 = vld [vmem:[#allocation5 + $0xa88] ss:$20 sps:$4 sm:$0xff]  }
 0x274   :  { %6247 = vmatprep.subr.bf16.mxu0 %v7299_v21  ;;  %6269 = vmatprep.subr.bf16.mxu1 %v7301_v22  ;;  %v7354_v20 = vld [vmem:[#allocation5 + $0xd08] ss:$20 sps:$4 sm:$0xff]   ;;  %v7355_v21 = vld [vmem:[#allocation5 + $0xbf0] ss:$20 sps:$4 sm:$0xff]  }
 0x275   :  { %v7357_v22 = vld [vmem:[#allocation5 + $0xe70] ss:$20 sps:$4 sm:$0xff]  }
 0x277   :  { %6248 = vmatpush3.bf16.msra.mxu0 %v7300_v23  ;;  %6270 = vmatpush3.bf16.msra.mxu1 %v7302_v25  ;;  %v7359_v23 = vld [vmem:[#allocation5 + $0xc18] ss:$20 sps:$4 sm:$0xff]  }
 0x278   :  { %6249 = vmatprep.subr.bf16.mxu0 %v7303_v26  ;;  %6271 = vmatprep.subr.bf16.mxu1 %v7305_v27  ;;  %v7361_v25 = vld [vmem:[#allocation5 + $0xe98] ss:$20 sps:$4 sm:$0xff]  }
 0x279   :  { %v7360_v26 = vld [vmem:[#allocation5 + $0xad8] ss:$20 sps:$4 sm:$0xff]  }
 0x27a   :  { %v7362_v27 = vld [vmem:[#allocation5 + $0xd58] ss:$20 sps:$4 sm:$0xff]  }
 0x27b   :  { %6250 = vmatpush3.bf16.msra.mxu0 %v7304_v29  ;;  %6272 = vmatpush3.bf16.msra.mxu1 %v7306_v30  ;;  %v7363_v29 = vld [vmem:[#allocation5 + $0xc40] ss:$20 sps:$4 sm:$0xff]  }
 0x27c   :  { %6279 = vmatprep.subr.bf16.mxu0 %v7307_v31  ;;  %6301 = vmatprep.subr.bf16.mxu1 %v7309_v32  ;;  %v7365_v30 = vld [vmem:[#allocation5 + $0xec0] ss:$20 sps:$4 sm:$0xff]  }
 0x27d   :  { %v7364_v31 = vld [vmem:[#allocation5 + $0xb00] ss:$20 sps:$4 sm:$0xff]  }
 0x27e   :  { %4979 = vmatmul.mubr.bf16.vlgmr.msra.gmra.mrb[4].mxu0 %v7700_v9  ;;  %5020 = vmatmul.mubr.bf16.vlgmr.msra.gmra.mrb[4].mxu1 %v7708_v17  ;;  %v7319_v9 = vld [vmem:[#allocation5 + $0x6c8] ss:$20 sps:$4 sm:$0xff]   ;;  %v7366_v32 = vld [vmem:[#allocation5 + $0xd80] ss:$20 sps:$4 sm:$0xff]  }
 0x27f   :  { %6280 = vmatpush3.bf16.msra.mxu0 %v7308_v34  ;;  %6302 = vmatpush3.bf16.msra.mxu1 %v7310_v35  ;;  %v7321_v17 = vld [vmem:[#allocation5 + $0x948] ss:$20 sps:$4 sm:$0xff]  }
 0x280   :  { %6281 = vmatprep.subr.bf16.mxu0 %v7311_v38  ;;  %6303 = vmatprep.subr.bf16.mxu1 %v7313_v39  ;;  %v7367_v34 = vld [vmem:[#allocation5 + $0xc68] ss:$20 sps:$4 sm:$0xff]  }
 0x281   :  { %5060 = vmatprep.mubr.bf16.mxu0 %v7712_v24  ;;  %5101 = vmatprep.mubr.bf16.mxu1 %v7718_v33  ;;  %v7324_v24 = vld [vmem:[#allocation5 + $0x5b0] ss:$20 sps:$4 sm:$0xff]   ;;  %v7369_v35 = vld [vmem:[#allocation5 + $0xee8] ss:$20 sps:$4 sm:$0xff]  }
 0x282   :  { %v7326_v33 = vld [vmem:[#allocation5 + $0x830] ss:$20 sps:$4 sm:$0xff]   ;;  %v7368_v38 = vld [vmem:[#allocation5 + $0xb28] ss:$20 sps:$4 sm:$0xff]  }
 0x283   :  { %6282 = vmatpush3.bf16.msra.mxu0 %v7312_v40  ;;  %6304 = vmatpush3.bf16.msra.mxu1 %v7314_v43  ;;  %v7370_v39 = vld [vmem:[#allocation5 + $0xda8] ss:$20 sps:$4 sm:$0xff]   ;;  %v7371_v40 = vld [vmem:[#allocation5 + $0x1050] ss:$20 sps:$4 sm:$0xff]  }
 0x284   :  { %6283 = vmatprep.subr.bf16.mxu0 %v7315_v44  ;;  %6305 = vmatprep.subr.bf16.mxu1 %v7317_v45  ;;  %v7373_v43 = vld [vmem:[#allocation5 + $0x12d0] ss:$20 sps:$4 sm:$0xff]  }
 0x285   :  { %v7372_v44 = vld [vmem:[#allocation5 + $0xf10] ss:$20 sps:$4 sm:$0xff]  }
 0x286   :  { %v7374_v45 = vld [vmem:[#allocation5 + $0x1190] ss:$20 sps:$4 sm:$0xff]  }
 0x287   :  { %6284 = vmatpush3.bf16.msra.mxu0 %v7316_v46  ;;  %6306 = vmatpush3.bf16.msra.mxu1 %v7318_v48  ;;  %v7375_v46 = vld [vmem:[#allocation5 + $0x1078] ss:$20 sps:$4 sm:$0xff]  }
 0x288   :  { %6285 = vmatprep.subr.bf16.mxu0 %v7319_v9  ;;  %6307 = vmatprep.subr.bf16.mxu1 %v7321_v17  ;;  %v7377_v48 = vld [vmem:[#allocation5 + $0x12f8] ss:$20 sps:$4 sm:$0xff]  }
 0x289   :  { %v7376_v9 = vld [vmem:[#allocation5 + $0xf38] ss:$20 sps:$4 sm:$0xff]  }
 0x28a   :  { %v7378_v17 = vld [vmem:[#allocation5 + $0x11b8] ss:$20 sps:$4 sm:$0xff]  }
 0x28b   :  { %6286 = vmatpush3.bf16.msra.mxu0 %v7320_v49  ;;  %6308 = vmatpush3.bf16.msra.mxu1 %v7322_v51  ;;  %v7379_v49 = vld [vmem:[#allocation5 + $0x10a0] ss:$20 sps:$4 sm:$0xff]  }
 0x28c   :  { %6287 = vmatprep.subr.bf16.mxu0 %v7323_v52  ;;  %6309 = vmatprep.subr.bf16.mxu1 %v7325_v53  ;;  %v7381_v51 = vld [vmem:[#allocation5 + $0x1320] ss:$20 sps:$4 sm:$0xff]  }
 0x28d   :  { %v7380_v52 = vld [vmem:[#allocation5 + $0xf60] ss:$20 sps:$4 sm:$0xff]  }
 0x28e   :  { %v7382_v53 = vld [vmem:[#allocation5 + $0x11e0] ss:$20 sps:$4 sm:$0xff]  }
 0x28f   :  { %6288 = vmatpush3.bf16.msra.mxu0 %v7324_v24  ;;  %6310 = vmatpush3.bf16.msra.mxu1 %v7326_v33  ;;  %v7384_v24 = vld [vmem:[#allocation5 + $0xf88] ss:$20 sps:$4 sm:$0xff]  }
 0x290   :  { %6289 = vmatprep.subr.bf16.mxu0 %v7327_v54  ;;  %6311 = vmatprep.subr.bf16.mxu1 %v7329_v55  ;;  %v7386_v33 = vld [vmem:[#allocation5 + $0x1208] ss:$20 sps:$4 sm:$0xff]   ;;  %v7387_v54 = vld [vmem:[#allocation5 + $0x10f0] ss:$20 sps:$4 sm:$0xff]  }
 0x291   :  { %v7389_v55 = vld [vmem:[#allocation5 + $0x1370] ss:$20 sps:$4 sm:$0xff]  }
 0x293   :  { %6290 = vmatpush3.bf16.msra.mxu0 %v7328_v56  ;;  %6312 = vmatpush3.bf16.msra.mxu1 %v7330_v57  ;;  %v7391_v56 = vld [vmem:[#allocation5 + $0x1118] ss:$20 sps:$4 sm:$0xff]  }
 0x294   :  { %6291 = vmatprep.subr.bf16.mxu0 %v7331_v60  ;;  %6313 = vmatprep.subr.bf16.mxu1 %v7333_v61  ;;  %v7393_v57 = vld [vmem:[#allocation5 + $0x1398] ss:$20 sps:$4 sm:$0xff]  }
 0x295   :  { %v7392_v60 = vld [vmem:[#allocation5 + $0xfd8] ss:$20 sps:$4 sm:$0xff]  }
 0x296   :  { %v7394_v61 = vld [vmem:[#allocation5 + $0x1258] ss:$20 sps:$4 sm:$0xff]  }
 0x297   :  { %6292 = vmatpush3.bf16.msra.mxu0 %v7332_v62  ;;  %6314 = vmatpush3.bf16.msra.mxu1 %v7334_v0  ;;  %v7395_v62 = vld [vmem:[#allocation5 + $0x1140] ss:$20 sps:$4 sm:$0xff]  }
 0x298   :  { %6293 = vmatprep.subr.bf16.mxu0 %v7335_v1  ;;  %6315 = vmatprep.subr.bf16.mxu1 %v7337_v2  ;;  %v7397_v0 = vld [vmem:[#allocation5 + $0x13c0] ss:$20 sps:$4 sm:$0xff]  }
 0x299   :  { %v7396_v1 = vld [vmem:[#allocation5 + $0x1000] ss:$20 sps:$4 sm:$0xff]  }
 0x29a   :  { %v7398_v2 = vld [vmem:[#allocation5 + $0x1280] ss:$20 sps:$4 sm:$0xff]  }
 0x29b   :  { %6294 = vmatpush3.bf16.msra.mxu0 %v7336_v3  ;;  %6316 = vmatpush3.bf16.msra.mxu1 %v7338_v4  ;;  %v7399_v3 = vld [vmem:[#allocation5 + $0x1168] ss:$20 sps:$4 sm:$0xff]  }
 0x29c   :  { %6323 = vmatprep.subr.bf16.mxu0 %v7339_v5  ;;  %6345 = vmatprep.subr.bf16.mxu1 %v7341_v6  ;;  %v7401_v4 = vld [vmem:[#allocation5 + $0x13e8] ss:$20 sps:$4 sm:$0xff]  }
 0x29d   :  { %v7400_v5 = vld [vmem:[#allocation5 + $0x1028] ss:$20 sps:$4 sm:$0xff]  }
 0x29e   :  { %5061 = vmatmul.mubr.bf16.vlgmr.msra.gmra.mrb[8].mxu0 %v7716_v28  ;;  %5102 = vmatmul.mubr.bf16.vlgmr.msra.gmra.mrb[8].mxu1 %v7724_v42  ;;  %v7351_v28 = vld [vmem:[#allocation5 + $0xbc8] ss:$20 sps:$4 sm:$0xff]  }
 0x29f   :  { %6324 = vmatpush3.bf16.msra.mxu0 %v7340_v7  ;;  %6346 = vmatpush3.bf16.msra.mxu1 %v7342_v8  ;;  %v7353_v42 = vld [vmem:[#allocation5 + $0xe48] ss:$20 sps:$4 sm:$0xff]   ;;  %v7403_v7 = vld [vmem:[%s7852_s3 + $0x40] sm:$0xff]  }
 0x2a0   :  { %6325 = vmatprep.subr.bf16.mxu0 %v7343_v10  ;;  %6347 = vmatprep.subr.bf16.mxu1 %v7345_v11  ;;  %v7402_v6 = vld [vmem:[#allocation5 + $0x12a8] ss:$20 sps:$4 sm:$0xff]   ;;  %v7404_v8 = vld [vmem:[%s7852_s3] sm:$0xff]  }
 0x2a1   :  { %5142 = vmatprep.mubr.bf16.mxu0 %v7726_v47  ;;  %5183 = vmatprep.mubr.bf16.mxu1 %v7734_v63  ;;  %v7356_v47 = vld [vmem:[#allocation5 + $0xab0] ss:$20 sps:$4 sm:$0xff]   ;;  %v7405_v10 = vld [vmem:[%s7852_s3 + $0x48] sm:$0xff]  }
 0x2a2   :  { %v7358_v63 = vld [vmem:[#allocation5 + $0xd30] ss:$20 sps:$4 sm:$0xff]   ;;  %v7406_v11 = vld [vmem:[%s7852_s3 + $0x8] sm:$0xff]  }
 0x2a3   :  { %6326 = vmatpush3.bf16.msra.mxu0 %v7344_v13  ;;  %6348 = vmatpush3.bf16.msra.mxu1 %v7346_v14  ;;  %v7407_v13 = vld [vmem:[%s7852_s3 + $0x50] sm:$0xff]  }
 0x2a4   :  { %6327 = vmatprep.subr.bf16.mxu0 %v7347_v50  ;;  %6349 = vmatprep.subr.bf16.mxu1 %v7349_v36  ;;  %v7408_v14 = vld [vmem:[%s7852_s3 + $0x10] sm:$0xff]   ;;  %v7411_v50 = vld [vmem:[%s7852_s3 + $0x60] sm:$0xff]  }
 0x2a5   :  { %v7412_v36 = vld [vmem:[%s7852_s3 + $0x20] sm:$0xff]  }
 0x2a7   :  { %6328 = vmatpush3.bf16.msra.mxu0 %v7348_v15  ;;  %6350 = vmatpush3.bf16.msra.mxu1 %v7350_v16  ;;  %v7413_v15 = vld [vmem:[%s7852_s3 + $0x68] sm:$0xff]  }
 0x2a8   :  { %6329 = vmatprep.subr.bf16.mxu0 %v7351_v28  ;;  %6351 = vmatprep.subr.bf16.mxu1 %v7353_v42  ;;  %v7414_v16 = vld [vmem:[%s7852_s3 + $0x28] sm:$0xff]   ;;  %v7415_v28 = vld [vmem:[%s7852_s3 + $0x70] sm:$0xff]  }
 0x2a9   :  { %v7416_v42 = vld [vmem:[%s7852_s3 + $0x30] sm:$0xff]  }
 0x2ab   :  { %6330 = vmatpush3.bf16.msra.mxu0 %v7352_v19  ;;  %6352 = vmatpush3.bf16.msra.mxu1 %v7354_v20  ;;  %v7417_v19 = vld [vmem:[%s7852_s3 + $0x78] sm:$0xff]  }
 0x2ac   :  { %6331 = vmatprep.subr.bf16.mxu0 %v7355_v21  ;;  %6353 = vmatprep.subr.bf16.mxu1 %v7357_v22  ;;  %v7418_v20 = vld [vmem:[%s7852_s3 + $0x38] sm:$0xff]   ;;  %v905_v21 = vlaneseq }
 0x2ae   :  { %v7824_v22 = vshrl.u32 %v905_v21, 7 }
 0x2af   :  { %6332 = vmatpush3.bf16.msra.mxu0 %v7356_v47  ;;  %6354 = vmatpush3.bf16.msra.mxu1 %v7358_v63  ;;  %v903_v63 = vld [vmem:[#allocation7] sm:$0x1f] }
 0x2b0   :  { %6333 = vmatprep.subr.bf16.mxu0 %v7359_v23  ;;  %6355 = vmatprep.subr.bf16.mxu1 %v7361_v25  ;;  %v915_v47 = vsub.s32 2, %v7824_v22  ;;  %v919_v23 = vsub.s32 3, %v7824_v22 }
 0x2b2   :  { %v916_v25 = vrot.slane %v903_v63, %v915_v47 }
 0x2b3   :  { %6334 = vmatpush3.bf16.msra.mxu0 %v7360_v26  ;;  %6356 = vmatpush3.bf16.msra.mxu1 %v7362_v27  ;;  %v920_v26 = vrot.slane %v903_v63, %v919_v23 }
 0x2b4   :  { %6335 = vmatprep.subr.bf16.mxu0 %v7363_v29  ;;  %6357 = vmatprep.subr.bf16.mxu1 %v7365_v30 }
 0x2b7   :  { %6336 = vmatpush3.bf16.msra.mxu0 %v7364_v31  ;;  %6358 = vmatpush3.bf16.msra.mxu1 %v7366_v32 }
 0x2b8   :  { %6337 = vmatprep.subr.bf16.mxu0 %v7367_v34  ;;  %6359 = vmatprep.subr.bf16.mxu1 %v7369_v35 }
 0x2bb   :  { %6338 = vmatpush3.bf16.msra.mxu0 %v7368_v38  ;;  %6360 = vmatpush3.bf16.msra.mxu1 %v7370_v39 }
 0x2bc   :  { %6367 = vmatprep.subr.bf16.mxu0 %v7371_v40  ;;  %6389 = vmatprep.subr.bf16.mxu1 %v7373_v43 }
 0x2be   :  { %5143 = vmatmul.mubr.bf16.vlgmr.msra.gmra.mrb[12].mxu0 %v7732_v58  ;;  %5184 = vmatmul.mubr.bf16.vlgmr.msra.gmra.mrb[12].mxu1 %v7740_v12  ;;  %v7383_v58 = vld [vmem:[#allocation5 + $0x10c8] ss:$20 sps:$4 sm:$0xff]  }
 0x2bf   :  { %6368 = vmatpush3.bf16.msra.mxu0 %v7372_v44  ;;  %6390 = vmatpush3.bf16.msra.mxu1 %v7374_v45  ;;  %v7385_v12 = vld [vmem:[#allocation5 + $0x1348] ss:$20 sps:$4 sm:$0xff]   ;;  %v907_v45 = vsub.s32 0, %v7824_v22 }
 0x2c0   :  { %6369 = vmatprep.subr.bf16.mxu0 %v7375_v46  ;;  %6391 = vmatprep.subr.bf16.mxu1 %v7377_v48 }
 0x2c1   :  { %5224 = vmatprep.mubr.bf16.mxu0 %v7742_v18  ;;  %5265 = vmatprep.mubr.bf16.mxu1 %v7750_v41  ;;  %v7388_v18 = vld [vmem:[#allocation5 + $0xfb0] ss:$20 sps:$4 sm:$0xff]  }
 0x2c2   :  { %v7390_v41 = vld [vmem:[#allocation5 + $0x1230] ss:$20 sps:$4 sm:$0xff]  }
 0x2c3   :  { %6370 = vmatpush3.bf16.msra.mxu0 %v7376_v9  ;;  %6392 = vmatpush3.bf16.msra.mxu1 %v7378_v17  ;;  %v911_v9 = vsub.s32 1, %v7824_v22 }
 0x2c4   :  { %6371 = vmatprep.subr.bf16.mxu0 %v7379_v49  ;;  %6393 = vmatprep.subr.bf16.mxu1 %v7381_v51  ;;  %v908_v51 = vrot.slane %v903_v63, %v907_v45 }
 0x2c7   :  { %6372 = vmatpush3.bf16.msra.mxu0 %v7380_v52  ;;  %6394 = vmatpush3.bf16.msra.mxu1 %v7382_v53  ;;  %v912_v52 = vrot.slane %v903_v63, %v911_v9 }
 0x2c8   :  { %6373 = vmatprep.subr.bf16.mxu0 %v7383_v58  ;;  %6395 = vmatprep.subr.bf16.mxu1 %v7385_v12 }
 0x2cb   :  { %6374 = vmatpush3.bf16.msra.mxu0 %v7384_v24  ;;  %6396 = vmatpush3.bf16.msra.mxu1 %v7386_v33 }
 0x2cc   :  { %6375 = vmatprep.subr.bf16.mxu0 %v7387_v54  ;;  %6397 = vmatprep.subr.bf16.mxu1 %v7389_v55 }
 0x2cf   :  { %6376 = vmatpush3.bf16.msra.mxu0 %v7388_v18  ;;  %6398 = vmatpush3.bf16.msra.mxu1 %v7390_v41 }
 0x2d0   :  { %6377 = vmatprep.subr.bf16.mxu0 %v7391_v56  ;;  %6399 = vmatprep.subr.bf16.mxu1 %v7393_v57 }
 0x2d3   :  { %6378 = vmatpush3.bf16.msra.mxu0 %v7392_v60  ;;  %6400 = vmatpush3.bf16.msra.mxu1 %v7394_v61 }
 0x2d4   :  { %6379 = vmatprep.subr.bf16.mxu0 %v7395_v62  ;;  %6401 = vmatprep.subr.bf16.mxu1 %v7397_v0 }
 0x2d7   :  { %6380 = vmatpush3.bf16.msra.mxu0 %v7396_v1  ;;  %6402 = vmatpush3.bf16.msra.mxu1 %v7398_v2  ;;  %v923_v1 = vsub.s32 4, %v7824_v22 }
 0x2d8   :  { %6381 = vmatprep.subr.bf16.mxu0 %v7399_v3  ;;  %6403 = vmatprep.subr.bf16.mxu1 %v7401_v4 }
 0x2db   :  { %6382 = vmatpush3.bf16.msra.mxu0 %v7400_v5  ;;  %6404 = vmatpush3.bf16.msra.mxu1 %v7402_v6 }
 0x2dc   :  { %6411 = vmatprep.subr.bf16.mxu0 %v7403_v7 }
 0x2de   :  { %5225 = vmatmul.mubr.bf16.vlgmr.msra.gmra.mrb[16].mxu0 %v7748_v37  ;;  %5266 = vmatmul.mubr.bf16.vlgmr.msra.gmra.mrb[16].mxu1 %v7756_v59  ;;  %v7409_v37 = vld [vmem:[%s7852_s3 + $0x58] sm:$0xff]  }
 0x2df   :  { %6412 = vmatpush3.bf16.msra.mxu0 %v7404_v8  ;;  %v7410_v59 = vld [vmem:[%s7852_s3 + $0x18] sm:$0xff]   ;;  %s7600_s3 = smov [#allocation11]  }
 0x2e0   :  { %6413 = vmatprep.subr.bf16.mxu0 %v7405_v10  ;;  %s5562_s12 = sshll.u32 %s7600_s3, 4  ;;  %s5563_s12 = int_to_ptr.vmem [resolvable:$true] %s5562_s12 }
 0x2e1   :  { %s7561_s13 = scalar_lea.vmem %s5563_s12, 32  ;;  %p7566_p13 = scmp.lt.s32.totalorder %s5563_s12, %s5563_s12 }
 0x2e2   :  { %p7562_p12 = scmp.ne.s32.totalorder %s5563_s12, %s7561_s13  ;;  %p7567_p0 = scmp.lt.s32.totalorder %s7561_s13, %s7561_s13 }
 0x2e3   :  { %6414 = vmatpush3.bf16.msra.mxu0 %v7406_v11  ;;  %v924_v11 = vrot.slane %v903_v63, %v923_v1 }
 0x2e4   :  { %6415 = vmatprep.subr.bf16.mxu0 %v7407_v13  ;;  %p7568_p1 = por %p7567_p0, %p7566_p13 }
 0x2e6   :  { %p7569_p2 = pnand %p7568_p1, %p7562_p12 }
 0x2e7   :  { %6416 = vmatpush3.bf16.msra.mxu0 %v7408_v14 }
 0x2e8   :  { %6417 = vmatprep.subr.bf16.mxu0 %v7409_v37 }
 0x2eb   :  { %6418 = vmatpush3.bf16.msra.mxu0 %v7410_v59 }
 0x2ec   :  { %6419 = vmatprep.subr.bf16.mxu0 %v7411_v50 }
 0x2ef   :  { %6420 = vmatpush3.bf16.msra.mxu0 %v7412_v36 }
 0x2f0   :  { %6421 = vmatprep.subr.bf16.mxu0 %v7413_v15 }
 0x2f3   :  { %6422 = vmatpush3.bf16.msra.mxu0 %v7414_v16 }
 0x2f4   :  { %6423 = vmatprep.subr.bf16.mxu0 %v7415_v28 }
 0x2f7   :  { %6424 = vmatpush3.bf16.msra.mxu0 %v7416_v42 }
 0x2f8   :  { %6425 = vmatprep.subr.bf16.mxu0 %v7417_v19 }
 0x2fb   :  { %6426 = vmatpush3.bf16.msra.mxu0 %v7418_v20 }
 0x331   :  { %v4593_v27 = vpop.f32.mrb[0].mxu0  ;;  %v4937_v29 = vpop.f32.mrb[0].mxu1 }
 0x332   :  { %v6437_v30 = vadd.f32 %v4937_v29, %v916_v25  ;;  %v4595_v31 = vpop.f32.mrb[1].mxu0  ;;  %v4939_v32 = vpop.f32.mrb[1].mxu1  ;;  %v6433_v53 = vadd.f32 %v4593_v27, %v908_v51 }
 0x333   :  { %v6438_v34 = vadd.f32 %v4939_v32, %v920_v26  ;;  %v4597_v35 = vpop.f32.mrb[2].mxu0  ;;  %v4941_v38 = vpop.f32.mrb[2].mxu1  ;;  %v6434_v58 = vadd.f32 %v4595_v31, %v912_v52 }
 0x334   :  { %v6213_v39 = vmul.f32 -1.442695, %v6437_v30  ;;  %v6439_v40 = vadd.f32 %v4941_v38, %v916_v25  ;;  %v4599_v43 = vpop.f32.mrb[3].mxu0  ;;  %v4943_v44 = vpop.f32.mrb[3].mxu1  ;;  %v6435_v54 = vadd.f32 %v4597_v35, %v908_v51 }
 0x335   :  { %v6214_v46 = vmul.f32 -1.442695, %v6438_v34  ;;  %v6440_v48 = vadd.f32 %v4943_v44, %v920_v26  ;;  %v6436_v41 = vadd.f32 %v4599_v43, %v912_v52 }
 0x336   :  { %7419 = vpow2.f32 %v6213_v39  ;;  %v6215_v17 = vmul.f32 -1.442695, %v6439_v40 }
 0x337   :  { %7421 = vpow2.f32 %v6214_v46  ;;  %v6216_v49 = vmul.f32 -1.442695, %v6440_v48 }
 0x338   :  { %7423 = vpow2.f32 %v6215_v17 }
 0x339   :  { %7425 = vpow2.f32 %v6216_v49 }
 0x33a   :  { %7427 = vtanh.f32 %v6433_v53 }
 0x33b   :  { %7429 = vtanh.f32 %v6434_v58 }
 0x340   :  { %v7420_v12 = vpop.eup %7419 }
 0x341   :  { %v7422_v24 = vpop.eup %7421  ;;  %v5290_v33 = vadd.f32 1.0, %v7420_v12 }
 0x342   :  { %v5291_v55 = vadd.f32 1.0, %v7422_v24  ;;  %v7424_v18 = vpop.eup %7423 }
 0x343   :  { %7431 = vrcp.f32 %v5290_v33  ;;  %v5292_v56 = vadd.f32 1.0, %v7424_v18  ;;  %v7426_v57 = vpop.eup %7425 }
 0x344   :  { %7433 = vrcp.f32 %v5291_v55  ;;  %v5293_v60 = vadd.f32 1.0, %v7426_v57  ;;  %v7428_v61 = vpop.eup %7427 }
 0x345   :  { %7435 = vtanh.f32 %v6435_v54  ;;  %v7430_v62 = vpop.eup %7429 }
 0x346   :  { %7437 = vrcp.f32 %v5292_v56 }
 0x347   :  { %7439 = vtanh.f32 %v6436_v41 }
 0x348   :  { %7441 = vrcp.f32 %v5293_v60 }
 0x34d   :  { %v7432_v0 = vpop.eup %7431 }
 0x34e   :  { %v7434_v2 = vpop.eup %7433  ;;  %v5302_v3 = vmul.f32 %v7432_v0, %v7428_v61 }
 0x34f   :  { %v7436_v4 = vpop.eup %7435  ;;  %v5303_v5 = vmul.f32 %v7434_v2, %v7430_v62 }
 0x350   :  { %v7438_v6 = vpop.eup %7437 }
 0x351   :  { %v7440_v7 = vpop.eup %7439  ;;  %v5304_v8 = vmul.f32 %v7438_v6, %v7436_v4  ;;  %v6251_v10 = vpop.f32.mrb[4].mxu0 }
 0x352   :  { %v6273_v13 = vpop.f32.mrb[4].mxu1  ;;  %v7442_v14 = vpop.eup %7441 }
 0x353   :  { %v6252_v37 = vpop.f32.mrb[5].mxu0  ;;  %v6274_v59 = vpop.f32.mrb[5].mxu1  ;;  %v5305_v50 = vmul.f32 %v7442_v14, %v7440_v7  ;;  %v5306_v36 = vpack.c.bf16 %v5304_v8, %v5302_v3 }
 0x354   :  { %v6253_v15 = vadd.f32 %v6252_v37, %v6251_v10  ;;  %v6254_v16 = vpop.f32.mrb[6].mxu0  ;;  %v6275_v28 = vadd.f32 %v6274_v59, %v6273_v13  ;;  %v6276_v42 = vpop.f32.mrb[6].mxu1 }
 0x355   :  { %v6255_v19 = vpop.f32.mrb[7].mxu0  ;;  %v6277_v20 = vpop.f32.mrb[7].mxu1  ;;  %v5307_v21 = vpack.c.bf16 %v5305_v50, %v5303_v5  ;;  %v6217_v50 = vld [vmem:[#allocation8] ss:$0 sm:$0xff] }
 0x356   :  { %v4981_v22 = vadd.f32 %v6253_v15, %v924_v11  ;;  %v6256_v47 = vadd.f32 %v6255_v19, %v6254_v16  ;;  %v6278_v23 = vadd.f32 %v6277_v20, %v6276_v42 }
 0x357   :  { %5475 = vmatprep.mubr.bf16.mxu0 %v5307_v21 }
 0x358   :  { %v4984_v25 = vadd.f32 %v6256_v47, %v924_v11  ;;  %v5022_v26 = vadd.f32 %v6275_v28, %v4981_v22  ;;  %5476 = vmatmul.mubr.bf16.vlgmr.msra.gmra.mrb[20].mxu0 %v5306_v36 }
 0x35a   :  { %v5025_v63 = vadd.f32 %v6278_v23, %v4984_v25 }
 0x371   :  { %v6295_v27 = vpop.f32.mrb[8].mxu0  ;;  %v6317_v29 = vpop.f32.mrb[8].mxu1 }
 0x372   :  { %v6296_v30 = vpop.f32.mrb[9].mxu0  ;;  %v6318_v31 = vpop.f32.mrb[9].mxu1 }
 0x373   :  { %v6297_v32 = vadd.f32 %v6296_v30, %v6295_v27  ;;  %v6298_v34 = vpop.f32.mrb[10].mxu0  ;;  %v6319_v35 = vadd.f32 %v6318_v31, %v6317_v29  ;;  %v6320_v38 = vpop.f32.mrb[10].mxu1 }
 0x374   :  { %v6299_v39 = vpop.f32.mrb[11].mxu0  ;;  %v6321_v40 = vpop.f32.mrb[11].mxu1 }
 0x375   :  { %v5063_v43 = vadd.f32 %v6297_v32, %v5022_v26  ;;  %v6300_v44 = vadd.f32 %v6299_v39, %v6298_v34  ;;  %v6322_v45 = vadd.f32 %v6321_v40, %v6320_v38 }
 0x377   :  { %v5066_v46 = vadd.f32 %v6300_v44, %v5025_v63  ;;  %v5104_v48 = vadd.f32 %v6319_v35, %v5063_v43 }
 0x379   :  { %v5107_v9 = vadd.f32 %v6322_v45, %v5066_v46 }
 0x391   :  { %v6339_v17 = vpop.f32.mrb[12].mxu0  ;;  %v6361_v49 = vpop.f32.mrb[12].mxu1 }
 0x392   :  { %v6340_v51 = vpop.f32.mrb[13].mxu0  ;;  %v6362_v52 = vpop.f32.mrb[13].mxu1 }
 0x393   :  { %v6341_v53 = vadd.f32 %v6340_v51, %v6339_v17  ;;  %v6342_v58 = vpop.f32.mrb[14].mxu0  ;;  %v6363_v12 = vadd.f32 %v6362_v52, %v6361_v49  ;;  %v6364_v24 = vpop.f32.mrb[14].mxu1 }
 0x394   :  { %v6343_v33 = vpop.f32.mrb[15].mxu0  ;;  %v6365_v54 = vpop.f32.mrb[15].mxu1 }
 0x395   :  { %v5145_v55 = vadd.f32 %v6341_v53, %v5104_v48  ;;  %v6344_v18 = vadd.f32 %v6343_v33, %v6342_v58  ;;  %v6366_v41 = vadd.f32 %v6365_v54, %v6364_v24 }
 0x397   :  { %v5148_v56 = vadd.f32 %v6344_v18, %v5107_v9  ;;  %v5186_v57 = vadd.f32 %v6363_v12, %v5145_v55 }
 0x399   :  { %v5189_v60 = vadd.f32 %v6366_v41, %v5148_v56 }
 0x3b1   :  { %v6383_v61 = vpop.f32.mrb[16].mxu0  ;;  %v6405_v62 = vpop.f32.mrb[16].mxu1 }
 0x3b2   :  { %v6384_v0 = vpop.f32.mrb[17].mxu0  ;;  %v6406_v1 = vpop.f32.mrb[17].mxu1 }
 0x3b3   :  { %v6385_v2 = vadd.f32 %v6384_v0, %v6383_v61  ;;  %v6386_v3 = vpop.f32.mrb[18].mxu0  ;;  %v6407_v4 = vadd.f32 %v6406_v1, %v6405_v62  ;;  %v6408_v5 = vpop.f32.mrb[18].mxu1 }
 0x3b4   :  { %v6387_v6 = vpop.f32.mrb[19].mxu0  ;;  %v6409_v7 = vpop.f32.mrb[19].mxu1 }
 0x3b5   :  { %v5227_v8 = vadd.f32 %v6385_v2, %v5186_v57  ;;  %v6388_v10 = vadd.f32 %v6387_v6, %v6386_v3  ;;  %v6410_v11 = vadd.f32 %v6409_v7, %v6408_v5 }
 0x3b7   :  { %v5230_v13 = vadd.f32 %v6388_v10, %v5189_v60  ;;  %v5268_v14 = vadd.f32 %v6407_v4, %v5227_v8 }
 0x3b9   :  { %v5271_v37 = vadd.f32 %v6410_v11, %v5230_v13 }
 0x42b   :  { %v6427_v59 = vpop.f32.mrb[20].mxu0 }
 0x42c   :  { %v6428_v36 = vpop.f32.mrb[21].mxu0 }
 0x42d   :  { %v6429_v15 = vadd.f32 %v6428_v36, %v6427_v59  ;;  %v6430_v16 = vpop.f32.mrb[22].mxu0 }
 0x42e   :  { %v6431_v28 = vpop.f32.mrb[23].mxu0 }
 0x42f   :  { %v5478_v42 = vadd.f32 %v6429_v15, %v6217_v50  ;;  %v6432_v19 = vadd.f32 %v6431_v28, %v6430_v16 }
 0x431   :  { %v5485_v20 = vsel %vm5484_vm0, %v5478_v42, -inf  ;;  %v5481_v21 = vadd.f32 %v6432_v19, %v6217_v50  ;;  %v6234_v50 = vld [vmem:[#allocation10] ss:$0 sm:$0xff] }
 0x432   :  { %v5486_v22 = vrot.slane %v5485_v20, 4 }
 0x433   :  { %v5492_v47 = vsel %vm5484_vm0, %v5481_v21, -inf }
 0x434   :  { %v5487_v23 = vmax.f32 %v5485_v20, %v5486_v22  ;;  %v5493_v25 = vrot.slane %v5492_v47, 4 }
 0x436   :  { %v5488_v26 = vrot.slane %v5487_v23, 2  ;;  %v5494_v63 = vmax.f32 %v5492_v47, %v5493_v25 }
 0x438   :  { %v5489_v27 = vmax.f32 %v5487_v23, %v5488_v26  ;;  %v5495_v29 = vrot.slane %v5494_v63, 2 }
 0x43a   :  { %v5490_v30 = vrot.slane %v5489_v27, 1  ;;  %v5496_v31 = vmax.f32 %v5494_v63, %v5495_v29 }
 0x43c   :  { %v5491_v32 = vmax.f32 %v5489_v27, %v5490_v30  ;;  %v5497_v34 = vrot.slane %v5496_v31, 1 }
 0x43e   :  { %v5499_v35 = vsub.f32 %v5478_v42, %v5491_v32  ;;  %v5498_v38 = vmax.f32 %v5496_v31, %v5497_v34 }
 0x440   :  { %v5501_v39 = vmul.f32 1.442695, %v5499_v35  ;;  %v5500_v40 = vsub.f32 %v5481_v21, %v5498_v38 }
 0x442   :  { %7443 = vpow2.f32 %v5501_v39  ;;  %v5503_v43 = vmul.f32 1.442695, %v5500_v40 }
 0x444   :  { %7445 = vpow2.f32 %v5503_v43 }
 0x44c   :  { %v7444_v44 = vpop.eup %7443 }
 0x44d   :  { %v5505_v45 = vsel %vm5484_vm0, %v7444_v44, 0.0 }
 0x44e   :  { %v7446_v46 = vpop.eup %7445  ;;  %v5506_v48 = vrot.slane %v5505_v45, 4 }
 0x44f   :  { %v5512_v9 = vsel %vm5484_vm0, %v7446_v46, 0.0 }
 0x450   :  { %v5507_v17 = vadd.f32 %v5506_v48, %v5505_v45  ;;  %v5513_v49 = vrot.slane %v5512_v9, 4 }
 0x452   :  { %v5508_v51 = vrot.slane %v5507_v17, 2  ;;  %v5514_v52 = vadd.f32 %v5513_v49, %v5512_v9 }
 0x454   :  { %v5509_v53 = vadd.f32 %v5508_v51, %v5507_v17  ;;  %v5515_v58 = vrot.slane %v5514_v52, 2 }
 0x456   :  { %v5510_v12 = vrot.slane %v5509_v53, 1  ;;  %v5516_v24 = vadd.f32 %v5515_v58, %v5514_v52 }
 0x458   :  { %v5511_v33 = vadd.f32 %v5510_v12, %v5509_v53  ;;  %v5517_v54 = vrot.slane %v5516_v24, 1 }
 0x45a   :  { %7447 = vrcp.f32 %v5511_v33  ;;  %v5518_v55 = vadd.f32 %v5517_v54, %v5516_v24 }
 0x45c   :  { %7449 = vrcp.f32 %v5518_v55 }
 0x464   :  { %v7448_v18 = vpop.eup %7447 }
 0x465   :  { %v5520_v41 = vmul.f32 %v7448_v18, %v7444_v44 }
 0x466   :  { %v7450_v56 = vpop.eup %7449 }
 0x467   :  { %v5522_v57 = vmul.f32 %v7450_v56, %v7446_v46  ;;  %v5523_v60 = vmul.f32 %v5520_v41, %v5268_v14 }
 0x469   :  { %v5524_v61 = vmul.f32 %v5522_v57, %v5271_v37  ;;  %v5525_v62 = vsel %vm5484_vm0, %v5523_v60, 0.0 }
 0x46a   :  { %v5526_v0 = vrot.slane %v5525_v62, 4 }
 0x46b   :  { %v5532_v1 = vsel %vm5484_vm0, %v5524_v61, 0.0 }
 0x46c   :  { %v5527_v2 = vadd.f32 %v5526_v0, %v5525_v62  ;;  %v5533_v3 = vrot.slane %v5532_v1, 4 }
 0x46e   :  { %v5528_v4 = vrot.slane %v5527_v2, 2  ;;  %v5534_v5 = vadd.f32 %v5533_v3, %v5532_v1 }
 0x470   :  { %v5529_v6 = vadd.f32 %v5528_v4, %v5527_v2  ;;  %v5535_v7 = vrot.slane %v5534_v5, 2 }
 0x472   :  { %v5530_v8 = vrot.slane %v5529_v6, 1  ;;  %v5536_v10 = vadd.f32 %v5535_v7, %v5534_v5 }
 0x474   :  { %v5537_v11 = vrot.slane %v5536_v10, 1  ;;  %v5531_v13 = vadd.f32 %v5530_v8, %v5529_v6 }
 0x476   :  { %v5538_v59 = vadd.f32 %v5537_v11, %v5536_v10  ;;  %v5546_v14 = vadd.f32 %v6234_v50, %v5531_v13 }
 0x478   :  { %v5547_v36 = vadd.f32 %v6234_v50, %v5538_v59 }
 0x47a   :  { %v5550_v37 = vrot.slane %v5547_v36, 7 }
 0x47c   :  { %v5552_v15 = vsel %vm5551_vm1, %v5550_v37, %v5546_v14 }
 0x47d   :  { %5555 = vst.msk [vmem:[#allocation11] sm:$0x3] %vm5554_vm2, %v5552_v15 }
 0x47e   :  { %7572 = shalt.err (!%p7569_p2)
}
 0x47f   :  { %s7573_s17 = scalar_lea.hbm %s7855_s6, 32 }
 0x480   :  { %p7574_p3 = scmp.ne.s32.totalorder %s7855_s6, %s7573_s17  ;;  %p7577_p4 = scmp.lt.u32.totalorder %s7573_s17, %s7855_s6 }
 0x482   :  { %p7579_p5 = pnand %p7577_p4, %p7574_p3 }
 0x484   :  { %7582 = shalt.err (!%p7579_p5)
}
 0x485   :  { %5565 = dma.vmem_to_hbm [thread:$0]  %s5563_s12, 32, %s7855_s6, [#allocation4]  }
 0x486   :  { %7589 = dma.done.wait [#allocation4], 32  }
 0x487   :  { %7590 = vsyncadd [#allocation4], 4294967264 }
 0x488   :  { %5569 = vsyncpa [#allocation3], 1 }
 0x489   :  { %5570 = vsyncpa [#allocation6], 1 }
 0x48a   :  { %5571 = vsyncpa [#allocation9], 1 }
 0x48b   :  { %5572 = vsyncpa [#allocation4], 1 }

</bundles_post_ra>
